<compile_context>
chip_gen: v7x
topology: tpu7x:2x2x1
jax: 0.10.0
libtpu: 0.0.40
codegen_flags: <defaults>
</compile_context>

<pallas_src>
import math

import jax
import jax.numpy as jnp
from jax.experimental import pallas as pl
from jax.experimental.pallas import tpu as pltpu

EPS = 1e-5  # nn.LayerNorm default eps


# ---------------------------------------------------------------------------
# math helpers shared by kernel and pure-JAX reference
# ---------------------------------------------------------------------------
def _silu(x):
    return x * jax.nn.sigmoid(x)


def _gelu(x):
    # exact (erf-based) GELU, matching torch.nn.GELU() default
    return 0.5 * x * (1.0 + jax.lax.erf(x * (1.0 / math.sqrt(2.0))))


def _layernorm(x, g, b):
    mu = jnp.mean(x, axis=-1, keepdims=True)
    xc = x - mu
    var = jnp.mean(xc * xc, axis=-1, keepdims=True)
    return xc * jax.lax.rsqrt(var + EPS) * g + b


def _linear(x, w, b):
    # cast LHS to the weight dtype (bf16) -> MXU bf16 path, f32 accumulation.
    return jnp.dot(x.astype(w.dtype), w, preferred_element_type=jnp.float32) + b


def _round_up(n, m):
    return ((n + m - 1) // m) * m


# ---------------------------------------------------------------------------
# Pallas kernel: one batch tile x one DiT layer per grid step
# ---------------------------------------------------------------------------
def dit_kernel(x_ref, t_ref, freq_ref, phase_ref,
               te_w1, te_b1, tt_w, tt_b, tm_w2, tm_b2, tm_w3, tm_b3,
               ip_w, ip_b, ip_g, ip_beta,
               ln1_g, ln1_b, aw, ab,
               ln2_g, ln2_b, fw1, fb1, fw2, fb2,
               fn_g, fn_b,
               op_w1, op_b1, op_w2, op_b2, op_w3, op_b3,
               out_ref, h_ref):
    d = pl.program_id(1)

    # ---- prologue (only at the first depth step of each batch tile) --------
    @pl.when(d == 0)
    def _prologue():
        t = t_ref[...]                                       # (TB, 1) f32
        # full-width sinusoid: sin(t*f) for k<half, cos(t*f)=sin(t*f+pi/2) else
        emb = jnp.sin(t * freq_ref[...] + phase_ref[...])    # (TB, TDIM)

        # advanced_time_embedding Linear -> SiLU, then [te.Linear2 ∘ tm.Linear1]
        # fused into a single matmul (no nonlinearity between them).
        emb = _silu(_linear(emb, te_w1[...], te_b1[...]))
        t_emb = _silu(_linear(emb, tt_w[...], tt_b[...]))
        t_emb = _silu(_linear(t_emb, tm_w2[...], tm_b2[...]))
        t_emb = _linear(t_emb, tm_w3[...], tm_b3[...])

        # input_proj: Linear -> LayerNorm, then add time embedding
        h0 = _layernorm(_linear(x_ref[...], ip_w[...], ip_b[...]),
                        ip_g[...], ip_beta[...])
        h_ref[...] = h0 + t_emb

    # ---- one DiT block (seq len == 1 => MHA == out_proj(v_proj(norm(x)))),
    #      with v_proj and out_proj pre-fused into a single matmul ------------
    h = h_ref[...]
    hn = _layernorm(h, ln1_g[...], ln1_b[...])
    h = h + _linear(hn, aw[...], ab[...])

    hn2 = _layernorm(h, ln2_g[...], ln2_b[...])
    h = h + _linear(_gelu(_linear(hn2, fw1[...], fb1[...])), fw2[...], fb2[...])
    h_ref[...] = h

    # ---- epilogue (only at the last depth step) -----------------------------
    @pl.when(d == pl.num_programs(1) - 1)
    def _epilogue():
        hf = _layernorm(h_ref[...], fn_g[...], fn_b[...])
        hf = _silu(_linear(hf, op_w1[...], op_b1[...]))
        hf = _silu(_linear(hf, op_w2[...], op_b2[...]))
        out_ref[...] = _linear(hf, op_w3[...], op_b3[...])   # lane-dense store


# ---------------------------------------------------------------------------
# host-side parameter fusion (f32, done once)
# ---------------------------------------------------------------------------
def fuse_params(params):
    (te_w1, te_b1, te_w2, te_b2,
     tm_w1, tm_b1, tm_w2, tm_b2, tm_w3, tm_b3,
     ip_w, ip_b, ip_g, ip_beta,
     ln1_g, ln1_b, wv, bv, wo, bo,
     ln2_g, ln2_b, fw1, fb1, fw2, fb2,
     fn_g, fn_b,
     op_w1, op_b1, op_w2, op_b2, op_w3, op_b3) = params

    # advanced_time_embedding's last Linear directly feeds time_mlp's first
    # Linear (no activation between) -> fuse: (tdim,tdim)@(tdim,E).
    tt_w = te_w2 @ tm_w1                                  # (tdim, E)
    tt_b = te_b2 @ tm_w1 + tm_b1                          # (1, E)

    # seq-len-1 attention:  out_proj(v_proj(x)) == x @ (Wv·Wo) + (bv·Wo + bo)
    aw = jnp.einsum('dij,djk->dik', wv, wo)               # (depth, E, E)
    ab = jnp.einsum('dxj,djk->dxk', bv, wo) + bo          # (depth, 1, E)

    return dict(te_w1=te_w1, te_b1=te_b1, tt_w=tt_w, tt_b=tt_b,
                tm_w2=tm_w2, tm_b2=tm_b2, tm_w3=tm_w3, tm_b3=tm_b3,
                ip_w=ip_w, ip_b=ip_b, ip_g=ip_g, ip_beta=ip_beta,
                ln1_g=ln1_g, ln1_b=ln1_b, aw=aw, ab=ab,
                ln2_g=ln2_g, ln2_b=ln2_b, fw1=fw1, fb1=fb1, fw2=fw2, fb2=fb2,
                fn_g=fn_g, fn_b=fn_b,
                op_w1=op_w1, op_b1=op_b1, op_w2=op_w2, op_b2=op_b2,
                op_w3=op_w3, op_b3=op_b3)


# ---------------------------------------------------------------------------
# wrapper: padding, bf16 weight cast, grid/BlockSpec construction
# ---------------------------------------------------------------------------
def enhanced_flow_matching_dit(x, t, params, *, depth, time_embed_dim,
                               batch_tile=128):
    p = fuse_params(params)

    B, input_dim = x.shape
    embed_dim = p['ip_w'].shape[1]
    hidden_dim = p['fw1'].shape[2]
    tdim = time_embed_dim
    bf16 = jnp.bfloat16

    # --- lane-dense padding of the narrow input/output feature dims ---------
    in_pad = _round_up(max(input_dim, 128), 128)
    tb = min(batch_tile, _round_up(B, 8))
    b_pad = _round_up(B, tb)
    nb = b_pad // tb

    xp = jnp.zeros((b_pad, in_pad), jnp.float32).at[:B, :input_dim].set(
        x.astype(jnp.float32))
    tp = jnp.zeros((b_pad, 1), jnp.float32).at[:B, 0].set(t.astype(jnp.float32))

    # --- precomputed sinusoidal-embedding constants (full lane width) -------
    half = tdim // 2
    k = jnp.arange(tdim, dtype=jnp.float32)
    freq_full = jnp.exp(-(k % half) * (math.log(10000.0) / half)).reshape(1, tdim)
    phase = jnp.where(k < half, 0.0, 0.5 * math.pi).astype(
        jnp.float32).reshape(1, tdim)

    # --- bf16 matmul weights (biases / LN params stay f32) ------------------
    ip_w_p = jnp.zeros((in_pad, embed_dim), bf16).at[:input_dim, :].set(
        p['ip_w'].astype(bf16))
    op_w3_p = jnp.zeros((embed_dim, in_pad), bf16).at[:, :input_dim].set(
        p['op_w3'].astype(bf16))
    op_b3_p = jnp.zeros((1, in_pad), jnp.float32).at[:, :input_dim].set(
        p['op_b3'])

    head_consts = [freq_full, phase,
                   p['te_w1'].astype(bf16), p['te_b1'],
                   p['tt_w'].astype(bf16), p['tt_b'],
                   p['tm_w2'].astype(bf16), p['tm_b2'],
                   p['tm_w3'].astype(bf16), p['tm_b3'],
                   ip_w_p, p['ip_b'], p['ip_g'], p['ip_beta']]
    layer_params = [p['ln1_g'], p['ln1_b'],
                    p['aw'].astype(bf16), p['ab'],
                    p['ln2_g'], p['ln2_b'],
                    p['fw1'].astype(bf16), p['fb1'],
                    p['fw2'].astype(bf16), p['fb2']]
    tail_consts = [p['fn_g'], p['fn_b'],
                   p['op_w1'].astype(bf16), p['op_b1'],
                   p['op_w2'].astype(bf16), p['op_b2'],
                   op_w3_p, op_b3_p]
    args = [xp, tp] + head_consts + layer_params + tail_consts

    # --- BlockSpecs ----------------------------------------------------------
    def const_spec(a):
        # whole small array, constant block index -> fetched once, stays resident
        return pl.BlockSpec(a.shape, lambda i, d, nd=a.ndim: (0,) * nd)

    def layer_spec(a):
        # (depth, ...) stacked weights: stream layer d's slice (double-buffered)
        return pl.BlockSpec((None,) + a.shape[1:],
                            lambda i, d, nd=a.ndim: (d,) + (0,) * (nd - 1))

    in_specs = ([pl.BlockSpec((tb, in_pad), lambda i, d: (i, 0)),
                 pl.BlockSpec((tb, 1), lambda i, d: (i, 0))]
                + [const_spec(a) for a in head_consts]
                + [layer_spec(a) for a in layer_params]
                + [const_spec(a) for a in tail_consts])
    out_spec = pl.BlockSpec((tb, in_pad), lambda i, d: (i, 0))

    # --- cost estimate (advisory) --------------------------------------------
    f_head = 2 * (tdim * tdim + tdim * embed_dim + 2 * embed_dim * embed_dim
                  + in_pad * embed_dim)
    f_layer = 2 * (embed_dim * embed_dim + 2 * embed_dim * hidden_dim)
    f_tail = 2 * (2 * embed_dim * embed_dim + embed_dim * in_pad)
    flops = int(b_pad * (f_head + depth * f_layer + f_tail))
    transcend = int(b_pad * (tdim + 3 * embed_dim
                             + depth * hidden_dim + 2 * embed_dim))
    bytes_accessed = int(sum(int(a.size) * a.dtype.itemsize for a in args)
                         + b_pad * in_pad * 4)
    cost = pl.CostEstimate(flops=flops, transcendentals=transcend,
                           bytes_accessed=bytes_accessed)

    out = pl.pallas_call(
        dit_kernel,
        out_shape=jax.ShapeDtypeStruct((b_pad, in_pad), jnp.float32),
        grid_spec=pltpu.PrefetchScalarGridSpec(
            num_scalar_prefetch=0,
            grid=(nb, depth),
            in_specs=in_specs,
            out_specs=out_spec,
            scratch_shapes=[pltpu.VMEM((tb, embed_dim), jnp.float32)]),
        compiler_params=pltpu.CompilerParams(
            dimension_semantics=("parallel", "arbitrary"),
            vmem_limit_bytes=32 * 1024 * 1024),
        cost_estimate=cost,
    )(*args)

    return out[:B, :input_dim]


# ---------------------------------------------------------------------------
# deterministic parameter construction (shapes from the module __init__)
# ---------------------------------------------------------------------------
def init_params(key, input_dim, embed_dim, depth, hidden_dim, time_embed_dim):
    state = [key]

    def nk():
        state[0], sub = jax.random.split(state[0])
        return sub

    def lin(fi, fo):
        w = (jax.random.normal(nk(), (fi, fo)) * 0.02).astype(jnp.float32)
        b = (jax.random.normal(nk(), (1, fo)) * 0.01).astype(jnp.float32)
        return w, b

    def ln(dim):
        return jnp.ones((1, dim), jnp.float32), jnp.zeros((1, dim), jnp.float32)

    te_w1, te_b1 = lin(time_embed_dim, time_embed_dim)
    te_w2, te_b2 = lin(time_embed_dim, time_embed_dim)
    tm_w1, tm_b1 = lin(time_embed_dim, embed_dim)
    tm_w2, tm_b2 = lin(embed_dim, embed_dim)
    tm_w3, tm_b3 = lin(embed_dim, embed_dim)
    ip_w, ip_b = lin(input_dim, embed_dim)
    ip_g, ip_beta = ln(embed_dim)

    names = ["ln1_g", "ln1_b", "wv", "bv", "wo", "bo",
             "ln2_g", "ln2_b", "fw1", "fb1", "fw2", "fb2"]
    blk = {n: [] for n in names}
    for _ in range(depth):
        g1, b1 = ln(embed_dim)
        wv_, bv_ = lin(embed_dim, embed_dim)     # v-projection slice of in_proj
        wo_, bo_ = lin(embed_dim, embed_dim)     # attention out_proj
        g2, b2 = ln(embed_dim)
        fw1_, fb1_ = lin(embed_dim, hidden_dim)
        fw2_, fb2_ = lin(hidden_dim, embed_dim)
        for n, v in zip(names, [g1, b1, wv_, bv_, wo_, bo_,
                                g2, b2, fw1_, fb1_, fw2_, fb2_]):
            blk[n].append(v)
    blk = {n: jnp.stack(v) for n, v in blk.items()}

    fn_g, fn_b = ln(embed_dim)
    op_w1, op_b1 = lin(embed_dim, embed_dim)
    op_w2, op_b2 = lin(embed_dim, embed_dim)
    op_w3, op_b3 = lin(embed_dim, input_dim)

    return (te_w1, te_b1, te_w2, te_b2,
            tm_w1, tm_b1, tm_w2, tm_b2, tm_w3, tm_b3,
            ip_w, ip_b, ip_g, ip_beta,
            blk["ln1_g"], blk["ln1_b"], blk["wv"], blk["bv"], blk["wo"], blk["bo"],
            blk["ln2_g"], blk["ln2_b"], blk["fw1"], blk["fb1"], blk["fw2"], blk["fb2"],
            fn_g, fn_b,
            op_w1, op_b1, op_w2, op_b2, op_w3, op_b3)


# ---------------------------------------------------------------------------
# pure-JAX reference.  Structurally faithful to the PyTorch module (concat
# sin/cos embedding, separate v_proj / out_proj, unfused time-embedding tail),
# with bf16 weights / f32 accumulation like the kernel.  The tolerance absorbs
# the f32-fused-weight vs sequential-bf16-matmul rounding difference (~1e-3).
# ---------------------------------------------------------------------------
def ref_forward(x, t, params, *, depth, time_embed_dim):
    (te_w1, te_b1, te_w2, te_b2,
     tm_w1, tm_b1, tm_w2, tm_b2, tm_w3, tm_b3,
     ip_w, ip_b, ip_g, ip_beta,
     ln1_g, ln1_b, wv, bv, wo, bo,
     ln2_g, ln2_b, fw1, fb1, fw2, fb2,
     fn_g, fn_b,
     op_w1, op_b1, op_w2, op_b2, op_w3, op_b3) = params
    bf = jnp.bfloat16

    half = time_embed_dim // 2
    freqs = jnp.exp(-jnp.arange(half, dtype=jnp.float32) * math.log(10000.0) / half)
    a = t[:, None].astype(jnp.float32) * freqs[None, :]
    emb = jnp.concatenate([jnp.sin(a), jnp.cos(a)], axis=-1)
    emb = _silu(_linear(emb, te_w1.astype(bf), te_b1))
    t_emb = _linear(emb, te_w2.astype(bf), te_b2)
    t_emb = _silu(_linear(t_emb, tm_w1.astype(bf), tm_b1))
    t_emb = _silu(_linear(t_emb, tm_w2.astype(bf), tm_b2))
    t_emb = _linear(t_emb, tm_w3.astype(bf), tm_b3)

    h = _layernorm(_linear(x, ip_w.astype(bf), ip_b), ip_g, ip_beta) + t_emb
    for d in range(depth):
        hn = _layernorm(h, ln1_g[d], ln1_b[d])
        h = h + _linear(_linear(hn, wv[d].astype(bf), bv[d]), wo[d].astype(bf), bo[d])
        hn2 = _layernorm(h, ln2_g[d], ln2_b[d])
        h = h + _linear(_gelu(_linear(hn2, fw1[d].astype(bf), fb1[d])),
                        fw2[d].astype(bf), fb2[d])
    h = _layernorm(h, fn_g, fn_b)
    h = _silu(_linear(h, op_w1.astype(bf), op_b1))
    h = _silu(_linear(h, op_w2.astype(bf), op_b2))
    return _linear(h, op_w3.astype(bf), op_b3)


# ---------------------------------------------------------------------------
if __name__ == "__main__":
    B = 16
    INPUT_DIM = 32
    EMBED_DIM = 128
    TIME_EMBED_DIM = 128
    DEPTH = 2
    MLP_RATIO = 4.0
    HIDDEN = int(EMBED_DIM * MLP_RATIO)

    key = jax.random.PRNGKey(0)
    kx, kt, kp = jax.random.split(key, 3)
    x = jax.random.normal(kx, (B, INPUT_DIM), jnp.float32)   # latent vectors
    t = jax.random.uniform(kt, (B,), jnp.float32)            # flow times

    params = init_params(kp, INPUT_DIM, EMBED_DIM, DEPTH, HIDDEN, TIME_EMBED_DIM)

    # batch_tile=8 keeps the demo tiny while exercising the (batch, depth) grid:
    # grid = (2, 2).  For production sizes use the default batch_tile=128+.
    velocity = enhanced_flow_matching_dit(
        x, t, params, depth=DEPTH, time_embed_dim=TIME_EMBED_DIM, batch_tile=8)
    velocity = jax.block_until_ready(velocity)

    ref = ref_forward(x, t, params, depth=DEPTH, time_embed_dim=TIME_EMBED_DIM)

    assert velocity.shape == (B, INPUT_DIM)
    assert bool(jnp.all(jnp.isfinite(velocity)))
    err = float(jnp.max(jnp.abs(velocity - ref)))
    assert bool(jnp.allclose(velocity, ref, atol=1e-2, rtol=1e-2)), err
    print("KERNEL_OK")
</pallas_src>

<mosaic_0001>
module attributes {stable_mosaic.version = 11 : i64} {
  func.func @dit_kernel(%arg0: i32, %arg1: i32, %arg2: memref<8x128xf32, #tpu.memory_space<vmem>>, %arg3: memref<8x1xf32, #tpu.memory_space<vmem>>, %arg4: memref<1x128xf32, #tpu.memory_space<vmem>>, %arg5: memref<1x128xf32, #tpu.memory_space<vmem>>, %arg6: memref<128x128xbf16, #tpu.memory_space<vmem>>, %arg7: memref<1x128xf32, #tpu.memory_space<vmem>>, %arg8: memref<128x128xbf16, #tpu.memory_space<vmem>>, %arg9: memref<1x128xf32, #tpu.memory_space<vmem>>, %arg10: memref<128x128xbf16, #tpu.memory_space<vmem>>, %arg11: memref<1x128xf32, #tpu.memory_space<vmem>>, %arg12: memref<128x128xbf16, #tpu.memory_space<vmem>>, %arg13: memref<1x128xf32, #tpu.memory_space<vmem>>, %arg14: memref<128x128xbf16, #tpu.memory_space<vmem>>, %arg15: memref<1x128xf32, #tpu.memory_space<vmem>>, %arg16: memref<1x128xf32, #tpu.memory_space<vmem>>, %arg17: memref<1x128xf32, #tpu.memory_space<vmem>>, %arg18: memref<1x1x128xf32, #tpu.memory_space<vmem>>, %arg19: memref<1x1x128xf32, #tpu.memory_space<vmem>>, %arg20: memref<1x128x128xbf16, #tpu.memory_space<vmem>>, %arg21: memref<1x1x128xf32, #tpu.memory_space<vmem>>, %arg22: memref<1x1x128xf32, #tpu.memory_space<vmem>>, %arg23: memref<1x1x128xf32, #tpu.memory_space<vmem>>, %arg24: memref<1x128x512xbf16, #tpu.memory_space<vmem>>, %arg25: memref<1x1x512xf32, #tpu.memory_space<vmem>>, %arg26: memref<1x512x128xbf16, #tpu.memory_space<vmem>>, %arg27: memref<1x1x128xf32, #tpu.memory_space<vmem>>, %arg28: memref<1x128xf32, #tpu.memory_space<vmem>>, %arg29: memref<1x128xf32, #tpu.memory_space<vmem>>, %arg30: memref<128x128xbf16, #tpu.memory_space<vmem>>, %arg31: memref<1x128xf32, #tpu.memory_space<vmem>>, %arg32: memref<128x128xbf16, #tpu.memory_space<vmem>>, %arg33: memref<1x128xf32, #tpu.memory_space<vmem>>, %arg34: memref<128x128xbf16, #tpu.memory_space<vmem>>, %arg35: memref<1x128xf32, #tpu.memory_space<vmem>>, %arg36: memref<8x128xf32, #tpu.memory_space<vmem>>, %arg37: memref<8x128xf32, #tpu.memory_space<vmem>>) attributes {dimension_semantics = [#tpu.dimension_semantics<parallel>, #tpu.dimension_semantics<arbitrary>], iteration_bounds = array<i64: 2, 2>, scalar_prefetch = 0 : i64, scratch_operands = 1 : i64, tpu.core_type = #tpu.core_type<tc>, window_params = [{transform_indices = @transform_0, window_bounds = array<i64: 8, 128>}, {transform_indices = @transform_1, window_bounds = array<i64: 8, 1>}, {pipeline_mode = #tpu.pipeline_mode<synchronous>, transform_indices = @transform_2, window_bounds = array<i64: 1, 128>}, {pipeline_mode = #tpu.pipeline_mode<synchronous>, transform_indices = @transform_3, window_bounds = array<i64: 1, 128>}, {pipeline_mode = #tpu.pipeline_mode<synchronous>, transform_indices = @transform_4, window_bounds = array<i64: 128, 128>}, {pipeline_mode = #tpu.pipeline_mode<synchronous>, transform_indices = @transform_5, window_bounds = array<i64: 1, 128>}, {pipeline_mode = #tpu.pipeline_mode<synchronous>, transform_indices = @transform_6, window_bounds = array<i64: 128, 128>}, {pipeline_mode = #tpu.pipeline_mode<synchronous>, transform_indices = @transform_7, window_bounds = array<i64: 1, 128>}, {pipeline_mode = #tpu.pipeline_mode<synchronous>, transform_indices = @transform_8, window_bounds = array<i64: 128, 128>}, {pipeline_mode = #tpu.pipeline_mode<synchronous>, transform_indices = @transform_9, window_bounds = array<i64: 1, 128>}, {pipeline_mode = #tpu.pipeline_mode<synchronous>, transform_indices = @transform_10, window_bounds = array<i64: 128, 128>}, {pipeline_mode = #tpu.pipeline_mode<synchronous>, transform_indices = @transform_11, window_bounds = array<i64: 1, 128>}, {pipeline_mode = #tpu.pipeline_mode<synchronous>, transform_indices = @transform_12, window_bounds = array<i64: 128, 128>}, {pipeline_mode = #tpu.pipeline_mode<synchronous>, transform_indices = @transform_13, window_bounds = array<i64: 1, 128>}, {pipeline_mode = #tpu.pipeline_mode<synchronous>, transform_indices = @transform_14, window_bounds = array<i64: 1, 128>}, {pipeline_mode = #tpu.pipeline_mode<synchronous>, transform_indices = @transform_15, window_bounds = array<i64: 1, 128>}, {transform_indices = @transform_16, window_bounds = array<i64: 1, 1, 128>}, {transform_indices = @transform_17, window_bounds = array<i64: 1, 1, 128>}, {transform_indices = @transform_18, window_bounds = array<i64: 1, 128, 128>}, {transform_indices = @transform_19, window_bounds = array<i64: 1, 1, 128>}, {transform_indices = @transform_20, window_bounds = array<i64: 1, 1, 128>}, {transform_indices = @transform_21, window_bounds = array<i64: 1, 1, 128>}, {transform_indices = @transform_22, window_bounds = array<i64: 1, 128, 512>}, {transform_indices = @transform_23, window_bounds = array<i64: 1, 1, 512>}, {transform_indices = @transform_24, window_bounds = array<i64: 1, 512, 128>}, {transform_indices = @transform_25, window_bounds = array<i64: 1, 1, 128>}, {pipeline_mode = #tpu.pipeline_mode<synchronous>, transform_indices = @transform_26, window_bounds = array<i64: 1, 128>}, {pipeline_mode = #tpu.pipeline_mode<synchronous>, transform_indices = @transform_27, window_bounds = array<i64: 1, 128>}, {pipeline_mode = #tpu.pipeline_mode<synchronous>, transform_indices = @transform_28, window_bounds = array<i64: 128, 128>}, {pipeline_mode = #tpu.pipeline_mode<synchronous>, transform_indices = @transform_29, window_bounds = array<i64: 1, 128>}, {pipeline_mode = #tpu.pipeline_mode<synchronous>, transform_indices = @transform_30, window_bounds = array<i64: 128, 128>}, {pipeline_mode = #tpu.pipeline_mode<synchronous>, transform_indices = @transform_31, window_bounds = array<i64: 1, 128>}, {pipeline_mode = #tpu.pipeline_mode<synchronous>, transform_indices = @transform_32, window_bounds = array<i64: 128, 128>}, {pipeline_mode = #tpu.pipeline_mode<synchronous>, transform_indices = @transform_33, window_bounds = array<i64: 1, 128>}, {transform_indices = @transform_34, window_bounds = array<i64: 8, 128>}]} {
    %c0_i32 = arith.constant 0 : i32
    %0 = arith.cmpi eq, %arg1, %c0_i32 : i32
    %1 = arith.extui %0 : i1 to i32
    %c0_i32_0 = arith.constant 0 : i32
    %2 = arith.cmpi ne, %1, %c0_i32_0 : i32
    scf.if %2 {
      %c0_50 = arith.constant 0 : index
      %c0_51 = arith.constant 0 : index
      %90 = vector.load %arg3[%c0_50, %c0_51] : memref<8x1xf32, #tpu.memory_space<vmem>>, vector<8x1xf32>
      %c0_52 = arith.constant 0 : index
      %c0_53 = arith.constant 0 : index
      %91 = vector.load %arg4[%c0_52, %c0_53] : memref<1x128xf32, #tpu.memory_space<vmem>>, vector<1x128xf32>
      %92 = vector.broadcast %90 : vector<8x1xf32> to vector<8x128xf32>
      %93 = vector.broadcast %91 : vector<1x128xf32> to vector<8x128xf32>
      %94 = arith.mulf %92, %93 : vector<8x128xf32>
      %c0_54 = arith.constant 0 : index
      %c0_55 = arith.constant 0 : index
      %95 = vector.load %arg5[%c0_54, %c0_55] : memref<1x128xf32, #tpu.memory_space<vmem>>, vector<1x128xf32>
      %96 = vector.broadcast %95 : vector<1x128xf32> to vector<8x128xf32>
      %97 = arith.addf %94, %96 : vector<8x128xf32>
      %98 = math.sin %97 : vector<8x128xf32>
      %c0_56 = arith.constant 0 : index
      %c0_57 = arith.constant 0 : index
      %99 = vector.load %arg6[%c0_56, %c0_57] : memref<128x128xbf16, #tpu.memory_space<vmem>>, vector<128x128xbf16>
      %c0_58 = arith.constant 0 : index
      %c0_59 = arith.constant 0 : index
      %100 = vector.load %arg7[%c0_58, %c0_59] : memref<1x128xf32, #tpu.memory_space<vmem>>, vector<1x128xf32>
      %101 = arith.truncf %98 : vector<8x128xf32> to vector<8x128xbf16>
      %cst_60 = arith.constant dense<0.000000e+00> : vector<8x128xf32>
      %102 = tpu.matmul %101, %99, %cst_60 {dimension_numbers = #tpu.dot_dimension_numbers<[1], [0], [0], [1], [0, 0, 1, 1], [], []>} : vector<8x128xbf16>, vector<128x128xbf16>, vector<8x128xf32> -> vector<8x128xf32>
      %103 = vector.broadcast %100 : vector<1x128xf32> to vector<8x128xf32>
      %104 = arith.addf %102, %103 : vector<8x128xf32>
      %105 = arith.negf %104 : vector<8x128xf32>
      %106 = math.exp %105 : vector<8x128xf32>
      %cst_61 = arith.constant 1.000000e+00 : f32
      %107 = vector.broadcast %cst_61 : f32 to vector<8x128xf32>
      %108 = arith.addf %107, %106 : vector<8x128xf32>
      %109 = arith.divf %107, %108 : vector<8x128xf32>
      %110 = arith.mulf %104, %109 : vector<8x128xf32>
      %c0_62 = arith.constant 0 : index
      %c0_63 = arith.constant 0 : index
      %111 = vector.load %arg8[%c0_62, %c0_63] : memref<128x128xbf16, #tpu.memory_space<vmem>>, vector<128x128xbf16>
      %c0_64 = arith.constant 0 : index
      %c0_65 = arith.constant 0 : index
      %112 = vector.load %arg9[%c0_64, %c0_65] : memref<1x128xf32, #tpu.memory_space<vmem>>, vector<1x128xf32>
      %113 = arith.truncf %110 : vector<8x128xf32> to vector<8x128xbf16>
      %cst_66 = arith.constant dense<0.000000e+00> : vector<8x128xf32>
      %114 = tpu.matmul %113, %111, %cst_66 {dimension_numbers = #tpu.dot_dimension_numbers<[1], [0], [0], [1], [0, 0, 1, 1], [], []>} : vector<8x128xbf16>, vector<128x128xbf16>, vector<8x128xf32> -> vector<8x128xf32>
      %115 = vector.broadcast %112 : vector<1x128xf32> to vector<8x128xf32>
      %116 = arith.addf %114, %115 : vector<8x128xf32>
      %117 = arith.negf %116 : vector<8x128xf32>
      %118 = math.exp %117 : vector<8x128xf32>
      %cst_67 = arith.constant 1.000000e+00 : f32
      %119 = vector.broadcast %cst_67 : f32 to vector<8x128xf32>
      %120 = arith.addf %119, %118 : vector<8x128xf32>
      %121 = arith.divf %119, %120 : vector<8x128xf32>
      %122 = arith.mulf %116, %121 : vector<8x128xf32>
      %c0_68 = arith.constant 0 : index
      %c0_69 = arith.constant 0 : index
      %123 = vector.load %arg10[%c0_68, %c0_69] : memref<128x128xbf16, #tpu.memory_space<vmem>>, vector<128x128xbf16>
      %c0_70 = arith.constant 0 : index
      %c0_71 = arith.constant 0 : index
      %124 = vector.load %arg11[%c0_70, %c0_71] : memref<1x128xf32, #tpu.memory_space<vmem>>, vector<1x128xf32>
      %125 = arith.truncf %122 : vector<8x128xf32> to vector<8x128xbf16>
      %cst_72 = arith.constant dense<0.000000e+00> : vector<8x128xf32>
      %126 = tpu.matmul %125, %123, %cst_72 {dimension_numbers = #tpu.dot_dimension_numbers<[1], [0], [0], [1], [0, 0, 1, 1], [], []>} : vector<8x128xbf16>, vector<128x128xbf16>, vector<8x128xf32> -> vector<8x128xf32>
      %127 = vector.broadcast %124 : vector<1x128xf32> to vector<8x128xf32>
      %128 = arith.addf %126, %127 : vector<8x128xf32>
      %129 = arith.negf %128 : vector<8x128xf32>
      %130 = math.exp %129 : vector<8x128xf32>
      %cst_73 = arith.constant 1.000000e+00 : f32
      %131 = vector.broadcast %cst_73 : f32 to vector<8x128xf32>
      %132 = arith.addf %131, %130 : vector<8x128xf32>
      %133 = arith.divf %131, %132 : vector<8x128xf32>
      %134 = arith.mulf %128, %133 : vector<8x128xf32>
      %c0_74 = arith.constant 0 : index
      %c0_75 = arith.constant 0 : index
      %135 = vector.load %arg12[%c0_74, %c0_75] : memref<128x128xbf16, #tpu.memory_space<vmem>>, vector<128x128xbf16>
      %c0_76 = arith.constant 0 : index
      %c0_77 = arith.constant 0 : index
      %136 = vector.load %arg13[%c0_76, %c0_77] : memref<1x128xf32, #tpu.memory_space<vmem>>, vector<1x128xf32>
      %137 = arith.truncf %134 : vector<8x128xf32> to vector<8x128xbf16>
      %cst_78 = arith.constant dense<0.000000e+00> : vector<8x128xf32>
      %138 = tpu.matmul %137, %135, %cst_78 {dimension_numbers = #tpu.dot_dimension_numbers<[1], [0], [0], [1], [0, 0, 1, 1], [], []>} : vector<8x128xbf16>, vector<128x128xbf16>, vector<8x128xf32> -> vector<8x128xf32>
      %139 = vector.broadcast %136 : vector<1x128xf32> to vector<8x128xf32>
      %140 = arith.addf %138, %139 : vector<8x128xf32>
      %c0_79 = arith.constant 0 : index
      %c0_80 = arith.constant 0 : index
      %141 = vector.load %arg2[%c0_79, %c0_80] : memref<8x128xf32, #tpu.memory_space<vmem>>, vector<8x128xf32>
      %c0_81 = arith.constant 0 : index
      %c0_82 = arith.constant 0 : index
      %142 = vector.load %arg14[%c0_81, %c0_82] : memref<128x128xbf16, #tpu.memory_space<vmem>>, vector<128x128xbf16>
      %c0_83 = arith.constant 0 : index
      %c0_84 = arith.constant 0 : index
      %143 = vector.load %arg15[%c0_83, %c0_84] : memref<1x128xf32, #tpu.memory_space<vmem>>, vector<1x128xf32>
      %144 = arith.truncf %141 : vector<8x128xf32> to vector<8x128xbf16>
      %cst_85 = arith.constant dense<0.000000e+00> : vector<8x128xf32>
      %145 = tpu.matmul %144, %142, %cst_85 {dimension_numbers = #tpu.dot_dimension_numbers<[1], [0], [0], [1], [0, 0, 1, 1], [], []>} : vector<8x128xbf16>, vector<128x128xbf16>, vector<8x128xf32> -> vector<8x128xf32>
      %146 = vector.broadcast %143 : vector<1x128xf32> to vector<8x128xf32>
      %147 = arith.addf %145, %146 : vector<8x128xf32>
      %c0_86 = arith.constant 0 : index
      %c0_87 = arith.constant 0 : index
      %148 = vector.load %arg16[%c0_86, %c0_87] : memref<1x128xf32, #tpu.memory_space<vmem>>, vector<1x128xf32>
      %c0_88 = arith.constant 0 : index
      %c0_89 = arith.constant 0 : index
      %149 = vector.load %arg17[%c0_88, %c0_89] : memref<1x128xf32, #tpu.memory_space<vmem>>, vector<1x128xf32>
      %cst_90 = arith.constant dense<0.000000e+00> : vector<8xf32>
      %150 = vector.multi_reduction <add>, %147, %cst_90 [1] : vector<8x128xf32> to vector<8xf32>
      %151 = vector.shape_cast %150 : vector<8xf32> to vector<8x1xf32>
      %cst_91 = arith.constant 1.280000e+02 : f32
      %152 = vector.broadcast %cst_91 : f32 to vector<8x1xf32>
      %153 = arith.divf %151, %152 : vector<8x1xf32>
      %154 = vector.broadcast %153 : vector<8x1xf32> to vector<8x128xf32>
      %155 = arith.subf %147, %154 : vector<8x128xf32>
      %156 = arith.mulf %155, %155 : vector<8x128xf32>
      %cst_92 = arith.constant dense<0.000000e+00> : vector<8xf32>
      %157 = vector.multi_reduction <add>, %156, %cst_92 [1] : vector<8x128xf32> to vector<8xf32>
      %158 = vector.shape_cast %157 : vector<8xf32> to vector<8x1xf32>
      %cst_93 = arith.constant 1.280000e+02 : f32
      %159 = vector.broadcast %cst_93 : f32 to vector<8x1xf32>
      %160 = arith.divf %158, %159 : vector<8x1xf32>
      %cst_94 = arith.constant 9.99999974E-6 : f32
      %161 = vector.broadcast %cst_94 : f32 to vector<8x1xf32>
      %162 = arith.addf %160, %161 : vector<8x1xf32>
      %163 = math.rsqrt %162 : vector<8x1xf32>
      %164 = vector.broadcast %163 : vector<8x1xf32> to vector<8x128xf32>
      %165 = arith.mulf %155, %164 : vector<8x128xf32>
      %166 = vector.broadcast %148 : vector<1x128xf32> to vector<8x128xf32>
      %167 = arith.mulf %165, %166 : vector<8x128xf32>
      %168 = vector.broadcast %149 : vector<1x128xf32> to vector<8x128xf32>
      %169 = arith.addf %167, %168 : vector<8x128xf32>
      %170 = arith.addf %169, %140 : vector<8x128xf32>
      %c0_95 = arith.constant 0 : index
      %c0_96 = arith.constant 0 : index
      %171 = vector.load %arg37[%c0_95, %c0_96] : memref<8x128xf32, #tpu.memory_space<vmem>>, vector<8x128xf32>
      tpu.vector_store %arg37[%c0_95, %c0_96], %170 {strides = array<i32>} : memref<8x128xf32, #tpu.memory_space<vmem>>, vector<8x128xf32>,
    } else {
    }
    %c0 = arith.constant 0 : index
    %c0_1 = arith.constant 0 : index
    %3 = vector.load %arg37[%c0, %c0_1] : memref<8x128xf32, #tpu.memory_space<vmem>>, vector<8x128xf32>
    %c0_2 = arith.constant 0 : index
    %c0_3 = arith.constant 0 : index
    %c0_4 = arith.constant 0 : index
    %4 = vector.load %arg18[%c0_2, %c0_3, %c0_4] : memref<1x1x128xf32, #tpu.memory_space<vmem>>, vector<1x1x128xf32>
    %5 = vector.shape_cast %4 : vector<1x1x128xf32> to vector<1x128xf32>
    %c0_5 = arith.constant 0 : index
    %c0_6 = arith.constant 0 : index
    %c0_7 = arith.constant 0 : index
    %6 = vector.load %arg19[%c0_5, %c0_6, %c0_7] : memref<1x1x128xf32, #tpu.memory_space<vmem>>, vector<1x1x128xf32>
    %7 = vector.shape_cast %6 : vector<1x1x128xf32> to vector<1x128xf32>
    %cst = arith.constant dense<0.000000e+00> : vector<8xf32>
    %8 = vector.multi_reduction <add>, %3, %cst [1] : vector<8x128xf32> to vector<8xf32>
    %9 = vector.shape_cast %8 : vector<8xf32> to vector<8x1xf32>
    %cst_8 = arith.constant 1.280000e+02 : f32
    %10 = vector.broadcast %cst_8 : f32 to vector<8x1xf32>
    %11 = arith.divf %9, %10 : vector<8x1xf32>
    %12 = vector.broadcast %11 : vector<8x1xf32> to vector<8x128xf32>
    %13 = arith.subf %3, %12 : vector<8x128xf32>
    %14 = arith.mulf %13, %13 : vector<8x128xf32>
    %cst_9 = arith.constant dense<0.000000e+00> : vector<8xf32>
    %15 = vector.multi_reduction <add>, %14, %cst_9 [1] : vector<8x128xf32> to vector<8xf32>
    %16 = vector.shape_cast %15 : vector<8xf32> to vector<8x1xf32>
    %cst_10 = arith.constant 1.280000e+02 : f32
    %17 = vector.broadcast %cst_10 : f32 to vector<8x1xf32>
    %18 = arith.divf %16, %17 : vector<8x1xf32>
    %cst_11 = arith.constant 9.99999974E-6 : f32
    %19 = vector.broadcast %cst_11 : f32 to vector<8x1xf32>
    %20 = arith.addf %18, %19 : vector<8x1xf32>
    %21 = math.rsqrt %20 : vector<8x1xf32>
    %22 = vector.broadcast %21 : vector<8x1xf32> to vector<8x128xf32>
    %23 = arith.mulf %13, %22 : vector<8x128xf32>
    %24 = vector.broadcast %5 : vector<1x128xf32> to vector<8x128xf32>
    %25 = arith.mulf %23, %24 : vector<8x128xf32>
    %26 = vector.broadcast %7 : vector<1x128xf32> to vector<8x128xf32>
    %27 = arith.addf %25, %26 : vector<8x128xf32>
    %c0_12 = arith.constant 0 : index
    %c0_13 = arith.constant 0 : index
    %c0_14 = arith.constant 0 : index
    %28 = vector.load %arg20[%c0_12, %c0_13, %c0_14] : memref<1x128x128xbf16, #tpu.memory_space<vmem>>, vector<1x128x128xbf16>
    %29 = vector.shape_cast %28 : vector<1x128x128xbf16> to vector<128x128xbf16>
    %c0_15 = arith.constant 0 : index
    %c0_16 = arith.constant 0 : index
    %c0_17 = arith.constant 0 : index
    %30 = vector.load %arg21[%c0_15, %c0_16, %c0_17] : memref<1x1x128xf32, #tpu.memory_space<vmem>>, vector<1x1x128xf32>
    %31 = vector.shape_cast %30 : vector<1x1x128xf32> to vector<1x128xf32>
    %32 = arith.truncf %27 : vector<8x128xf32> to vector<8x128xbf16>
    %cst_18 = arith.constant dense<0.000000e+00> : vector<8x128xf32>
    %33 = tpu.matmul %32, %29, %cst_18 {dimension_numbers = #tpu.dot_dimension_numbers<[1], [0], [0], [1], [0, 0, 1, 1], [], []>} : vector<8x128xbf16>, vector<128x128xbf16>, vector<8x128xf32> -> vector<8x128xf32>
    %34 = vector.broadcast %31 : vector<1x128xf32> to vector<8x128xf32>
    %35 = arith.addf %33, %34 : vector<8x128xf32>
    %36 = arith.addf %3, %35 : vector<8x128xf32>
    %c0_19 = arith.constant 0 : index
    %c0_20 = arith.constant 0 : index
    %c0_21 = arith.constant 0 : index
    %37 = vector.load %arg22[%c0_19, %c0_20, %c0_21] : memref<1x1x128xf32, #tpu.memory_space<vmem>>, vector<1x1x128xf32>
    %38 = vector.shape_cast %37 : vector<1x1x128xf32> to vector<1x128xf32>
    %c0_22 = arith.constant 0 : index
    %c0_23 = arith.constant 0 : index
    %c0_24 = arith.constant 0 : index
    %39 = vector.load %arg23[%c0_22, %c0_23, %c0_24] : memref<1x1x128xf32, #tpu.memory_space<vmem>>, vector<1x1x128xf32>
    %40 = vector.shape_cast %39 : vector<1x1x128xf32> to vector<1x128xf32>
    %cst_25 = arith.constant dense<0.000000e+00> : vector<8xf32>
    %41 = vector.multi_reduction <add>, %36, %cst_25 [1] : vector<8x128xf32> to vector<8xf32>
    %42 = vector.shape_cast %41 : vector<8xf32> to vector<8x1xf32>
    %cst_26 = arith.constant 1.280000e+02 : f32
    %43 = vector.broadcast %cst_26 : f32 to vector<8x1xf32>
    %44 = arith.divf %42, %43 : vector<8x1xf32>
    %45 = vector.broadcast %44 : vector<8x1xf32> to vector<8x128xf32>
    %46 = arith.subf %36, %45 : vector<8x128xf32>
    %47 = arith.mulf %46, %46 : vector<8x128xf32>
    %cst_27 = arith.constant dense<0.000000e+00> : vector<8xf32>
    %48 = vector.multi_reduction <add>, %47, %cst_27 [1] : vector<8x128xf32> to vector<8xf32>
    %49 = vector.shape_cast %48 : vector<8xf32> to vector<8x1xf32>
    %cst_28 = arith.constant 1.280000e+02 : f32
    %50 = vector.broadcast %cst_28 : f32 to vector<8x1xf32>
    %51 = arith.divf %49, %50 : vector<8x1xf32>
    %cst_29 = arith.constant 9.99999974E-6 : f32
    %52 = vector.broadcast %cst_29 : f32 to vector<8x1xf32>
    %53 = arith.addf %51, %52 : vector<8x1xf32>
    %54 = math.rsqrt %53 : vector<8x1xf32>
    %55 = vector.broadcast %54 : vector<8x1xf32> to vector<8x128xf32>
    %56 = arith.mulf %46, %55 : vector<8x128xf32>
    %57 = vector.broadcast %38 : vector<1x128xf32> to vector<8x128xf32>
    %58 = arith.mulf %56, %57 : vector<8x128xf32>
    %59 = vector.broadcast %40 : vector<1x128xf32> to vector<8x128xf32>
    %60 = arith.addf %58, %59 : vector<8x128xf32>
    %c0_30 = arith.constant 0 : index
    %c0_31 = arith.constant 0 : index
    %c0_32 = arith.constant 0 : index
    %61 = vector.load %arg24[%c0_30, %c0_31, %c0_32] : memref<1x128x512xbf16, #tpu.memory_space<vmem>>, vector<1x128x512xbf16>
    %62 = vector.shape_cast %61 : vector<1x128x512xbf16> to vector<128x512xbf16>
    %c0_33 = arith.constant 0 : index
    %c0_34 = arith.constant 0 : index
    %c0_35 = arith.constant 0 : index
    %63 = vector.load %arg25[%c0_33, %c0_34, %c0_35] : memref<1x1x512xf32, #tpu.memory_space<vmem>>, vector<1x1x512xf32>
    %64 = vector.shape_cast %63 : vector<1x1x512xf32> to vector<1x512xf32>
    %65 = arith.truncf %60 : vector<8x128xf32> to vector<8x128xbf16>
    %cst_36 = arith.constant dense<0.000000e+00> : vector<8x512xf32>
    %66 = tpu.matmul %65, %62, %cst_36 {dimension_numbers = #tpu.dot_dimension_numbers<[1], [0], [0], [1], [0, 0, 1, 1], [], []>} : vector<8x128xbf16>, vector<128x512xbf16>, vector<8x512xf32> -> vector<8x512xf32>
    %67 = vector.broadcast %64 : vector<1x512xf32> to vector<8x512xf32>
    %68 = arith.addf %66, %67 : vector<8x512xf32>
    %cst_37 = arith.constant 5.000000e-01 : f32
    %69 = vector.broadcast %cst_37 : f32 to vector<8x512xf32>
    %70 = arith.mulf %69, %68 : vector<8x512xf32>
    %cst_38 = arith.constant 0.707106769 : f32
    %71 = vector.broadcast %cst_38 : f32 to vector<8x512xf32>
    %72 = arith.mulf %68, %71 : vector<8x512xf32>
    %73 = math.erf %72 : vector<8x512xf32>
    %cst_39 = arith.constant 1.000000e+00 : f32
    %74 = vector.broadcast %cst_39 : f32 to vector<8x512xf32>
    %75 = arith.addf %74, %73 : vector<8x512xf32>
    %76 = arith.mulf %70, %75 : vector<8x512xf32>
    %c0_40 = arith.constant 0 : index
    %c0_41 = arith.constant 0 : index
    %c0_42 = arith.constant 0 : index
    %77 = vector.load %arg26[%c0_40, %c0_41, %c0_42] : memref<1x512x128xbf16, #tpu.memory_space<vmem>>, vector<1x512x128xbf16>
    %78 = vector.shape_cast %77 : vector<1x512x128xbf16> to vector<512x128xbf16>
    %c0_43 = arith.constant 0 : index
    %c0_44 = arith.constant 0 : index
    %c0_45 = arith.constant 0 : index
    %79 = vector.load %arg27[%c0_43, %c0_44, %c0_45] : memref<1x1x128xf32, #tpu.memory_space<vmem>>, vector<1x1x128xf32>
    %80 = vector.shape_cast %79 : vector<1x1x128xf32> to vector<1x128xf32>
    %81 = arith.truncf %76 : vector<8x512xf32> to vector<8x512xbf16>
    %cst_46 = arith.constant dense<0.000000e+00> : vector<8x128xf32>
    %82 = tpu.matmul %81, %78, %cst_46 {dimension_numbers = #tpu.dot_dimension_numbers<[1], [0], [0], [1], [0, 0, 1, 1], [], []>} : vector<8x512xbf16>, vector<512x128xbf16>, vector<8x128xf32> -> vector<8x128xf32>
    %83 = vector.broadcast %80 : vector<1x128xf32> to vector<8x128xf32>
    %84 = arith.addf %82, %83 : vector<8x128xf32>
    %85 = arith.addf %36, %84 : vector<8x128xf32>
    %c0_47 = arith.constant 0 : index
    %c0_48 = arith.constant 0 : index
    %86 = vector.load %arg37[%c0_47, %c0_48] : memref<8x128xf32, #tpu.memory_space<vmem>>, vector<8x128xf32>
    tpu.vector_store %arg37[%c0_47, %c0_48], %85 {strides = array<i32>} : memref<8x128xf32, #tpu.memory_space<vmem>>, vector<8x128xf32>,
    %c1_i32 = arith.constant 1 : i32
    %87 = arith.cmpi eq, %arg1, %c1_i32 : i32
    %88 = arith.extui %87 : i1 to i32
    %c0_i32_49 = arith.constant 0 : i32
    %89 = arith.cmpi ne, %88, %c0_i32_49 : i32
    scf.if %89 {
      %c0_50 = arith.constant 0 : index
      %c0_51 = arith.constant 0 : index
      %90 = vector.load %arg37[%c0_50, %c0_51] : memref<8x128xf32, #tpu.memory_space<vmem>>, vector<8x128xf32>
      %c0_52 = arith.constant 0 : index
      %c0_53 = arith.constant 0 : index
      %91 = vector.load %arg28[%c0_52, %c0_53] : memref<1x128xf32, #tpu.memory_space<vmem>>, vector<1x128xf32>
      %c0_54 = arith.constant 0 : index
      %c0_55 = arith.constant 0 : index
      %92 = vector.load %arg29[%c0_54, %c0_55] : memref<1x128xf32, #tpu.memory_space<vmem>>, vector<1x128xf32>
      %cst_56 = arith.constant dense<0.000000e+00> : vector<8xf32>
      %93 = vector.multi_reduction <add>, %90, %cst_56 [1] : vector<8x128xf32> to vector<8xf32>
      %94 = vector.shape_cast %93 : vector<8xf32> to vector<8x1xf32>
      %cst_57 = arith.constant 1.280000e+02 : f32
      %95 = vector.broadcast %cst_57 : f32 to vector<8x1xf32>
      %96 = arith.divf %94, %95 : vector<8x1xf32>
      %97 = vector.broadcast %96 : vector<8x1xf32> to vector<8x128xf32>
      %98 = arith.subf %90, %97 : vector<8x128xf32>
      %99 = arith.mulf %98, %98 : vector<8x128xf32>
      %cst_58 = arith.constant dense<0.000000e+00> : vector<8xf32>
      %100 = vector.multi_reduction <add>, %99, %cst_58 [1] : vector<8x128xf32> to vector<8xf32>
      %101 = vector.shape_cast %100 : vector<8xf32> to vector<8x1xf32>
      %cst_59 = arith.constant 1.280000e+02 : f32
      %102 = vector.broadcast %cst_59 : f32 to vector<8x1xf32>
      %103 = arith.divf %101, %102 : vector<8x1xf32>
      %cst_60 = arith.constant 9.99999974E-6 : f32
      %104 = vector.broadcast %cst_60 : f32 to vector<8x1xf32>
      %105 = arith.addf %103, %104 : vector<8x1xf32>
      %106 = math.rsqrt %105 : vector<8x1xf32>
      %107 = vector.broadcast %106 : vector<8x1xf32> to vector<8x128xf32>
      %108 = arith.mulf %98, %107 : vector<8x128xf32>
      %109 = vector.broadcast %91 : vector<1x128xf32> to vector<8x128xf32>
      %110 = arith.mulf %108, %109 : vector<8x128xf32>
      %111 = vector.broadcast %92 : vector<1x128xf32> to vector<8x128xf32>
      %112 = arith.addf %110, %111 : vector<8x128xf32>
      %c0_61 = arith.constant 0 : index
      %c0_62 = arith.constant 0 : index
      %113 = vector.load %arg30[%c0_61, %c0_62] : memref<128x128xbf16, #tpu.memory_space<vmem>>, vector<128x128xbf16>
      %c0_63 = arith.constant 0 : index
      %c0_64 = arith.constant 0 : index
      %114 = vector.load %arg31[%c0_63, %c0_64] : memref<1x128xf32, #tpu.memory_space<vmem>>, vector<1x128xf32>
      %115 = arith.truncf %112 : vector<8x128xf32> to vector<8x128xbf16>
      %cst_65 = arith.constant dense<0.000000e+00> : vector<8x128xf32>
      %116 = tpu.matmul %115, %113, %cst_65 {dimension_numbers = #tpu.dot_dimension_numbers<[1], [0], [0], [1], [0, 0, 1, 1], [], []>} : vector<8x128xbf16>, vector<128x128xbf16>, vector<8x128xf32> -> vector<8x128xf32>
      %117 = vector.broadcast %114 : vector<1x128xf32> to vector<8x128xf32>
      %118 = arith.addf %116, %117 : vector<8x128xf32>
      %119 = arith.negf %118 : vector<8x128xf32>
      %120 = math.exp %119 : vector<8x128xf32>
      %cst_66 = arith.constant 1.000000e+00 : f32
      %121 = vector.broadcast %cst_66 : f32 to vector<8x128xf32>
      %122 = arith.addf %121, %120 : vector<8x128xf32>
      %123 = arith.divf %121, %122 : vector<8x128xf32>
      %124 = arith.mulf %118, %123 : vector<8x128xf32>
      %c0_67 = arith.constant 0 : index
      %c0_68 = arith.constant 0 : index
      %125 = vector.load %arg32[%c0_67, %c0_68] : memref<128x128xbf16, #tpu.memory_space<vmem>>, vector<128x128xbf16>
      %c0_69 = arith.constant 0 : index
      %c0_70 = arith.constant 0 : index
      %126 = vector.load %arg33[%c0_69, %c0_70] : memref<1x128xf32, #tpu.memory_space<vmem>>, vector<1x128xf32>
      %127 = arith.truncf %124 : vector<8x128xf32> to vector<8x128xbf16>
      %cst_71 = arith.constant dense<0.000000e+00> : vector<8x128xf32>
      %128 = tpu.matmul %127, %125, %cst_71 {dimension_numbers = #tpu.dot_dimension_numbers<[1], [0], [0], [1], [0, 0, 1, 1], [], []>} : vector<8x128xbf16>, vector<128x128xbf16>, vector<8x128xf32> -> vector<8x128xf32>
      %129 = vector.broadcast %126 : vector<1x128xf32> to vector<8x128xf32>
      %130 = arith.addf %128, %129 : vector<8x128xf32>
      %131 = arith.negf %130 : vector<8x128xf32>
      %132 = math.exp %131 : vector<8x128xf32>
      %cst_72 = arith.constant 1.000000e+00 : f32
      %133 = vector.broadcast %cst_72 : f32 to vector<8x128xf32>
      %134 = arith.addf %133, %132 : vector<8x128xf32>
      %135 = arith.divf %133, %134 : vector<8x128xf32>
      %136 = arith.mulf %130, %135 : vector<8x128xf32>
      %c0_73 = arith.constant 0 : index
      %c0_74 = arith.constant 0 : index
      %137 = vector.load %arg34[%c0_73, %c0_74] : memref<128x128xbf16, #tpu.memory_space<vmem>>, vector<128x128xbf16>
      %c0_75 = arith.constant 0 : index
      %c0_76 = arith.constant 0 : index
      %138 = vector.load %arg35[%c0_75, %c0_76] : memref<1x128xf32, #tpu.memory_space<vmem>>, vector<1x128xf32>
      %139 = arith.truncf %136 : vector<8x128xf32> to vector<8x128xbf16>
      %cst_77 = arith.constant dense<0.000000e+00> : vector<8x128xf32>
      %140 = tpu.matmul %139, %137, %cst_77 {dimension_numbers = #tpu.dot_dimension_numbers<[1], [0], [0], [1], [0, 0, 1, 1], [], []>} : vector<8x128xbf16>, vector<128x128xbf16>, vector<8x128xf32> -> vector<8x128xf32>
      %141 = vector.broadcast %138 : vector<1x128xf32> to vector<8x128xf32>
      %142 = arith.addf %140, %141 : vector<8x128xf32>
      %c0_78 = arith.constant 0 : index
      %c0_79 = arith.constant 0 : index
      %143 = vector.load %arg36[%c0_78, %c0_79] : memref<8x128xf32, #tpu.memory_space<vmem>>, vector<8x128xf32>
      tpu.vector_store %arg36[%c0_78, %c0_79], %142 {strides = array<i32>} : memref<8x128xf32, #tpu.memory_space<vmem>>, vector<8x128xf32>,
    } else {
    }
    return
  }
  func.func @transform_0(%arg0: i32, %arg1: i32) -> (i32, i32) {
    %c0_i32 = arith.constant 0 : i32
    %c0_i32_0 = arith.constant 0 : i32
    return %arg0, %c0_i32 : i32, i32
  }
  func.func @transform_1(%arg0: i32, %arg1: i32) -> (i32, i32) {
    %c0_i32 = arith.constant 0 : i32
    %c0_i32_0 = arith.constant 0 : i32
    return %arg0, %c0_i32 : i32, i32
  }
  func.func @transform_2(%arg0: i32, %arg1: i32) -> (i32, i32) {
    %c0_i32 = arith.constant 0 : i32
    %c0_i32_0 = arith.constant 0 : i32
    %c0_i32_1 = arith.constant 0 : i32
    return %c0_i32, %c0_i32_0 : i32, i32
  }
  func.func @transform_3(%arg0: i32, %arg1: i32) -> (i32, i32) {
    %c0_i32 = arith.constant 0 : i32
    %c0_i32_0 = arith.constant 0 : i32
    %c0_i32_1 = arith.constant 0 : i32
    return %c0_i32, %c0_i32_0 : i32, i32
  }
  func.func @transform_4(%arg0: i32, %arg1: i32) -> (i32, i32) {
    %c0_i32 = arith.constant 0 : i32
    %c0_i32_0 = arith.constant 0 : i32
    %c0_i32_1 = arith.constant 0 : i32
    return %c0_i32, %c0_i32_0 : i32, i32
  }
  func.func @transform_5(%arg0: i32, %arg1: i32) -> (i32, i32) {
    %c0_i32 = arith.constant 0 : i32
    %c0_i32_0 = arith.constant 0 : i32
    %c0_i32_1 = arith.constant 0 : i32
    return %c0_i32, %c0_i32_0 : i32, i32
  }
  func.func @transform_6(%arg0: i32, %arg1: i32) -> (i32, i32) {
    %c0_i32 = arith.constant 0 : i32
    %c0_i32_0 = arith.constant 0 : i32
    %c0_i32_1 = arith.constant 0 : i32
    return %c0_i32, %c0_i32_0 : i32, i32
  }
  func.func @transform_7(%arg0: i32, %arg1: i32) -> (i32, i32) {
    %c0_i32 = arith.constant 0 : i32
    %c0_i32_0 = arith.constant 0 : i32
    %c0_i32_1 = arith.constant 0 : i32
    return %c0_i32, %c0_i32_0 : i32, i32
  }
  func.func @transform_8(%arg0: i32, %arg1: i32) -> (i32, i32) {
    %c0_i32 = arith.constant 0 : i32
    %c0_i32_0 = arith.constant 0 : i32
    %c0_i32_1 = arith.constant 0 : i32
    return %c0_i32, %c0_i32_0 : i32, i32
  }
  func.func @transform_9(%arg0: i32, %arg1: i32) -> (i32, i32) {
    %c0_i32 = arith.constant 0 : i32
    %c0_i32_0 = arith.constant 0 : i32
    %c0_i32_1 = arith.constant 0 : i32
    return %c0_i32, %c0_i32_0 : i32, i32
  }
  func.func @transform_10(%arg0: i32, %arg1: i32) -> (i32, i32) {
    %c0_i32 = arith.constant 0 : i32
    %c0_i32_0 = arith.constant 0 : i32
    %c0_i32_1 = arith.constant 0 : i32
    return %c0_i32, %c0_i32_0 : i32, i32
  }
  func.func @transform_11(%arg0: i32, %arg1: i32) -> (i32, i32) {
    %c0_i32 = arith.constant 0 : i32
    %c0_i32_0 = arith.constant 0 : i32
    %c0_i32_1 = arith.constant 0 : i32
    return %c0_i32, %c0_i32_0 : i32, i32
  }
  func.func @transform_12(%arg0: i32, %arg1: i32) -> (i32, i32) {
    %c0_i32 = arith.constant 0 : i32
    %c0_i32_0 = arith.constant 0 : i32
    %c0_i32_1 = arith.constant 0 : i32
    return %c0_i32, %c0_i32_0 : i32, i32
  }
  func.func @transform_13(%arg0: i32, %arg1: i32) -> (i32, i32) {
    %c0_i32 = arith.constant 0 : i32
    %c0_i32_0 = arith.constant 0 : i32
    %c0_i32_1 = arith.constant 0 : i32
    return %c0_i32, %c0_i32_0 : i32, i32
  }
  func.func @transform_14(%arg0: i32, %arg1: i32) -> (i32, i32) {
    %c0_i32 = arith.constant 0 : i32
    %c0_i32_0 = arith.constant 0 : i32
    %c0_i32_1 = arith.constant 0 : i32
    return %c0_i32, %c0_i32_0 : i32, i32
  }
  func.func @transform_15(%arg0: i32, %arg1: i32) -> (i32, i32) {
    %c0_i32 = arith.constant 0 : i32
    %c0_i32_0 = arith.constant 0 : i32
    %c0_i32_1 = arith.constant 0 : i32
    return %c0_i32, %c0_i32_0 : i32, i32
  }
  func.func @transform_16(%arg0: i32, %arg1: i32) -> (i32, i32, i32) {
    %c0_i32 = arith.constant 0 : i32
    %c0_i32_0 = arith.constant 0 : i32
    %c0_i32_1 = arith.constant 0 : i32
    return %arg1, %c0_i32, %c0_i32_0 : i32, i32, i32
  }
  func.func @transform_17(%arg0: i32, %arg1: i32) -> (i32, i32, i32) {
    %c0_i32 = arith.constant 0 : i32
    %c0_i32_0 = arith.constant 0 : i32
    %c0_i32_1 = arith.constant 0 : i32
    return %arg1, %c0_i32, %c0_i32_0 : i32, i32, i32
  }
  func.func @transform_18(%arg0: i32, %arg1: i32) -> (i32, i32, i32) {
    %c0_i32 = arith.constant 0 : i32
    %c0_i32_0 = arith.constant 0 : i32
    %c0_i32_1 = arith.constant 0 : i32
    return %arg1, %c0_i32, %c0_i32_0 : i32, i32, i32
  }
  func.func @transform_19(%arg0: i32, %arg1: i32) -> (i32, i32, i32) {
    %c0_i32 = arith.constant 0 : i32
    %c0_i32_0 = arith.constant 0 : i32
    %c0_i32_1 = arith.constant 0 : i32
    return %arg1, %c0_i32, %c0_i32_0 : i32, i32, i32
  }
  func.func @transform_20(%arg0: i32, %arg1: i32) -> (i32, i32, i32) {
    %c0_i32 = arith.constant 0 : i32
    %c0_i32_0 = arith.constant 0 : i32
    %c0_i32_1 = arith.constant 0 : i32
    return %arg1, %c0_i32, %c0_i32_0 : i32, i32, i32
  }
  func.func @transform_21(%arg0: i32, %arg1: i32) -> (i32, i32, i32) {
    %c0_i32 = arith.constant 0 : i32
    %c0_i32_0 = arith.constant 0 : i32
    %c0_i32_1 = arith.constant 0 : i32
    return %arg1, %c0_i32, %c0_i32_0 : i32, i32, i32
  }
  func.func @transform_22(%arg0: i32, %arg1: i32) -> (i32, i32, i32) {
    %c0_i32 = arith.constant 0 : i32
    %c0_i32_0 = arith.constant 0 : i32
    %c0_i32_1 = arith.constant 0 : i32
    return %arg1, %c0_i32, %c0_i32_0 : i32, i32, i32
  }
  func.func @transform_23(%arg0: i32, %arg1: i32) -> (i32, i32, i32) {
    %c0_i32 = arith.constant 0 : i32
    %c0_i32_0 = arith.constant 0 : i32
    %c0_i32_1 = arith.constant 0 : i32
    return %arg1, %c0_i32, %c0_i32_0 : i32, i32, i32
  }
  func.func @transform_24(%arg0: i32, %arg1: i32) -> (i32, i32, i32) {
    %c0_i32 = arith.constant 0 : i32
    %c0_i32_0 = arith.constant 0 : i32
    %c0_i32_1 = arith.constant 0 : i32
    return %arg1, %c0_i32, %c0_i32_0 : i32, i32, i32
  }
  func.func @transform_25(%arg0: i32, %arg1: i32) -> (i32, i32, i32) {
    %c0_i32 = arith.constant 0 : i32
    %c0_i32_0 = arith.constant 0 : i32
    %c0_i32_1 = arith.constant 0 : i32
    return %arg1, %c0_i32, %c0_i32_0 : i32, i32, i32
  }
  func.func @transform_26(%arg0: i32, %arg1: i32) -> (i32, i32) {
    %c0_i32 = arith.constant 0 : i32
    %c0_i32_0 = arith.constant 0 : i32
    %c0_i32_1 = arith.constant 0 : i32
    return %c0_i32, %c0_i32_0 : i32, i32
  }
  func.func @transform_27(%arg0: i32, %arg1: i32) -> (i32, i32) {
    %c0_i32 = arith.constant 0 : i32
    %c0_i32_0 = arith.constant 0 : i32
    %c0_i32_1 = arith.constant 0 : i32
    return %c0_i32, %c0_i32_0 : i32, i32
  }
  func.func @transform_28(%arg0: i32, %arg1: i32) -> (i32, i32) {
    %c0_i32 = arith.constant 0 : i32
    %c0_i32_0 = arith.constant 0 : i32
    %c0_i32_1 = arith.constant 0 : i32
    return %c0_i32, %c0_i32_0 : i32, i32
  }
  func.func @transform_29(%arg0: i32, %arg1: i32) -> (i32, i32) {
    %c0_i32 = arith.constant 0 : i32
    %c0_i32_0 = arith.constant 0 : i32
    %c0_i32_1 = arith.constant 0 : i32
    return %c0_i32, %c0_i32_0 : i32, i32
  }
  func.func @transform_30(%arg0: i32, %arg1: i32) -> (i32, i32) {
    %c0_i32 = arith.constant 0 : i32
    %c0_i32_0 = arith.constant 0 : i32
    %c0_i32_1 = arith.constant 0 : i32
    return %c0_i32, %c0_i32_0 : i32, i32
  }
  func.func @transform_31(%arg0: i32, %arg1: i32) -> (i32, i32) {
    %c0_i32 = arith.constant 0 : i32
    %c0_i32_0 = arith.constant 0 : i32
    %c0_i32_1 = arith.constant 0 : i32
    return %c0_i32, %c0_i32_0 : i32, i32
  }
  func.func @transform_32(%arg0: i32, %arg1: i32) -> (i32, i32) {
    %c0_i32 = arith.constant 0 : i32
    %c0_i32_0 = arith.constant 0 : i32
    %c0_i32_1 = arith.constant 0 : i32
    return %c0_i32, %c0_i32_0 : i32, i32
  }
  func.func @transform_33(%arg0: i32, %arg1: i32) -> (i32, i32) {
    %c0_i32 = arith.constant 0 : i32
    %c0_i32_0 = arith.constant 0 : i32
    %c0_i32_1 = arith.constant 0 : i32
    return %c0_i32, %c0_i32_0 : i32, i32
  }
  func.func @transform_34(%arg0: i32, %arg1: i32) -> (i32, i32) {
    %c0_i32 = arith.constant 0 : i32
    %c0_i32_0 = arith.constant 0 : i32
    return %arg0, %c0_i32 : i32, i32
  }
}

</mosaic_0001>

<bundles_post_ra>
// kernel: tpu_custom_call.1
= control target key start
LH: loop header
LB: loop body
LE: loop exit
PB: predicated region body
PF: predicated region fallthrough
CT: control target
= control target key end

     0   :  { %s6228_s6 = smov 1   ;;  %s6229_s10 = smov 2   ;;  %s7512_s0 = inlined_call_operand.smem [shape: u32[35], index: -1, kind: input, shape index: {}] }
   0x1   :  { %s6317_s5 = sld [smem:[%s7512_s0]]   ;;  %s6230_s14 = smov 3  }
   0x2   :  { %s6322_s9 = sld [smem:[%s7512_s0 + %s6228_s6]]   ;;  %s6231_s18 = smov 4  }
   0x3   :  { %s6327_s13 = sld [smem:[%s7512_s0 + %s6229_s10]]   ;;  %s6232_s22 = smov 5  }
   0x4   :  { %s6332_s17 = sld [smem:[%s7512_s0 + %s6230_s14]]   ;;  %s6233_s26 = smov 6  }
   0x5   :  { %s6337_s21 = sld [smem:[%s7512_s0 + %s6231_s18]]   ;;  %s6234_s30 = smov 7  }
   0x6   :  { %s6342_s25 = sld [smem:[%s7512_s0 + %s6232_s22]]   ;;  %s6235_s4 = smov 8  }
   0x7   :  { %7589 = sst [smem:[#allocation65_spill]] %s6317_s5  ;;  %s6236_s10 = smov 9  }
   0x8   :  { %7590 = sst [smem:[#allocation66_spill]] %s6322_s9  ;;  %s6237_s15 = smov 10  }
   0x9   :  { %7591 = sst [smem:[#allocation67_spill]] %s6327_s13  ;;  %s6238_s20 = smov 11  }
   0xa   :  { %7592 = sst [smem:[#allocation68_spill]] %s6332_s17  ;;  %s6240_s1 = smov 13  }
   0xb   :  { %7593 = sst [smem:[#allocation69_spill]] %s6337_s21  ;;  %s6241_s7 = smov 14  }
   0xc   :  { %7594 = sst [smem:[#allocation70_spill]] %s6342_s25  ;;  %s6243_s22 = smov 16  }
   0xd   :  { %s6347_s29 = sld [smem:[%s7512_s0 + %s6233_s26]]   ;;  %s6239_s26 = smov 12  }
   0xe   :  { %s6352_s3 = sld [smem:[%s7512_s0 + %s6234_s30]]   ;;  %s6244_s28 = smov 17  }
   0xf   :  { %s6357_s8 = sld [smem:[%s7512_s0 + %s6235_s4]]  }
  0x10   :  { %s6362_s14 = sld [smem:[%s7512_s0 + %s6236_s10]]  }
  0x11   :  { %s6367_s19 = sld [smem:[%s7512_s0 + %s6237_s15]]   ;;  %s6242_s15 = smov 15  }
  0x12   :  { %s6372_s24 = sld [smem:[%s7512_s0 + %s6238_s20]]  }
  0x13   :  { %7595 = sst [smem:[#allocation71_spill]] %s6347_s29 }
  0x14   :  { %7596 = sst [smem:[#allocation72_spill]] %s6352_s3 }
  0x15   :  { %7597 = sst [smem:[#allocation73_spill]] %s6357_s8 }
  0x16   :  { %7598 = sst [smem:[#allocation74_spill]] %s6362_s14 }
  0x17   :  { %7599 = sst [smem:[#allocation75_spill]] %s6367_s19 }
  0x18   :  { %7600 = sst [smem:[#allocation76_spill]] %s6372_s24 }
  0x19   :  { %s6377_s30 = sld [smem:[%s7512_s0 + %s6239_s26]]  }
  0x1a   :  { %s6382_s6 = sld [smem:[%s7512_s0 + %s6240_s1]]  }
  0x1b   :  { %s6387_s12 = sld [smem:[%s7512_s0 + %s6241_s7]]   ;;  %s6245_s7 = smov 18  }
  0x1c   :  { %s6392_s20 = sld [smem:[%s7512_s0 + %s6242_s15]]   ;;  %s6246_s15 = smov 19  }
  0x1d   :  { %s6397_s27 = sld [smem:[%s7512_s0 + %s6243_s22]]   ;;  %s6247_s22 = smov 20  }
  0x1e   :  { %s6402_s4 = sld [smem:[%s7512_s0 + %s6244_s28]]   ;;  %s6248_s28 = smov 21  }
  0x1f   :  { %7601 = sst [smem:[#allocation77_spill]] %s6377_s30 }
  0x20   :  { %7602 = sst [smem:[#allocation78_spill]] %s6382_s6 }
  0x21   :  { %7603 = sst [smem:[#allocation79_spill]] %s6387_s12 }
  0x22   :  { %7604 = sst [smem:[#allocation80_spill]] %s6392_s20 }
  0x23   :  { %7605 = sst [smem:[#allocation81_spill]] %s6397_s27 }
  0x24   :  { %7606 = sst [smem:[#allocation82_spill]] %s6402_s4 }
  0x25   :  { %s6407_s9 = sld [smem:[%s7512_s0 + %s6245_s7]]   ;;  %s6249_s7 = smov 22  }
  0x26   :  { %s6412_s5 = sld [smem:[%s7512_s0 + %s6246_s15]]   ;;  %s6250_s15 = smov 23  }
  0x27   :  { %s6417_s27 = sld [smem:[%s7512_s0 + %s6247_s22]]   ;;  %s6251_s22 = smov 24  }
  0x28   :  { %s6422_s20 = sld [smem:[%s7512_s0 + %s6248_s28]]   ;;  %s6252_s28 = smov 25  }
  0x29   :  { %s6432_s6 = sld [smem:[%s7512_s0 + %s6250_s15]]   ;;  %s6254_s15 = smov 27  }
  0x2a   :  { %s6442_s24 = sld [smem:[%s7512_s0 + %s6252_s28]]   ;;  %s6256_s28 = smov 29  }
  0x2b   :  { %7607 = sst [smem:[#allocation83_spill]] %s6407_s9 }
  0x2c   :  { %7608 = sst [smem:[#allocation84_spill]] %s6412_s5 }
  0x2d   :  { %7609 = sst [smem:[#allocation85_spill]] %s6417_s27 }
  0x2e   :  { %7610 = sst [smem:[#allocation86_spill]] %s6422_s20 }
  0x2f   :  { %s6427_s9 = sld [smem:[%s7512_s0 + %s6249_s7]]   ;;  %s6253_s7 = smov 26  }
  0x30   :  { %7612 = sst [smem:[#allocation88_spill]] %s6432_s6 }
  0x31   :  { %s6437_s27 = sld [smem:[%s7512_s0 + %s6251_s22]]   ;;  %s6255_s22 = smov 28  }
  0x32   :  { %7614 = sst [smem:[#allocation90_spill]] %s6442_s24 }
  0x33   :  { %s6452_s14 = sld [smem:[%s7512_s0 + %s6254_s15]]   ;;  %s6258_s15 = smov 31  }
  0x34   :  { %s6462_s24 = sld [smem:[%s7512_s0 + %s6256_s28]]   ;;  %s6260_s28 = smov 33  }
  0x35   :  { %7611 = sst [smem:[#allocation87_spill]] %s6427_s9 }
  0x36   :  { %s6447_s9 = sld [smem:[%s7512_s0 + %s6253_s7]]   ;;  %s6257_s7 = smov 30  }
  0x37   :  { %7613 = sst [smem:[#allocation89_spill]] %s6437_s27 }
  0x38   :  { %s6457_s27 = sld [smem:[%s7512_s0 + %s6255_s22]]   ;;  %s6259_s22 = smov 32  }
  0x39   :  { %7616 = sst [smem:[#allocation92_spill]] %s6452_s14 }
  0x3a   :  { %7618 = sst [smem:[#allocation94_spill]] %s6462_s24 }
  0x3b   :  { %s6467_s3 = sld [smem:[%s7512_s0 + %s6257_s7]]   ;;  %s6261_s7 = smov 34  }
  0x3c   :  { %7615 = sst [smem:[#allocation91_spill]] %s6447_s9 }
  0x3d   :  { %s6472_s25 = sld [smem:[%s7512_s0 + %s6258_s15]]  }
  0x3e   :  { %7617 = sst [smem:[#allocation93_spill]] %s6457_s27 }
  0x3f   :  { %s6477_s27 = sld [smem:[%s7512_s0 + %s6259_s22]]  }
  0x40   :  { %s6482_s24 = sld [smem:[%s7512_s0 + %s6260_s28]]  }
  0x41   :  { %7619 = sst [smem:[#allocation95_spill]] %s6467_s3 }
  0x42   :  { %s6487_s3 = sld [smem:[%s7512_s0 + %s6261_s7]]  }
  0x43   :  { %7620 = sst [smem:[#allocation96_spill]] %s6472_s25 }
  0x45   :  { %7621 = sst [smem:[#allocation97_spill]] %s6477_s27 }
  0x46   :  { %7622 = sst [smem:[#allocation98_spill]] %s6482_s24 }
  0x48   :  { %7623 = sst [smem:[#allocation99_spill]] %s6487_s3 }
  0x49   :  { %74 = vsyncpa [#allocation4], 0 }
  0x4a   :  { %76 = vsyncpa [#allocation4 + $0x1], 0 }
  0x4b   :  { %77 = vsyncpa [#allocation7], 0 }
  0x4c   :  { %78 = vsyncpa [#allocation10], 0 }
  0x4d   :  { %79 = vsyncpa [#allocation13], 0 }
  0x4e   :  { %80 = vsyncpa [#allocation16], 0 }
  0x4f   :  { %81 = vsyncpa [#allocation19], 0 }
  0x50   :  { %82 = vsyncpa [#allocation22], 0 }
  0x51   :  { %83 = vsyncpa [#allocation25], 0 }
  0x52   :  { %84 = vsyncpa [#allocation28], 0 }
  0x53   :  { %86 = vsyncpa [#allocation28 + $0x1], 0 }
  0x54   :  { %87 = vsyncpa [#allocation31], 0 }
  0x55   :  { %89 = vsyncpa [#allocation31 + $0x1], 0 }
  0x56   :  { %90 = vsyncpa [#allocation34], 0 }
  0x57   :  { %92 = vsyncpa [#allocation34 + $0x1], 0 }
  0x58   :  { %93 = vsyncpa [#allocation37], 0 }
  0x59   :  { %95 = vsyncpa [#allocation37 + $0x1], 0 }
  0x5a   :  { %96 = vsyncpa [#allocation40], 0 }
  0x5b   :  { %98 = vsyncpa [#allocation40 + $0x1], 0 }
  0x5c   :  { %99 = vsyncpa [#allocation43], 0 }
  0x5d   :  { %100 = vsyncpa [#allocation46], 0 }
  0x5e   :  { %101 = vsyncpa [#allocation5], 0 }
  0x5f   :  { %103 = vsyncpa [#allocation5 + $0x1], 0  ;;  %s6489_s0 = smov 0   ;;  %s6491_s15 = smov 0  }
  0x60   :  { %s6493_s16 = smov 0   ;;  %s6495_s18 = smov 0  }
  0x61   :  { %s6497_s22 = smov 0   ;;  %s6499_s23 = smov 0  }
  0x62   :  { %s6501_s26 = smov 0   ;;  %s6503_s28 = smov 0  }
  0x63   :  { %s6505_s1 = smov 0   ;;  %s6507_s2 = smov 0  }
  0x64   :  { %s6509_s7 = smov 0  }
  0x65 LB: > { %s7624_s30 = sld [smem:[#allocation77_spill]]  ;;  %s7625_s29 = sld [smem:[#allocation71_spill]]  ;;  %s6198_s18 = sphi %s6495_s18, %s7743_s18   ;;  %s6194_s16 = sphi %s6493_s16, %s7750_s16   ;;  %s6190_s15 = sphi %s6491_s15, %s7749_s15   ;;  %s6186_s0 = sphi %s6489_s0, %s7748_s0   ;;  %s6226_s7 = sphi %s6509_s7, %s109_s7   ;;  %s6222_s2 = sphi %s6507_s2, %s7747_s2   ;;  %s6218_s1 = sphi %s6505_s1, %s7753_s1   ;;  %s6214_s28 = sphi %s6503_s28, %s7745_s28   ;;  %s6210_s26 = sphi %s6501_s26, %s7752_s26   ;;  %s6206_s23 = sphi %s6499_s23, %s7751_s23   ;;  %s6202_s22 = sphi %s6497_s22, %s7744_s22  }
  0x66   : > { %s7626_s27 = sld [smem:[#allocation97_spill]]  ;;  %s7627_s17 = sld [smem:[#allocation68_spill]] }
  0x67   : > { %s7628_s6 = sld [smem:[#allocation88_spill]]  ;;  %s7629_s20 = sld [smem:[#allocation86_spill]] }
  0x68   : > { %s7630_s5 = sld [smem:[#allocation84_spill]]  ;;  %s7631_s4 = sld [smem:[#allocation82_spill]] }
  0x69   : > { %s7632_s19 = sld [smem:[#allocation75_spill]]  ;;  %s7633_s14 = sld [smem:[#allocation92_spill]] }
  0x6a   : > { %s7634_s12 = sld [smem:[#allocation79_spill]]  ;;  %s7635_s9 = sld [smem:[#allocation91_spill]] }
  0x6b   : > { %s7636_s8 = sld [smem:[#allocation73_spill]]  ;;  %s7637_s21 = sld [smem:[#allocation69_spill]] }
  0x6c   : > { %s7638_s13 = sld [smem:[#allocation67_spill]]  ;;  %7639 = sst [smem:[#allocation100_spill]] %s6198_s18 }
  0x6d   : > { %7640 = sst [smem:[#allocation101_spill]] %s6202_s22  ;;  %s6545_s10 = sadd.s32 4294967295, %s6226_s7  }
  0x6e   : > { %7641 = sst [smem:[#allocation102_spill]] %s6206_s23  ;;  %p4118_p0 = scmp.ge.s32.totalorder %s6226_s7, 1 }
  0x6f   : > { %7642 = sst [smem:[#allocation103_spill]] %s6210_s26  ;;  %p7534_p1 = scmp.eq.s32.totalorder %s6545_s10, 0 }
  0x70   : > { %7643 = sst [smem:[#allocation104_spill]] %s6214_s28  ;;  %p926_p2 = scmp.lt.s32.totalorder %s6226_s7, 5 }
  0x71   : > { %7644 = sst [smem:[#allocation105_spill]] %s6222_s2  ;;  %s6262_s3 = smov [#allocation6]  }
  0x72   : > { %p6550_p3 = pnand %p4118_p0, %p926_p2  ;;  %s939_s24 = sshll.u32 %s6262_s3, 4  ;;  %s940_s24 = int_to_ptr.vmem [resolvable:$true] %s939_s24 }
  0x73   : > { %s6263_s25 = smov [#allocation9]   ;;  %s6264_s18 = smov [#allocation12]  }
  0x74   : > { %s7645_s11 = scalar_select %p6550_p3, 1, 0 }
  0x75   : > { %p4761_p4 = pneg %p6550_p3  ;;  %s960_s26 = sshll.u32 %s6263_s25, 4  ;;  %s6562_s26 = int_to_ptr.vmem [resolvable:$true] %s960_s26 }
  0x76   : > { %7646 = sst [smem:[#allocation106_spill]] %s7645_s11  ;;  %s6564_s22 = sshll.u32 %s6264_s18, 4  ;;  %s985_s22 = int_to_ptr.vmem [resolvable:$true] %s6564_s22 }
  0x77   : > { %p6558_p5 = pnand %p4761_p4, %p7534_p1  ;;  %s5240_s23 = scalar_lea.hbm %s7638_s13, 16 }
  0x78   : > { %p5241_p6 = scmp.ne.s32.totalorder %s7638_s13, %s5240_s23  ;;  %p5247_p10 = scmp.lt.u32.totalorder %s5240_s23, %s7638_s13 }
  0x79   : > { %s7647_s28 = scalar_select %p6558_p5, 1, 0 }
  0x7a   : > { %p6570_p7 = pneg %p6558_p5 }
  0x7c   : > { %s7648_s3 = scalar_select %p6570_p7, 1, 0 }
  0x7d   : > { %p5243_p8 = pnand %p6570_p7, %p5241_p6 }
  0x7f   : > { %p5244_p9 = pneg %p5243_p8 }
  0x81   : > { %p5249_p11 = pnand %p5247_p10, %p5244_p9 }
  0x83   : > { %5252 = shalt.err (!%p5249_p11)
}
  0x84   : > { %s5253_s25 = scalar_lea.vmem %s940_s24, 16  ;;  %s5260_s18 = scalar_lea.vmem %s940_s24, 32 }
  0x85   : > { %p5254_p12 = scmp.ne.s32.totalorder %s940_s24, %s5253_s25  ;;  %p5261_p2 = scmp.lt.s32.totalorder %s940_s24, %s940_s24 }
  0x86   : > { %p5262_p4 = scmp.lt.s32.totalorder %s5260_s18, %s5253_s25 }
  0x87   : > { %p5256_p13 = pnand %p5254_p12, %p6570_p7 }
  0x88   : > { %p5263_p1 = por %p5262_p4, %p5261_p2 }
  0x89   : > { %p5257_p0 = pneg %p5256_p13 }
  0x8b   : > { %p5264_p3 = pnand %p5263_p1, %p5257_p0 }
  0x8d   : > { %5267 = shalt.err (!%p5264_p3)
}
  0x8e   : > { %4764 = dma.hbm_to_vmem [thread:$0]  (!%p6558_p5), %s7638_s13, 16, %s940_s24, [#allocation7]  }
  0x8f   : > { %s5268_s23 = scalar_lea.hbm %s7637_s21, 1024 }
  0x90   : > { %p5269_p6 = scmp.ne.s32.totalorder %s7637_s21, %s5268_s23  ;;  %p5275_p10 = scmp.lt.u32.totalorder %s5268_s23, %s7637_s21 }
  0x92   : > { %p5271_p8 = pnand %p5269_p6, %p6570_p7 }
  0x94   : > { %p5272_p9 = pneg %p5271_p8 }
  0x96   : > { %p5277_p11 = pnand %p5275_p10, %p5272_p9 }
  0x98   : > { %5280 = shalt.err (!%p5277_p11)
}
  0x99   : > { %s5281_s25 = scalar_lea.vmem %s6562_s26, 1024  ;;  %p5289_p13 = scmp.lt.s32.totalorder %s6562_s26, %s6562_s26 }
  0x9a   : > { %p5282_p1 = scmp.ne.s32.totalorder %s6562_s26, %s5281_s25  ;;  %p5290_p0 = scmp.lt.s32.totalorder %s5281_s25, %s5281_s25 }
  0x9c   : > { %p5284_p3 = pnand %p5282_p1, %p6570_p7  ;;  %p5291_p2 = por %p5290_p0, %p5289_p13 }
  0x9e   : > { %p5285_p12 = pneg %p5284_p3 }
  0xa0   : > { %p5292_p4 = pnand %p5291_p2, %p5285_p12 }
  0xa2   : > { %5295 = shalt.err (!%p5292_p4)
}
  0xa3   : > { %s7539_s24 = smov 64   ;;  %s7541_s18 = smov 4  }
  0xa4   : > { %4770 = dma.hbm_to_vmem [thread:$0]  (!%p6558_p5), %s7637_s21, 1024, %s6562_s26, [#allocation10], %s7539_s24, %s7539_s24, %s7541_s18  }
  0xa5   : > { %s5296_s23 = scalar_lea.hbm %s7625_s29, 1024 }
  0xa6   : > { %p5297_p6 = scmp.ne.s32.totalorder %s7625_s29, %s5296_s23  ;;  %p5303_p10 = scmp.lt.u32.totalorder %s5296_s23, %s7625_s29 }
  0xa8   : > { %p5299_p8 = pnand %p5297_p6, %p6570_p7 }
  0xaa   : > { %p5300_p9 = pneg %p5299_p8 }
  0xac   : > { %p5305_p11 = pnand %p5303_p10, %p5300_p9 }
  0xae   : > { %5308 = shalt.err (!%p5305_p11)
}
  0xaf   : > { %s5309_s25 = scalar_lea.vmem %s985_s22, 1024  ;;  %p5317_p13 = scmp.lt.s32.totalorder %s985_s22, %s985_s22 }
  0xb0   : > { %p5310_p1 = scmp.ne.s32.totalorder %s985_s22, %s5309_s25  ;;  %p5318_p0 = scmp.lt.s32.totalorder %s5309_s25, %s5309_s25 }
  0xb2   : > { %p5312_p3 = pnand %p5310_p1, %p6570_p7  ;;  %p5319_p2 = por %p5318_p0, %p5317_p13 }
  0xb4   : > { %p5313_p12 = pneg %p5312_p3 }
  0xb6   : > { %p5320_p4 = pnand %p5319_p2, %p5313_p12 }
  0xb8   : > { %5323 = shalt.err (!%p5320_p4)
}
  0xb9   : > { %4776 = dma.hbm_to_vmem [thread:$0]  (!%p6558_p5), %s7625_s29, 1024, %s985_s22, [#allocation13], %s7539_s24, %s7539_s24, %s7541_s18  }
  0xba   : > { %s6267_s26 = smov [#allocation15]   ;;  %s6268_s13 = smov [#allocation18]  }
  0xbb   : > { %s1008_s23 = sshll.u32 %s6267_s26, 4  ;;  %s1032_s21 = sshll.u32 %s6268_s13, 4  ;;  %s1009_s23 = int_to_ptr.vmem [resolvable:$true] %s1008_s23  ;;  %s1033_s21 = int_to_ptr.vmem [resolvable:$true] %s1032_s21 }
  0xbc   : > { %s5324_s25 = scalar_lea.hbm %s7636_s8, 1024 }
  0xbd   : > { %p5325_p6 = scmp.ne.s32.totalorder %s7636_s8, %s5324_s25  ;;  %p5331_p10 = scmp.lt.u32.totalorder %s5324_s25, %s7636_s8 }
  0xbf   : > { %p5327_p8 = pnand %p5325_p6, %p6570_p7 }
  0xc1   : > { %p5328_p9 = pneg %p5327_p8 }
  0xc3   : > { %p5333_p11 = pnand %p5331_p10, %p5328_p9 }
  0xc5   : > { %5336 = shalt.err (!%p5333_p11)
}
  0xc6   : > { %s5337_s11 = scalar_lea.vmem %s1009_s23, 1024  ;;  %p5345_p13 = scmp.lt.s32.totalorder %s1009_s23, %s1009_s23 }
  0xc7   : > { %p5338_p1 = scmp.ne.s32.totalorder %s1009_s23, %s5337_s11  ;;  %p5346_p0 = scmp.lt.s32.totalorder %s5337_s11, %s5337_s11 }
  0xc9   : > { %p5340_p3 = pnand %p5338_p1, %p6570_p7  ;;  %p5347_p2 = por %p5346_p0, %p5345_p13 }
  0xcb   : > { %p5341_p12 = pneg %p5340_p3 }
  0xcd   : > { %p5348_p4 = pnand %p5347_p2, %p5341_p12 }
  0xcf   : > { %5351 = shalt.err (!%p5348_p4)
}
  0xd0   : > { %4782 = dma.hbm_to_vmem [thread:$0]  (!%p6558_p5), %s7636_s8, 1024, %s1009_s23, [#allocation16], %s7539_s24, %s7539_s24, %s7541_s18  }
  0xd1   : > { %s5352_s13 = scalar_lea.hbm %s7632_s19, 1024 }
  0xd2   : > { %p5353_p6 = scmp.ne.s32.totalorder %s7632_s19, %s5352_s13  ;;  %p5359_p10 = scmp.lt.u32.totalorder %s5352_s13, %s7632_s19 }
  0xd4   : > { %p5355_p8 = pnand %p5353_p6, %p6570_p7 }
  0xd6   : > { %p5356_p9 = pneg %p5355_p8 }
  0xd8   : > { %p5361_p11 = pnand %p5359_p10, %p5356_p9 }
  0xda   : > { %5364 = shalt.err (!%p5361_p11)
}
  0xdb   : > { %s5365_s22 = scalar_lea.vmem %s1033_s21, 1024  ;;  %p5373_p13 = scmp.lt.s32.totalorder %s1033_s21, %s1033_s21 }
  0xdc   : > { %p5366_p1 = scmp.ne.s32.totalorder %s1033_s21, %s5365_s22  ;;  %p5374_p0 = scmp.lt.s32.totalorder %s5365_s22, %s5365_s22 }
  0xde   : > { %p5368_p3 = pnand %p5366_p1, %p6570_p7  ;;  %p5375_p2 = por %p5374_p0, %p5373_p13 }
  0xe0   : > { %p5369_p12 = pneg %p5368_p3 }
  0xe2   : > { %p5376_p4 = pnand %p5375_p2, %p5369_p12 }
  0xe4   : > { %5379 = shalt.err (!%p5376_p4)
}
  0xe5   : > { %4788 = dma.hbm_to_vmem [thread:$0]  (!%p6558_p5), %s7632_s19, 1024, %s1033_s21, [#allocation19], %s7539_s24, %s7539_s24, %s7541_s18  }
  0xe6   : > { %s6269_s11 = smov [#allocation21]   ;;  %s6270_s23 = smov [#allocation24]  }
  0xe7   : > { %s1056_s26 = sshll.u32 %s6269_s11, 4  ;;  %s1081_s25 = sshll.u32 %s6270_s23, 4  ;;  %s1057_s26 = int_to_ptr.vmem [resolvable:$true] %s1056_s26  ;;  %s1082_s25 = int_to_ptr.vmem [resolvable:$true] %s1081_s25 }
  0xe8   : > { %s5380_s13 = scalar_lea.hbm %s7624_s30, 1024 }
  0xe9   : > { %p5381_p6 = scmp.ne.s32.totalorder %s7624_s30, %s5380_s13  ;;  %p5387_p10 = scmp.lt.u32.totalorder %s5380_s13, %s7624_s30 }
  0xeb   : > { %p5383_p8 = pnand %p5381_p6, %p6570_p7 }
  0xed   : > { %p5384_p9 = pneg %p5383_p8 }
  0xef   : > { %p5389_p11 = pnand %p5387_p10, %p5384_p9 }
  0xf1   : > { %5392 = shalt.err (!%p5389_p11)
}
  0xf2   : > { %s5393_s22 = scalar_lea.vmem %s1057_s26, 1024  ;;  %p5401_p13 = scmp.lt.s32.totalorder %s1057_s26, %s1057_s26 }
  0xf3   : > { %p5394_p1 = scmp.ne.s32.totalorder %s1057_s26, %s5393_s22  ;;  %p5402_p0 = scmp.lt.s32.totalorder %s5393_s22, %s5393_s22 }
  0xf5   : > { %p5396_p3 = pnand %p5394_p1, %p6570_p7  ;;  %p5403_p2 = por %p5402_p0, %p5401_p13 }
  0xf7   : > { %p5397_p12 = pneg %p5396_p3 }
  0xf9   : > { %p5404_p4 = pnand %p5403_p2, %p5397_p12 }
  0xfb   : > { %5407 = shalt.err (!%p5404_p4)
}
  0xfc   : > { %4794 = dma.hbm_to_vmem [thread:$0]  (!%p6558_p5), %s7624_s30, 1024, %s1057_s26, [#allocation22], %s7539_s24, %s7539_s24, %s7541_s18  }
  0xfd   : > { %s5408_s21 = scalar_lea.hbm %s7634_s12, 16 }
  0xfe   : > { %p5409_p6 = scmp.ne.s32.totalorder %s7634_s12, %s5408_s21  ;;  %p5415_p10 = scmp.lt.u32.totalorder %s5408_s21, %s7634_s12 }
 0x100   : > { %p5411_p8 = pnand %p5409_p6, %p6570_p7 }
 0x102   : > { %p5412_p9 = pneg %p5411_p8 }
 0x104   : > { %p5417_p11 = pnand %p5415_p10, %p5412_p9 }
 0x106   : > { %5420 = shalt.err (!%p5417_p11)
}
 0x107   : > { %s5421_s11 = scalar_lea.vmem %s1082_s25, 16  ;;  %s5428_s23 = scalar_lea.vmem %s1082_s25, 32 }
 0x108   : > { %p5422_p1 = scmp.ne.s32.totalorder %s1082_s25, %s5421_s11  ;;  %p5429_p13 = scmp.lt.s32.totalorder %s1082_s25, %s1082_s25 }
 0x109   : > { %p5430_p0 = scmp.lt.s32.totalorder %s5428_s23, %s5421_s11 }
 0x10a   : > { %p5424_p3 = pnand %p5422_p1, %p6570_p7 }
 0x10b   : > { %p5431_p2 = por %p5430_p0, %p5429_p13 }
 0x10c   : > { %p5425_p12 = pneg %p5424_p3 }
 0x10e   : > { %p5432_p4 = pnand %p5431_p2, %p5425_p12 }
 0x110   : > { %5435 = shalt.err (!%p5432_p4)
}
 0x111   : > { %4800 = dma.hbm_to_vmem [thread:$0]  (!%p6558_p5), %s7634_s12, 16, %s1082_s25, [#allocation25]  }
 0x112   : > { %s6271_s26 = smov [#allocation41]   ;;  %s6272_s22 = smov [#allocation42]  }
 0x113   : > { %s1103_s13 = sshll.u32 %s6271_s26, 4  ;;  %s1114_s21 = sshll.u32 %s6272_s22, 4  ;;  %s1104_s13 = int_to_ptr.vmem [resolvable:$true] %s1103_s13  ;;  %s1115_s21 = int_to_ptr.vmem [resolvable:$true] %s1114_s21 }
 0x114   : > { %s5436_s24 = scalar_lea.hbm %s7635_s9, 16 }
 0x115   : > { %p5437_p6 = scmp.ne.s32.totalorder %s7635_s9, %s5436_s24  ;;  %p5443_p10 = scmp.lt.u32.totalorder %s5436_s24, %s7635_s9 }
 0x117   : > { %p5439_p8 = pnand %p5437_p6, %p6570_p7 }
 0x119   : > { %p5440_p9 = pneg %p5439_p8 }
 0x11b   : > { %p5445_p11 = pnand %p5443_p10, %p5440_p9 }
 0x11d   : > { %5448 = shalt.err (!%p5445_p11)
}
 0x11e   : > { %s5449_s11 = scalar_lea.vmem %s1104_s13, 16  ;;  %s5456_s25 = scalar_lea.vmem %s1104_s13, 32 }
 0x11f   : > { %p5450_p1 = scmp.ne.s32.totalorder %s1104_s13, %s5449_s11  ;;  %p5457_p13 = scmp.lt.s32.totalorder %s1104_s13, %s1104_s13 }
 0x120   : > { %p5458_p0 = scmp.lt.s32.totalorder %s5456_s25, %s5449_s11 }
 0x121   : > { %p5452_p3 = pnand %p5450_p1, %p6570_p7 }
 0x122   : > { %p5459_p2 = por %p5458_p0, %p5457_p13 }
 0x123   : > { %p5453_p12 = pneg %p5452_p3 }
 0x125   : > { %p5460_p4 = pnand %p5459_p2, %p5453_p12 }
 0x127   : > { %5463 = shalt.err (!%p5460_p4)
}
 0x128   : > { %4806 = dma.hbm_to_vmem [thread:$0]  (!%p6558_p5), %s7635_s9, 16, %s1104_s13, [#allocation40]  }
 0x129   : > { %s5464_s24 = scalar_lea.hbm %s7633_s14, 16 }
 0x12a   : > { %p5465_p6 = scmp.ne.s32.totalorder %s7633_s14, %s5464_s24  ;;  %p5471_p10 = scmp.lt.u32.totalorder %s5464_s24, %s7633_s14 }
 0x12c   : > { %p5467_p8 = pnand %p5465_p6, %p6570_p7 }
 0x12e   : > { %p5468_p9 = pneg %p5467_p8 }
 0x130   : > { %p5473_p11 = pnand %p5471_p10, %p5468_p9 }
 0x132   : > { %5476 = shalt.err (!%p5473_p11)
}
 0x133   : > { %s5477_s23 = scalar_lea.vmem %s1115_s21, 16  ;;  %s5484_s26 = scalar_lea.vmem %s1115_s21, 32 }
 0x134   : > { %p5478_p1 = scmp.ne.s32.totalorder %s1115_s21, %s5477_s23  ;;  %p5485_p13 = scmp.lt.s32.totalorder %s1115_s21, %s1115_s21 }
 0x135   : > { %p5486_p0 = scmp.lt.s32.totalorder %s5484_s26, %s5477_s23 }
 0x136   : > { %p5480_p3 = pnand %p5478_p1, %p6570_p7 }
 0x137   : > { %p5487_p2 = por %p5486_p0, %p5485_p13 }
 0x138   : > { %p5481_p12 = pneg %p5480_p3 }
 0x13a   : > { %p5488_p4 = pnand %p5487_p2, %p5481_p12 }
 0x13c   : > { %5491 = shalt.err (!%p5488_p4)
}
 0x13d   : > { %4809 = dma.hbm_to_vmem [thread:$0]  (!%p6558_p5), %s7633_s14, 16, %s1115_s21, [#allocation43]  }
 0x13e   : > { %p7546_p6 = scmp.eq.s32.totalorder %s6226_s7, 0  ;;  %p507_p8 = scmp.ne.s32.totalorder %s6194_s16, %s6190_s15 }
 0x13f   : > { %p513_p9 = scmp.ne.s32.totalorder %s6190_s15, %s6186_s0  ;;  %p7545_p10 = scmp.lt.s32.totalorder %s6226_s7, 4 }
 0x140   : > { %s6690_s13 = sand.u32 1, %s6226_s7   ;;  %p509_p11 = por %p507_p8, %p7546_p6 }
 0x141   : > { %p7649_p1 = scmp.eq.s32.totalorder %s6545_s10, 0  ;;  %s6701_s11 = sand.u32 1, %s6194_s16  }
 0x142   : > { %s6704_s21 = sshll.u32 %s6218_s1, 4  ;;  %s1195_s25 = scalar_lea.vmem [#allocation27], %s6701_s11 }
 0x143   : > { %p6696_p3 = por %p513_p9, %p7649_p1  ;;  %s6708_s0 = scalar_lea.hbm %s7631_s4, %s6704_s21 }
 0x144   : > { %s1202_s24 = sshll.u32 %s1195_s25, 4  ;;  %p6715_p12 = pnand %p7545_p10, %p509_p11  ;;  %s6711_s24 = int_to_ptr.vmem [resolvable:$true] %s1202_s24 }
 0x145   : > { %s7650_s22 = scalar_select %p6696_p3, 1, 0 }
 0x146   : > { %s7651_s23 = scalar_select %p6715_p12, 1, 0 }
 0x147   : > { %s6721_s26 = scalar_lea.hbm %s7630_s5, %s6704_s21  ;;  %s5492_s8 = scalar_lea.hbm %s6708_s0, 16 }
 0x148   : > { %p5493_p13 = scmp.ne.s32.totalorder %s6708_s0, %s5492_s8  ;;  %p6728_p0 = pneg %p6715_p12 }
 0x149   : > { %s5497_s25 = scalar_lea.hbm %s7631_s4, 32  ;;  %p5498_p8 = scmp.lt.u32.totalorder %s6708_s0, %s7631_s4 }
 0x14a   : > { %s7652_s9 = scalar_select %p6728_p0, 1, 0 }
 0x14b   : > { %p5495_p2 = pnand %p6728_p0, %p5493_p13  ;;  %p5499_p9 = scmp.lt.u32.totalorder %s5497_s25, %s5492_s8 }
 0x14c   : > { %p5501_p1 = scmp.lt.u32.totalorder %s5492_s8, %s6708_s0 }
 0x14d   : > { %p5496_p4 = pneg %p5495_p2  ;;  %p5500_p11 = por %p5499_p9, %p5498_p8 }
 0x14f   : > { %p5502_p10 = por %p5501_p1, %p5500_p11 }
 0x151   : > { %p5503_p6 = pnand %p5502_p10, %p5496_p4 }
 0x153   : > { %5506 = shalt.err (!%p5503_p6)
}
 0x154   : > { %s5507_s18 = scalar_lea.vmem %s6711_s24, 16  ;;  %s6273_s12 = smov [#allocation27]  }
 0x155   : > { %p5508_p3 = scmp.ne.s32.totalorder %s6711_s24, %s5507_s18  ;;  %s5512_s14 = sshll.u32 %s6273_s12, 4  ;;  %s5513_s14 = int_to_ptr.vmem [resolvable:$false] %s5512_s14 }
 0x156   : > { %s5514_s19 = scalar_lea.vmem %s5513_s14, 32  ;;  %p5515_p13 = scmp.lt.s32.totalorder %s6711_s24, %s5513_s14 }
 0x157   : > { %p5510_p5 = pnand %p5508_p3, %p6728_p0  ;;  %p5516_p2 = scmp.lt.s32.totalorder %s5514_s19, %s5507_s18 }
 0x159   : > { %p5511_p7 = pneg %p5510_p5  ;;  %p5517_p8 = por %p5516_p2, %p5515_p13 }
 0x15b   : > { %p5518_p9 = pnand %p5517_p8, %p5511_p7 }
 0x15d   : > { %5521 = shalt.err (!%p5518_p9)
}
 0x15e   : > { %s7653_s8 = scalar_lea.sflag [#allocation28], %s6690_s13  ;;  %s1233_s14 = scalar_lea.vmem [#allocation30], %s6701_s11 }
 0x15f   : > { %4822 = dma.hbm_to_vmem [thread:$0]  (!%p6715_p12), %s6708_s0, 16, %s6711_s24, %s7653_s8  }
 0x160   : > { %s1240_s19 = sshll.u32 %s1233_s14, 4  ;;  %s7558_s12 = scalar_lea.sflag [#allocation31], %s6690_s13  ;;  %s1241_s19 = int_to_ptr.vmem [resolvable:$true] %s1240_s19 }
 0x161   : > { %s5522_s18 = scalar_lea.hbm %s6721_s26, 16  ;;  %s5527_s25 = scalar_lea.hbm %s7630_s5, 32 }
 0x162   : > { %p5523_p5 = scmp.ne.s32.totalorder %s6721_s26, %s5522_s18  ;;  %p5528_p10 = scmp.lt.u32.totalorder %s6721_s26, %s7630_s5 }
 0x163   : > { %p5529_p3 = scmp.lt.u32.totalorder %s5527_s25, %s5522_s18  ;;  %p5531_p11 = scmp.lt.u32.totalorder %s5522_s18, %s6721_s26 }
 0x164   : > { %p5525_p7 = pnand %p5523_p5, %p6728_p0 }
 0x165   : > { %p5530_p4 = por %p5529_p3, %p5528_p10 }
 0x166   : > { %p5526_p6 = pneg %p5525_p7 }
 0x167   : > { %p5532_p1 = por %p5531_p11, %p5530_p4 }
 0x169   : > { %p5533_p13 = pnand %p5532_p1, %p5526_p6 }
 0x16b   : > { %5536 = shalt.err (!%p5533_p13)
}
 0x16c   : > { %s5537_s4 = scalar_lea.vmem %s1241_s19, 16  ;;  %s6274_s0 = smov [#allocation30]  }
 0x16d   : > { %p5538_p2 = scmp.ne.s32.totalorder %s1241_s19, %s5537_s4  ;;  %s5542_s24 = sshll.u32 %s6274_s0, 4  ;;  %s5543_s24 = int_to_ptr.vmem [resolvable:$false] %s5542_s24 }
 0x16e   : > { %s5544_s8 = scalar_lea.vmem %s5543_s24, 32  ;;  %p5545_p5 = scmp.lt.s32.totalorder %s1241_s19, %s5543_s24 }
 0x16f   : > { %p5540_p8 = pnand %p5538_p2, %p6728_p0  ;;  %p5546_p7 = scmp.lt.s32.totalorder %s5544_s8, %s5537_s4 }
 0x171   : > { %p5541_p9 = pneg %p5540_p8  ;;  %p5547_p12 = por %p5546_p7, %p5545_p5 }
 0x173   : > { %p5548_p3 = pnand %p5547_p12, %p5541_p9 }
 0x175   : > { %5551 = shalt.err (!%p5548_p3)
}
 0x176   : > { %p7654_p10 = scmp.ne.s32.totalorder %s7651_s23, 0  ;;  %s6768_s14 = scalar_lea.hbm %s7629_s20, %s6704_s21 }
 0x177   : > { %s1267_s4 = scalar_lea.vmem [#allocation33], %s6701_s11  ;;  %s7565_s25 = scalar_lea.sflag [#allocation34], %s6690_s13 }
 0x178   : > { %4828 = dma.hbm_to_vmem [thread:$0]  (!%p7654_p10), %s6721_s26, 16, %s1241_s19, %s7558_s12  }
 0x179   : > { %s1274_s18 = sshll.u32 %s1267_s4, 4  ;;  %s5552_s0 = scalar_lea.hbm %s6768_s14, 16  ;;  %s1275_s18 = int_to_ptr.vmem [resolvable:$true] %s1274_s18 }
 0x17a   : > { %p5553_p12 = scmp.ne.s32.totalorder %s6768_s14, %s5552_s0  ;;  %s5557_s24 = scalar_lea.hbm %s7629_s20, 32 }
 0x17b   : > { %p5558_p11 = scmp.lt.u32.totalorder %s6768_s14, %s7629_s20  ;;  %p5559_p1 = scmp.lt.u32.totalorder %s5557_s24, %s5552_s0 }
 0x17c   : > { %p5555_p6 = pnand %p5553_p12, %p6728_p0  ;;  %p5561_p2 = scmp.lt.u32.totalorder %s5552_s0, %s6768_s14 }
 0x17d   : > { %p5560_p13 = por %p5559_p1, %p5558_p11 }
 0x17e   : > { %p5556_p4 = pneg %p5555_p6 }
 0x17f   : > { %p5562_p8 = por %p5561_p2, %p5560_p13 }
 0x181   : > { %p5563_p9 = pnand %p5562_p8, %p5556_p4 }
 0x183   : > { %5566 = shalt.err (!%p5563_p9)
}
 0x184   : > { %s5567_s26 = scalar_lea.vmem %s1275_s18, 16  ;;  %s6275_s19 = smov [#allocation33]  }
 0x185   : > { %p5568_p5 = scmp.ne.s32.totalorder %s1275_s18, %s5567_s26  ;;  %s5572_s8 = sshll.u32 %s6275_s19, 4  ;;  %s5573_s8 = int_to_ptr.vmem [resolvable:$false] %s5572_s8 }
 0x186   : > { %s5574_s4 = scalar_lea.vmem %s5573_s8, 32  ;;  %p5575_p12 = scmp.lt.s32.totalorder %s1275_s18, %s5573_s8 }
 0x187   : > { %p5570_p7 = pnand %p5568_p5, %p6728_p0  ;;  %p5576_p6 = scmp.lt.s32.totalorder %s5574_s4, %s5567_s26 }
 0x189   : > { %p5571_p3 = pneg %p5570_p7  ;;  %p5577_p10 = por %p5576_p6, %p5575_p12 }
 0x18b   : > { %p5578_p1 = pnand %p5577_p10, %p5571_p3 }
 0x18d   : > { %5581 = shalt.err (!%p5578_p1)
}
 0x18e   : > { %p7655_p11 = scmp.ne.s32.totalorder %s7651_s23, 0  ;;  %s4150_s0 = sshll.u32 %s6701_s11, 2 }
 0x18f   : > { %s4356_s24 = sshll.u32 %s6218_s1, 6  ;;  %s1306_s26 = scalar_lea.vmem [#allocation36], %s4150_s0 }
 0x190   : > { %4834 = dma.hbm_to_vmem [thread:$0]  (!%p7655_p11), %s6768_s14, 16, %s1275_s18, %s7565_s25  }
 0x191   : > { %s6790_s19 = scalar_lea.hbm %s7628_s6, %s4356_s24  ;;  %s1314_s8 = sshll.u32 %s1306_s26, 4  ;;  %s6792_s8 = int_to_ptr.vmem [resolvable:$true] %s1314_s8 }
 0x192   : > { %s6276_s4 = smov [#allocation8]   ;;  %s7564_s5 = scalar_lea.sflag [#allocation37], %s6690_s13 }
 0x193   : > { %s6794_s12 = sshll.u32 %s6276_s4, 4  ;;  %s5582_s20 = scalar_lea.hbm %s6790_s19, 64  ;;  %s951_s12 = int_to_ptr.vmem [resolvable:$true] %s6794_s12 }
 0x194   : > { %p5583_p10 = scmp.ne.s32.totalorder %s6790_s19, %s5582_s20  ;;  %s5587_s14 = scalar_lea.hbm %s7628_s6, 128 }
 0x195   : > { %p5588_p2 = scmp.lt.u32.totalorder %s6790_s19, %s7628_s6  ;;  %p5589_p8 = scmp.lt.u32.totalorder %s5587_s14, %s5582_s20 }
 0x196   : > { %p5585_p4 = pnand %p5583_p10, %p6728_p0  ;;  %p5591_p5 = scmp.lt.u32.totalorder %s5582_s20, %s6790_s19 }
 0x197   : > { %p5590_p9 = por %p5589_p8, %p5588_p2 }
 0x198   : > { %p5586_p13 = pneg %p5585_p4 }
 0x199   : > { %p5592_p7 = por %p5591_p5, %p5590_p9 }
 0x19b   : > { %p5593_p3 = pnand %p5592_p7, %p5586_p13 }
 0x19d   : > { %5596 = shalt.err (!%p5593_p3)
}
 0x19e   : > { %s5597_s18 = scalar_lea.vmem %s6792_s8, 64  ;;  %s6277_s0 = smov [#allocation36]  }
 0x19f   : > { %p5598_p12 = scmp.ne.s32.totalorder %s6792_s8, %s5597_s18  ;;  %s5602_s24 = sshll.u32 %s6277_s0, 4  ;;  %s5603_s24 = int_to_ptr.vmem [resolvable:$false] %s5602_s24 }
 0x1a0   : > { %s5604_s26 = scalar_lea.vmem %s5603_s24, 128  ;;  %p5605_p10 = scmp.lt.s32.totalorder %s6792_s8, %s5603_s24 }
 0x1a1   : > { %p5600_p6 = pnand %p5598_p12, %p6728_p0  ;;  %p5606_p4 = scmp.lt.s32.totalorder %s5604_s26, %s5597_s18 }
 0x1a3   : > { %p5601_p1 = pneg %p5600_p6  ;;  %p5607_p2 = por %p5606_p4, %p5605_p10 }
 0x1a5   : > { %p5608_p8 = pnand %p5607_p2, %p5601_p1 }
 0x1a7   : > { %5611 = shalt.err (!%p5608_p8)
}
 0x1a8   : > { %4840 = dma.hbm_to_vmem [thread:$0]  (!%p7655_p11), %s6790_s19, 64, %s6792_s8, %s7564_s5  }
 0x1a9   : > { %s5612_s20 = scalar_lea.hbm %s7627_s17, 16  ;;  %p7656_p9 = scmp.ne.s32.totalorder %s7648_s3, 0 }
 0x1aa   : > { %p5613_p13 = scmp.ne.s32.totalorder %s7627_s17, %s5612_s20  ;;  %p5619_p3 = scmp.lt.u32.totalorder %s5612_s20, %s7627_s17 }
 0x1ac   : > { %p5615_p5 = pnand %p5613_p13, %p7656_p9 }
 0x1ae   : > { %p5616_p7 = pneg %p5615_p5 }
 0x1b0   : > { %p5621_p12 = pnand %p5619_p3, %p5616_p7 }
 0x1b2   : > { %5624 = shalt.err (!%p5621_p12)
}
 0x1b3   : > { %s5625_s4 = scalar_lea.vmem %s951_s12, 16  ;;  %s5632_s14 = scalar_lea.vmem %s951_s12, 32 }
 0x1b4   : > { %p5626_p6 = scmp.ne.s32.totalorder %s951_s12, %s5625_s4  ;;  %p5633_p4 = scmp.lt.s32.totalorder %s951_s12, %s951_s12 }
 0x1b5   : > { %p5634_p2 = scmp.lt.s32.totalorder %s5632_s14, %s5625_s4 }
 0x1b6   : > { %p5628_p1 = pnand %p5626_p6, %p7656_p9 }
 0x1b7   : > { %p5635_p8 = por %p5634_p2, %p5633_p4 }
 0x1b8   : > { %p5629_p10 = pneg %p5628_p1 }
 0x1ba   : > { %p5636_p11 = pnand %p5635_p8, %p5629_p10 }
 0x1bc   : > { %5639 = shalt.err (!%p5636_p11)
}
 0x1bd   : > { %p7657_p0 = scmp.ne.s32.totalorder %s7647_s28, 0  ;;  %s7658_s19 = sld [smem:[#allocation70_spill]] }
 0x1be   : > { %s6278_s8 = smov [#allocation11]   ;;  %s6279_s0 = smov [#allocation14]  }
 0x1bf   : > { %4767 = dma.hbm_to_vmem [thread:$0]  (!%p7657_p0), %s7627_s17, 16, %s951_s12, [#allocation7]  }
 0x1c0   : > { %s974_s18 = sshll.u32 %s6278_s8, 4  ;;  %s998_s24 = sshll.u32 %s6279_s0, 4  ;;  %s975_s18 = int_to_ptr.vmem [resolvable:$true] %s974_s18  ;;  %s999_s24 = int_to_ptr.vmem [resolvable:$true] %s998_s24 }
 0x1c3   : > { %s5640_s26 = scalar_lea.hbm %s7658_s19, 16 }
 0x1c4   : > { %p5641_p13 = scmp.ne.s32.totalorder %s7658_s19, %s5640_s26  ;;  %p5647_p3 = scmp.lt.u32.totalorder %s5640_s26, %s7658_s19 }
 0x1c6   : > { %p5643_p5 = pnand %p5641_p13, %p7656_p9 }
 0x1c8   : > { %p5644_p7 = pneg %p5643_p5 }
 0x1ca   : > { %p5649_p11 = pnand %p5647_p3, %p5644_p7 }
 0x1cc   : > { %5652 = shalt.err (!%p5649_p11)
}
 0x1cd   : > { %s5653_s20 = scalar_lea.vmem %s975_s18, 16  ;;  %s5660_s12 = scalar_lea.vmem %s975_s18, 32 }
 0x1ce   : > { %p5654_p12 = scmp.ne.s32.totalorder %s975_s18, %s5653_s20  ;;  %p5661_p10 = scmp.lt.s32.totalorder %s975_s18, %s975_s18 }
 0x1cf   : > { %p5662_p4 = scmp.lt.s32.totalorder %s5660_s12, %s5653_s20 }
 0x1d0   : > { %p5656_p6 = pnand %p5654_p12, %p7656_p9 }
 0x1d1   : > { %p5663_p2 = por %p5662_p4, %p5661_p10 }
 0x1d2   : > { %p5657_p1 = pneg %p5656_p6 }
 0x1d4   : > { %p5664_p8 = pnand %p5663_p2, %p5657_p1 }
 0x1d6   : > { %5667 = shalt.err (!%p5664_p8)
}
 0x1d7   : > { %s7659_s4 = sld [smem:[#allocation72_spill]] }
 0x1d8   : > { %4773 = dma.hbm_to_vmem [thread:$0]  (!%p7657_p0), %s7658_s19, 16, %s975_s18, [#allocation10]  }
 0x1dd   : > { %s5668_s14 = scalar_lea.hbm %s7659_s4, 16 }
 0x1de   : > { %p5669_p13 = scmp.ne.s32.totalorder %s7659_s4, %s5668_s14  ;;  %p5675_p3 = scmp.lt.u32.totalorder %s5668_s14, %s7659_s4 }
 0x1e0   : > { %p5671_p5 = pnand %p5669_p13, %p7656_p9 }
 0x1e2   : > { %p5672_p7 = pneg %p5671_p5 }
 0x1e4   : > { %p5677_p11 = pnand %p5675_p3, %p5672_p7 }
 0x1e6   : > { %5680 = shalt.err (!%p5677_p11)
}
 0x1e7   : > { %s5681_s8 = scalar_lea.vmem %s999_s24, 16  ;;  %s5688_s0 = scalar_lea.vmem %s999_s24, 32 }
 0x1e8   : > { %p5682_p12 = scmp.ne.s32.totalorder %s999_s24, %s5681_s8  ;;  %p5689_p10 = scmp.lt.s32.totalorder %s999_s24, %s999_s24 }
 0x1e9   : > { %p5690_p4 = scmp.lt.s32.totalorder %s5688_s0, %s5681_s8 }
 0x1ea   : > { %p5684_p6 = pnand %p5682_p12, %p7656_p9 }
 0x1eb   : > { %p5691_p2 = por %p5690_p4, %p5689_p10 }
 0x1ec   : > { %p5685_p1 = pneg %p5684_p6 }
 0x1ee   : > { %p5692_p8 = pnand %p5691_p2, %p5685_p1 }
 0x1f0   : > { %5695 = shalt.err (!%p5692_p8)
}
 0x1f1   : > { %s7660_s18 = sld [smem:[#allocation74_spill]]  ;;  %s6280_s26 = smov [#allocation17]  }
 0x1f2   : > { %4779 = dma.hbm_to_vmem [thread:$0]  (!%p7657_p0), %s7659_s4, 16, %s999_s24, [#allocation13]  }
 0x1f3   : > { %s1022_s12 = sshll.u32 %s6280_s26, 4  ;;  %s6281_s14 = smov [#allocation20]   ;;  %s1023_s12 = int_to_ptr.vmem [resolvable:$true] %s1022_s12 }
 0x1f4   : > { %s1046_s5 = sshll.u32 %s6281_s14, 4  ;;  %s1047_s5 = int_to_ptr.vmem [resolvable:$true] %s1046_s5 }
 0x1f7   : > { %s7661_s20 = smov %s7660_s18  ;;  %s5696_s25 = scalar_lea.hbm %s7660_s18, 16 }
 0x1f8   : > { %p5697_p13 = scmp.ne.s32.totalorder %s7661_s20, %s5696_s25  ;;  %p5703_p3 = scmp.lt.u32.totalorder %s5696_s25, %s7661_s20 }
 0x1fa   : > { %p5699_p5 = pnand %p5697_p13, %p7656_p9 }
 0x1fc   : > { %p5700_p7 = pneg %p5699_p5 }
 0x1fe   : > { %p5705_p11 = pnand %p5703_p3, %p5700_p7 }
 0x200   : > { %5708 = shalt.err (!%p5705_p11)
}
 0x201   : > { %s5709_s8 = scalar_lea.vmem %s1023_s12, 16  ;;  %s5716_s24 = scalar_lea.vmem %s1023_s12, 32 }
 0x202   : > { %p5710_p12 = scmp.ne.s32.totalorder %s1023_s12, %s5709_s8  ;;  %p5717_p10 = scmp.lt.s32.totalorder %s1023_s12, %s1023_s12 }
 0x203   : > { %p5718_p4 = scmp.lt.s32.totalorder %s5716_s24, %s5709_s8 }
 0x204   : > { %p5712_p6 = pnand %p5710_p12, %p7656_p9 }
 0x205   : > { %p5719_p2 = por %p5718_p4, %p5717_p10 }
 0x206   : > { %p5713_p1 = pneg %p5712_p6 }
 0x208   : > { %p5720_p8 = pnand %p5719_p2, %p5713_p1 }
 0x20a   : > { %5723 = shalt.err (!%p5720_p8)
}
 0x20b   : > { %s7662_s0 = sld [smem:[#allocation76_spill]] }
 0x20c   : > { %4785 = dma.hbm_to_vmem [thread:$0]  (!%p7657_p0), %s7661_s20, 16, %s1023_s12, [#allocation16]  }
 0x211   : > { %s7663_s14 = smov %s7662_s0  ;;  %s5724_s25 = scalar_lea.hbm %s7662_s0, 16 }
 0x212   : > { %p5725_p13 = scmp.ne.s32.totalorder %s7663_s14, %s5724_s25  ;;  %p5731_p3 = scmp.lt.u32.totalorder %s5724_s25, %s7663_s14 }
 0x214   : > { %p5727_p5 = pnand %p5725_p13, %p7656_p9 }
 0x216   : > { %p5728_p7 = pneg %p5727_p5 }
 0x218   : > { %p5733_p11 = pnand %p5731_p3, %p5728_p7 }
 0x21a   : > { %5736 = shalt.err (!%p5733_p11)
}
 0x21b   : > { %s5737_s18 = scalar_lea.vmem %s1047_s5, 16  ;;  %s5744_s26 = scalar_lea.vmem %s1047_s5, 32 }
 0x21c   : > { %p5738_p12 = scmp.ne.s32.totalorder %s1047_s5, %s5737_s18  ;;  %p5745_p10 = scmp.lt.s32.totalorder %s1047_s5, %s1047_s5 }
 0x21d   : > { %p5746_p4 = scmp.lt.s32.totalorder %s5744_s26, %s5737_s18 }
 0x21e   : > { %p5740_p6 = pnand %p5738_p12, %p7656_p9 }
 0x21f   : > { %p5747_p2 = por %p5746_p4, %p5745_p10 }
 0x220   : > { %p5741_p1 = pneg %p5740_p6 }
 0x222   : > { %p5748_p8 = pnand %p5747_p2, %p5741_p1 }
 0x224   : > { %5751 = shalt.err (!%p5748_p8)
}
 0x225   : > { %s7664_s12 = sld [smem:[#allocation78_spill]]  ;;  %s6282_s8 = smov [#allocation23]  }
 0x226   : > { %4791 = dma.hbm_to_vmem [thread:$0]  (!%p7657_p0), %s7663_s14, 16, %s1047_s5, [#allocation19]  }
 0x227   : > { %s1070_s24 = sshll.u32 %s6282_s8, 4  ;;  %s6283_s0 = smov [#allocation26]   ;;  %s1071_s24 = int_to_ptr.vmem [resolvable:$true] %s1070_s24 }
 0x228   : > { %s1092_s25 = sshll.u32 %s6283_s0, 4  ;;  %s1093_s25 = int_to_ptr.vmem [resolvable:$true] %s1092_s25 }
 0x22b   : > { %s5752_s4 = scalar_lea.hbm %s7664_s12, 16 }
 0x22c   : > { %p5753_p13 = scmp.ne.s32.totalorder %s7664_s12, %s5752_s4  ;;  %p5759_p3 = scmp.lt.u32.totalorder %s5752_s4, %s7664_s12 }
 0x22e   : > { %p5755_p5 = pnand %p5753_p13, %p7656_p9 }
 0x230   : > { %p5756_p7 = pneg %p5755_p5 }
 0x232   : > { %p5761_p11 = pnand %p5759_p3, %p5756_p7 }
 0x234   : > { %5764 = shalt.err (!%p5761_p11)
}
 0x235   : > { %s5765_s18 = scalar_lea.vmem %s1071_s24, 16  ;;  %s5772_s5 = scalar_lea.vmem %s1071_s24, 32 }
 0x236   : > { %p5766_p12 = scmp.ne.s32.totalorder %s1071_s24, %s5765_s18  ;;  %p5773_p10 = scmp.lt.s32.totalorder %s1071_s24, %s1071_s24 }
 0x237   : > { %p5774_p4 = scmp.lt.s32.totalorder %s5772_s5, %s5765_s18 }
 0x238   : > { %p5768_p6 = pnand %p5766_p12, %p7656_p9 }
 0x239   : > { %p5775_p2 = por %p5774_p4, %p5773_p10 }
 0x23a   : > { %p5769_p1 = pneg %p5768_p6 }
 0x23c   : > { %p5776_p8 = pnand %p5775_p2, %p5769_p1 }
 0x23e   : > { %5779 = shalt.err (!%p5776_p8)
}
 0x23f   : > { %s7665_s26 = sld [smem:[#allocation80_spill]] }
 0x240   : > { %4797 = dma.hbm_to_vmem [thread:$0]  (!%p7657_p0), %s7664_s12, 16, %s1071_s24, [#allocation22]  }
 0x245   : > { %s7666_s8 = smov %s7665_s26  ;;  %s5780_s4 = scalar_lea.hbm %s7665_s26, 16 }
 0x246   : > { %p5781_p13 = scmp.ne.s32.totalorder %s7666_s8, %s5780_s4  ;;  %p5787_p3 = scmp.lt.u32.totalorder %s5780_s4, %s7666_s8 }
 0x248   : > { %p5783_p5 = pnand %p5781_p13, %p7656_p9 }
 0x24a   : > { %p5784_p7 = pneg %p5783_p5 }
 0x24c   : > { %p5789_p11 = pnand %p5787_p3, %p5784_p7 }
 0x24e   : > { %5792 = shalt.err (!%p5789_p11)
}
 0x24f   : > { %s5793_s0 = scalar_lea.vmem %s1093_s25, 16  ;;  %s5800_s18 = scalar_lea.vmem %s1093_s25, 32 }
 0x250   : > { %p5794_p12 = scmp.ne.s32.totalorder %s1093_s25, %s5793_s0  ;;  %p5801_p10 = scmp.lt.s32.totalorder %s1093_s25, %s1093_s25 }
 0x251   : > { %p5802_p4 = scmp.lt.s32.totalorder %s5800_s18, %s5793_s0 }
 0x252   : > { %p5796_p6 = pnand %p5794_p12, %p7656_p9 }
 0x253   : > { %p5803_p2 = por %p5802_p4, %p5801_p10 }
 0x254   : > { %p5797_p1 = pneg %p5796_p6 }
 0x256   : > { %p5804_p8 = pnand %p5803_p2, %p5797_p1 }
 0x258   : > { %5807 = shalt.err (!%p5804_p8)
}
 0x259   : > { %s7667_s24 = sld [smem:[#allocation94_spill]]  ;;  %s6284_s5 = smov [#allocation44]  }
 0x25a   : > { %4803 = dma.hbm_to_vmem [thread:$0]  (!%p7657_p0), %s7666_s8, 16, %s1093_s25, [#allocation25]  }
 0x25b   : > { %s1128_s26 = sshll.u32 %s6284_s5, 4  ;;  %s6285_s4 = smov [#allocation45]   ;;  %s1129_s26 = int_to_ptr.vmem [resolvable:$true] %s1128_s26 }
 0x25c   : > { %s1144_s6 = sshll.u32 %s6285_s4, 4  ;;  %s1145_s6 = int_to_ptr.vmem [resolvable:$true] %s1144_s6 }
 0x25f   : > { %s5808_s12 = scalar_lea.hbm %s7667_s24, 16 }
 0x260   : > { %p5809_p13 = scmp.ne.s32.totalorder %s7667_s24, %s5808_s12  ;;  %p5815_p3 = scmp.lt.u32.totalorder %s5808_s12, %s7667_s24 }
 0x262   : > { %p5811_p5 = pnand %p5809_p13, %p7656_p9 }
 0x264   : > { %p5812_p7 = pneg %p5811_p5 }
 0x266   : > { %p5817_p11 = pnand %p5815_p3, %p5812_p7 }
 0x268   : > { %5820 = shalt.err (!%p5817_p11)
}
 0x269   : > { %s5821_s0 = scalar_lea.vmem %s1129_s26, 16  ;;  %s5828_s25 = scalar_lea.vmem %s1129_s26, 32 }
 0x26a   : > { %p5822_p12 = scmp.ne.s32.totalorder %s1129_s26, %s5821_s0  ;;  %p5829_p10 = scmp.lt.s32.totalorder %s1129_s26, %s1129_s26 }
 0x26b   : > { %p5830_p4 = scmp.lt.s32.totalorder %s5828_s25, %s5821_s0 }
 0x26c   : > { %p5824_p6 = pnand %p5822_p12, %p7656_p9 }
 0x26d   : > { %p5831_p2 = por %p5830_p4, %p5829_p10 }
 0x26e   : > { %p5825_p1 = pneg %p5824_p6 }
 0x270   : > { %p5832_p8 = pnand %p5831_p2, %p5825_p1 }
 0x272   : > { %5835 = shalt.err (!%p5832_p8)
}
 0x273   : > { %4812 = dma.hbm_to_vmem [thread:$0]  (!%p7657_p0), %s7667_s24, 16, %s1129_s26, [#allocation43]  }
 0x274   : > { %s5836_s12 = scalar_lea.hbm %s7626_s27, 1024 }
 0x275   : > { %p5837_p13 = scmp.ne.s32.totalorder %s7626_s27, %s5836_s12  ;;  %p5843_p3 = scmp.lt.u32.totalorder %s5836_s12, %s7626_s27 }
 0x277   : > { %p5839_p5 = pnand %p5837_p13, %p7656_p9 }
 0x279   : > { %p5840_p7 = pneg %p5839_p5 }
 0x27b   : > { %p5845_p11 = pnand %p5843_p3, %p5840_p7 }
 0x27d   : > { %5848 = shalt.err (!%p5845_p11)
}
 0x27e   : > { %s5849_s18 = scalar_lea.vmem %s1145_s6, 1024  ;;  %p5857_p10 = scmp.lt.s32.totalorder %s1145_s6, %s1145_s6 }
 0x27f   : > { %p5850_p12 = scmp.ne.s32.totalorder %s1145_s6, %s5849_s18  ;;  %p5858_p4 = scmp.lt.s32.totalorder %s5849_s18, %s5849_s18 }
 0x281   : > { %p5852_p6 = pnand %p5850_p12, %p7656_p9  ;;  %p5859_p2 = por %p5858_p4, %p5857_p10 }
 0x283   : > { %p5853_p1 = pneg %p5852_p6 }
 0x285   : > { %p5860_p8 = pnand %p5859_p2, %p5853_p1 }
 0x287   : > { %5863 = shalt.err (!%p5860_p8)
}
 0x288   : > { %s7668_s5 = smov 4   ;;  %s7669_s26 = smov 64  }
 0x289   : > { %s7670_s4 = sld [smem:[#allocation102_spill]]  ;;  %s7671_s0 = sld [smem:[#allocation101_spill]] }
 0x28a   : > { %s7672_s3 = sld [smem:[#allocation100_spill]]  ;;  %s4117_s28 = sadd.s32 4294967294, %s6226_s7  }
 0x28b   : > { %4815 = dma.hbm_to_vmem [thread:$0]  (!%p7657_p0), %s7626_s27, 1024, %s1145_s6, [#allocation46], %s7669_s26, %s7669_s26, %s7668_s5  }
 0x28c   : > { %s118_s25 = sadd.s32 1, %s6218_s1  ;;  %s121_s12 = sadd.s32 1, %s6222_s2 }
 0x28d   : > { %p119_p9 = scmp.ge.s32.totalorder %s118_s25, 2  ;;  %p7674_p0 = scmp.eq.s32.totalorder %s6226_s7, 0 }
 0x28e   : > { %p7676_p3 = scmp.eq.s32.totalorder %s6545_s10, 0  ;;  %s7678_s14 = sld [smem:[#allocation65_spill]] }
 0x28f   : > { %s128_s18 = sadd.s32 1, %s7670_s4  ;;  %p135_p13 = scmp.ne.s32.totalorder %s7670_s4, %s7671_s0 }
 0x290   : > { %p141_p5 = scmp.ne.s32.totalorder %s7671_s0, %s7672_s3  ;;  %s7755_s25 = smov (%p119_p9, %s118_s25), 0 }
 0x291   : > { %7673 = sst [smem:[#allocation107_spill]] %s7755_s25  ;;  %s7757_s12 = smov (!%p119_p9, %s121_s12), %s6222_s2 }
 0x292   : > { %p6926_p7 = por %p7674_p0, %p135_p13  ;;  %p6935_p11 = por %p7676_p3, %p141_p5 }
 0x293   : > { %p123_p12 = scmp.ge.s32.totalorder %s7757_s12, 2  ;;  %s497_s17 = ssub.s32 %s6218_s1, %s7755_s25 }
 0x294   : > { %s7677_s8 = scalar_select %p6935_p11, 1, 0 }
 0x295   : > { %p498_p6 = scmp.eq.s32.totalorder %s497_s17, 0  ;;  %s500_s19 = sadd.s32 1, %s6194_s16 }
 0x296   : > { %s7759_s12 = smov (%p123_p12, %s7757_s12), 0  ;;  %p913_p1 = scmp.eq.s32.totalorder %s6545_s10, 3 }
 0x297   : > { %7679 = sst [smem:[#allocation108_spill]] %s7759_s12  ;;  %s125_s24 = ssub.s32 %s6222_s2, %s7759_s12 }
 0x298   : > { %s6945_s20 = scalar_select %p498_p6, %s6194_s16, %s500_s19  }
 0x299   : > { %p126_p10 = scmp.eq.s32.totalorder %s125_s24, 0  ;;  %p919_p4 = scmp.eq.s32.totalorder %s4117_s28, 3 }
 0x29a   : > { %p6953_p2 = por %p913_p1, %p135_p13  ;;  %s1161_s29 = sand.u32 1, %s7670_s4  }
 0x29b   : > { %s7761_s4 = smov (!%p126_p10, %s7670_s4), %s128_s18  ;;  %p6964_p8 = por %p919_p4, %p141_p5 }
 0x29c   : > { %s7680_s27 = scalar_select %p6953_p2, 1, 0 }
 0x29d   : > { %s7681_s17 = scalar_select %p6964_p8, 1, 0 }
 0x29e   : > { %s4138_s19 = sshll.u32 %s1161_s29, 3  ;;  %s4139_s30 = sshll.u32 %s6222_s2, 7 }
 0x29f   : > { %s6970_s12 = scalar_lea.hbm %s7678_s14, %s4139_s30  ;;  %s1165_s24 = scalar_lea.vmem [#allocation3], %s4138_s19 }
 0x2a0   : > { %s1172_s28 = sshll.u32 %s1165_s24, 4  ;;  %p7682_p9 = scmp.lt.s32.totalorder %s6226_s7, 4  ;;  %s6980_s28 = int_to_ptr.vmem [resolvable:$true] %s1172_s28 }
 0x2a1   : > { %s1162_s18 = scalar_lea.sflag [#allocation4], %s1161_s29  ;;  %s5864_s30 = scalar_lea.hbm %s6970_s12, 128 }
 0x2a2   : > { %p6976_p13 = pnand %p7682_p9, %p6926_p7  ;;  %p5865_p5 = scmp.ne.s32.totalorder %s6970_s12, %s5864_s30 }
 0x2a3   : > { %s5869_s6 = scalar_lea.hbm %s7678_s14, 256  ;;  %p5870_p6 = scmp.lt.u32.totalorder %s6970_s12, %s7678_s14 }
 0x2a4   : > { %p5866_p0 = pneg %p6976_p13  ;;  %p5871_p7 = scmp.lt.u32.totalorder %s5869_s6, %s5864_s30 }
 0x2a5   : > { %p5873_p10 = scmp.lt.u32.totalorder %s5864_s30, %s6970_s12 }
 0x2a6   : > { %p5867_p3 = pnand %p5866_p0, %p5865_p5  ;;  %p5872_p1 = por %p5871_p7, %p5870_p6 }
 0x2a8   : > { %p5868_p12 = pneg %p5867_p3  ;;  %p5874_p4 = por %p5873_p10, %p5872_p1 }
 0x2aa   : > { %p5875_p9 = pnand %p5874_p4, %p5868_p12 }
 0x2ac   : > { %5878 = shalt.err (!%p5875_p9)
}
 0x2ad   : > { %s5879_s29 = scalar_lea.vmem %s6980_s28, 128  ;;  %s6286_s19 = smov [#allocation3]  }
 0x2ae   : > { %p5880_p8 = scmp.ne.s32.totalorder %s6980_s28, %s5879_s29  ;;  %s5884_s24 = sshll.u32 %s6286_s19, 4  ;;  %s5885_s24 = int_to_ptr.vmem [resolvable:$false] %s5884_s24 }
 0x2af   : > { %s5886_s3 = scalar_lea.vmem %s5885_s24, 256  ;;  %p5887_p5 = scmp.lt.s32.totalorder %s6980_s28, %s5885_s24 }
 0x2b0   : > { %p5882_p2 = pnand %p5880_p8, %p5866_p0  ;;  %p5888_p3 = scmp.lt.s32.totalorder %s5886_s3, %s5879_s29 }
 0x2b2   : > { %p5883_p11 = pneg %p5882_p2  ;;  %p5889_p6 = por %p5888_p3, %p5887_p5 }
 0x2b4   : > { %p5890_p7 = pnand %p5889_p6, %p5883_p11 }
 0x2b6   : > { %5893 = shalt.err (!%p5890_p7)
}
 0x2b7   : > { %s7684_s30 = sld [smem:[#allocation83_spill]]  ;;  %s4354_s6 = sshll.u32 %s6218_s1, 10 }
 0x2b8   : > { %4819 = dma.hbm_to_vmem [thread:$0]  (!%p6976_p13), %s6970_s12, 128, %s6980_s28, %s1162_s18  }
 0x2b9   : > { %s7685_s19 = sshll.u32 %s6701_s11, 6  ;;  %p7686_p2 = scmp.ne.s32.totalorder %s7652_s9, 0 }
 0x2ba   : > { %s1213_s14 = scalar_lea.vmem [#allocation29], %s7685_s19 }
 0x2bb   : > { %s1220_s25 = sshll.u32 %s1213_s14, 4  ;;  %s7010_s25 = int_to_ptr.vmem [resolvable:$true] %s1220_s25 }
 0x2bd   : > { %s7008_s24 = scalar_lea.hbm %s7684_s30, %s4354_s6  ;;  %s5899_s3 = scalar_lea.hbm %s7684_s30, 2048 }
 0x2be   : > { %s5894_s0 = scalar_lea.hbm %s7008_s24, 1024  ;;  %p5900_p12 = scmp.lt.u32.totalorder %s7008_s24, %s7684_s30 }
 0x2bf   : > { %p5895_p11 = scmp.ne.s32.totalorder %s7008_s24, %s5894_s0  ;;  %p5901_p13 = scmp.lt.u32.totalorder %s5899_s3, %s5894_s0 }
 0x2c0   : > { %p5903_p10 = scmp.lt.u32.totalorder %s5894_s0, %s7008_s24 }
 0x2c1   : > { %p5897_p8 = pnand %p5895_p11, %p7686_p2  ;;  %p5902_p1 = por %p5901_p13, %p5900_p12 }
 0x2c3   : > { %p5898_p0 = pneg %p5897_p8  ;;  %p5904_p4 = por %p5903_p10, %p5902_p1 }
 0x2c5   : > { %p5905_p9 = pnand %p5904_p4, %p5898_p0 }
 0x2c7   : > { %5908 = shalt.err (!%p5905_p9)
}
 0x2c8   : > { %s5909_s14 = scalar_lea.vmem %s7010_s25, 1024  ;;  %s6287_s12 = smov [#allocation29]  }
 0x2c9   : > { %p5910_p5 = scmp.ne.s32.totalorder %s7010_s25, %s5909_s14  ;;  %s5914_s28 = sshll.u32 %s6287_s12, 4  ;;  %s5915_s28 = int_to_ptr.vmem [resolvable:$false] %s5914_s28 }
 0x2ca   : > { %s5916_s18 = scalar_lea.vmem %s5915_s28, 2048  ;;  %p5917_p7 = scmp.lt.s32.totalorder %s7010_s25, %s5915_s28 }
 0x2cb   : > { %p5912_p3 = pnand %p5910_p5, %p7686_p2  ;;  %p5918_p11 = scmp.lt.s32.totalorder %s5916_s18, %s5909_s14 }
 0x2cd   : > { %p5913_p6 = pneg %p5912_p3  ;;  %p5919_p8 = por %p5918_p11, %p5917_p7 }
 0x2cf   : > { %p5920_p12 = pnand %p5919_p8, %p5913_p6 }
 0x2d1   : > { %5923 = shalt.err (!%p5920_p12)
}
 0x2d2   : > { %p7687_p0 = scmp.ne.s32.totalorder %s7651_s23, 0  ;;  %s7688_s29 = scalar_lea.sflag [#allocation28], %s6690_s13 }
 0x2d3   : > { %s7689_s6 = sld [smem:[#allocation85_spill]]  ;;  %s1250_s0 = scalar_lea.vmem [#allocation32], %s6701_s11 }
 0x2d4   : > { %4825 = dma.hbm_to_vmem [thread:$0]  (!%p7687_p0), %s7008_s24, 1024, %s7010_s25, %s7688_s29, %s7669_s26, %s7669_s26, %s7668_s5  }
 0x2d5   : > { %s1257_s3 = sshll.u32 %s1250_s0, 4  ;;  %s7584_s14 = sshll.u32 %s6701_s11, 8  ;;  %s1258_s3 = int_to_ptr.vmem [resolvable:$true] %s1257_s3 }
 0x2d9   : > { %s7036_s19 = scalar_lea.hbm %s7689_s6, %s6704_s21  ;;  %s5929_s28 = scalar_lea.hbm %s7689_s6, 32 }
 0x2da   : > { %s5924_s12 = scalar_lea.hbm %s7036_s19, 16  ;;  %p5930_p4 = scmp.lt.u32.totalorder %s7036_s19, %s7689_s6 }
 0x2db   : > { %p5925_p13 = scmp.ne.s32.totalorder %s7036_s19, %s5924_s12  ;;  %p5931_p9 = scmp.lt.u32.totalorder %s5929_s28, %s5924_s12 }
 0x2dc   : > { %p5933_p3 = scmp.lt.u32.totalorder %s5924_s12, %s7036_s19 }
 0x2dd   : > { %p5927_p1 = pnand %p5925_p13, %p7686_p2  ;;  %p5932_p5 = por %p5931_p9, %p5930_p4 }
 0x2df   : > { %p5928_p10 = pneg %p5927_p1  ;;  %p5934_p6 = por %p5933_p3, %p5932_p5 }
 0x2e1   : > { %p5935_p7 = pnand %p5934_p6, %p5928_p10 }
 0x2e3   : > { %5938 = shalt.err (!%p5935_p7)
}
 0x2e4   : > { %s5939_s25 = scalar_lea.vmem %s1258_s3, 16  ;;  %s6288_s24 = smov [#allocation32]  }
 0x2e5   : > { %p5940_p11 = scmp.ne.s32.totalorder %s1258_s3, %s5939_s25  ;;  %s5944_s18 = sshll.u32 %s6288_s24, 4  ;;  %s5945_s18 = int_to_ptr.vmem [resolvable:$false] %s5944_s18 }
 0x2e6   : > { %s5946_s29 = scalar_lea.vmem %s5945_s18, 32  ;;  %p5947_p13 = scmp.lt.s32.totalorder %s1258_s3, %s5945_s18 }
 0x2e7   : > { %p5942_p8 = pnand %p5940_p11, %p7686_p2  ;;  %p5948_p1 = scmp.lt.s32.totalorder %s5946_s29, %s5939_s25 }
 0x2e9   : > { %p5943_p12 = pneg %p5942_p8  ;;  %p5949_p0 = por %p5948_p1, %p5947_p13 }
 0x2eb   : > { %p5950_p4 = pnand %p5949_p0, %p5943_p12 }
 0x2ed   : > { %5953 = shalt.err (!%p5950_p4)
}
 0x2ee   : > { %p7690_p9 = scmp.ne.s32.totalorder %s7651_s23, 0  ;;  %s7691_s0 = scalar_lea.sflag [#allocation31], %s6690_s13 }
 0x2ef   : > { %s7692_s12 = sld [smem:[#allocation87_spill]]  ;;  %s4355_s28 = sshll.u32 %s6218_s1, 12 }
 0x2f0   : > { %4831 = dma.hbm_to_vmem [thread:$0]  (!%p7690_p9), %s7036_s19, 16, %s1258_s3, %s7691_s0  }
 0x2f1   : > { %s1285_s24 = scalar_lea.vmem [#allocation35], %s7584_s14 }
 0x2f2   : > { %s1292_s25 = sshll.u32 %s1285_s24, 4  ;;  %s7063_s25 = int_to_ptr.vmem [resolvable:$true] %s1292_s25 }
 0x2f5   : > { %s7061_s18 = scalar_lea.hbm %s7692_s12, %s4355_s28  ;;  %s5959_s6 = scalar_lea.hbm %s7692_s12, 8192 }
 0x2f6   : > { %s5954_s29 = scalar_lea.hbm %s7061_s18, 4096  ;;  %p5960_p3 = scmp.lt.u32.totalorder %s7061_s18, %s7692_s12 }
 0x2f7   : > { %p5955_p0 = scmp.ne.s32.totalorder %s7061_s18, %s5954_s29  ;;  %p5961_p6 = scmp.lt.u32.totalorder %s5959_s6, %s5954_s29 }
 0x2f8   : > { %p5963_p11 = scmp.lt.u32.totalorder %s5954_s29, %s7061_s18 }
 0x2f9   : > { %p5957_p10 = pnand %p5955_p0, %p7686_p2  ;;  %p5962_p7 = por %p5961_p6, %p5960_p3 }
 0x2fb   : > { %p5958_p5 = pneg %p5957_p10  ;;  %p5964_p8 = por %p5963_p11, %p5962_p7 }
 0x2fd   : > { %p5965_p12 = pnand %p5964_p8, %p5958_p5 }
 0x2ff   : > { %5968 = shalt.err (!%p5965_p12)
}
 0x300   : > { %s5969_s19 = scalar_lea.vmem %s7063_s25, 4096  ;;  %s6289_s3 = smov [#allocation35]  }
 0x301   : > { %p5970_p13 = scmp.ne.s32.totalorder %s7063_s25, %s5969_s19  ;;  %s5974_s0 = sshll.u32 %s6289_s3, 4  ;;  %s5975_s0 = int_to_ptr.vmem [resolvable:$false] %s5974_s0 }
 0x302   : > { %s5976_s24 = scalar_lea.vmem %s5975_s0, 8192  ;;  %p5977_p0 = scmp.lt.s32.totalorder %s7063_s25, %s5975_s0 }
 0x303   : > { %p5972_p1 = pnand %p5970_p13, %p7686_p2  ;;  %p5978_p10 = scmp.lt.s32.totalorder %s5976_s24, %s5969_s19 }
 0x305   : > { %p5973_p4 = pneg %p5972_p1  ;;  %p5979_p3 = por %p5978_p10, %p5977_p0 }
 0x307   : > { %p5980_p6 = pnand %p5979_p3, %p5973_p4 }
 0x309   : > { %5983 = shalt.err (!%p5980_p6)
}
 0x30a   : > { %s6290_s6 = smov 256   ;;  %s7693_s29 = sld [smem:[#allocation89_spill]] }
 0x30b   : > { %s6291_s14 = smov 16   ;;  %s7694_s3 = scalar_lea.sflag [#allocation34], %s6690_s13 }
 0x30c   : > { %4837 = dma.hbm_to_vmem [thread:$0]  (!%p7690_p9), %s7061_s18, 4096, %s7063_s25, %s7694_s3, %s6290_s6, %s6290_s6, %s6291_s14  }
 0x30d   : > { %s7695_s0 = sshll.u32 %s6701_s11, 8 }
 0x30e   : > { %s1325_s24 = scalar_lea.vmem [#allocation38], %s7695_s0 }
 0x30f   : > { %s1332_s12 = sshll.u32 %s1325_s24, 4  ;;  %s7091_s12 = int_to_ptr.vmem [resolvable:$true] %s1332_s12 }
 0x310   : > { %s7087_s19 = scalar_lea.hbm %s7693_s29, %s4355_s28  ;;  %s5989_s2 = scalar_lea.hbm %s7693_s29, 8192 }
 0x311   : > { %s5984_s30 = scalar_lea.hbm %s7087_s19, 4096  ;;  %p5990_p8 = scmp.lt.u32.totalorder %s7087_s19, %s7693_s29 }
 0x312   : > { %p5985_p5 = scmp.ne.s32.totalorder %s7087_s19, %s5984_s30  ;;  %p5991_p12 = scmp.lt.u32.totalorder %s5989_s2, %s5984_s30 }
 0x313   : > { %p5993_p1 = scmp.lt.u32.totalorder %s5984_s30, %s7087_s19 }
 0x314   : > { %p5987_p7 = pnand %p5985_p5, %p7686_p2  ;;  %p5992_p13 = por %p5991_p12, %p5990_p8 }
 0x316   : > { %p5988_p11 = pneg %p5987_p7  ;;  %p5994_p4 = por %p5993_p1, %p5992_p13 }
 0x318   : > { %p5995_p0 = pnand %p5994_p4, %p5988_p11 }
 0x31a   : > { %5998 = shalt.err (!%p5995_p0)
}
 0x31b   : > { %s5999_s14 = scalar_lea.vmem %s7091_s12, 4096  ;;  %s6292_s28 = smov [#allocation38]  }
 0x31c   : > { %p6000_p10 = scmp.ne.s32.totalorder %s7091_s12, %s5999_s14  ;;  %s6004_s25 = sshll.u32 %s6292_s28, 4  ;;  %s6005_s25 = int_to_ptr.vmem [resolvable:$false] %s6004_s25 }
 0x31d   : > { %s6006_s18 = scalar_lea.vmem %s6005_s25, 8192  ;;  %p6007_p5 = scmp.lt.s32.totalorder %s7091_s12, %s6005_s25 }
 0x31e   : > { %p6002_p3 = pnand %p6000_p10, %p7686_p2  ;;  %p6008_p7 = scmp.lt.s32.totalorder %s6006_s18, %s5999_s14 }
 0x320   : > { %p6003_p6 = pneg %p6002_p3  ;;  %p6009_p8 = por %p6008_p7, %p6007_p5 }
 0x322   : > { %p6010_p12 = pnand %p6009_p8, %p6003_p6 }
 0x324   : > { %6013 = shalt.err (!%p6010_p12)
}
 0x325   : > { %s7696_s2 = scalar_lea.sflag [#allocation37], %s6690_s13  ;;  %s7697_s30 = sld [smem:[#allocation90_spill]] }
 0x326   : > { %4843 = dma.hbm_to_vmem [thread:$0]  (!%p7690_p9), %s7087_s19, 4096, %s7091_s12, %s7696_s2, %s7669_s26, %s7669_s26, %s7668_s5  }
 0x327   : > { %s1345_s3 = scalar_lea.vmem [#allocation39], %s6701_s11  ;;  %s1343_s24 = scalar_lea.sflag [#allocation40], %s6690_s13 }
 0x328   : > { %s1352_s0 = sshll.u32 %s1345_s3, 4  ;;  %s1353_s0 = int_to_ptr.vmem [resolvable:$true] %s1352_s0 }
 0x32b   : > { %s7117_s6 = scalar_lea.hbm %s7697_s30, %s6704_s21  ;;  %s6019_s28 = scalar_lea.hbm %s7697_s30, 32 }
 0x32c   : > { %s6014_s14 = scalar_lea.hbm %s7117_s6, 16  ;;  %p6020_p4 = scmp.lt.u32.totalorder %s7117_s6, %s7697_s30 }
 0x32d   : > { %p6015_p11 = scmp.ne.s32.totalorder %s7117_s6, %s6014_s14  ;;  %p6021_p0 = scmp.lt.u32.totalorder %s6019_s28, %s6014_s14 }
 0x32e   : > { %p6023_p3 = scmp.lt.u32.totalorder %s6014_s14, %s7117_s6 }
 0x32f   : > { %p6017_p13 = pnand %p6015_p11, %p7686_p2  ;;  %p6022_p10 = por %p6021_p0, %p6020_p4 }
 0x331   : > { %p6018_p1 = pneg %p6017_p13  ;;  %p6024_p6 = por %p6023_p3, %p6022_p10 }
 0x333   : > { %p6025_p5 = pnand %p6024_p6, %p6018_p1 }
 0x335   : > { %6028 = shalt.err (!%p6025_p5)
}
 0x336   : > { %s6029_s21 = scalar_lea.vmem %s1353_s0, 16  ;;  %s6293_s13 = smov [#allocation39]  }
 0x337   : > { %p6030_p7 = scmp.ne.s32.totalorder %s1353_s0, %s6029_s21  ;;  %s6034_s11 = sshll.u32 %s6293_s13, 4  ;;  %s6035_s11 = int_to_ptr.vmem [resolvable:$false] %s6034_s11 }
 0x338   : > { %s6036_s5 = scalar_lea.vmem %s6035_s11, 32  ;;  %p6037_p11 = scmp.lt.s32.totalorder %s1353_s0, %s6035_s11 }
 0x339   : > { %p6032_p8 = pnand %p6030_p7, %p7686_p2  ;;  %p6038_p13 = scmp.lt.s32.totalorder %s6036_s5, %s6029_s21 }
 0x33b   : > { %p6033_p12 = pneg %p6032_p8  ;;  %p6039_p9 = por %p6038_p13, %p6037_p11 }
 0x33d   : > { %p6040_p0 = pnand %p6039_p9, %p6033_p12 }
 0x33f   : > { %6043 = shalt.err (!%p6040_p0)
}
 0x340   : > { %p7698_p4 = scmp.ne.s32.totalorder %s7651_s23, 0  ;;  %s7699_s26 = sld [smem:[#allocation106_spill]] }
 0x342   : > { %4846 = dma.hbm_to_vmem [thread:$0]  (!%p7698_p4), %s7117_s6, 16, %s1353_s0, %s1343_s24  }
 0x346   : > { %p7700_p1 = scmp.ne.s32.totalorder %s7699_s26, 0 }
 0x347   : > { %s7701_s12 = sld [smem:[#allocation101_spill]] (!%p7700_p1)  ;;  %p7702_p2 = scmp.ne.s32.totalorder (!%p7700_p1), %s7677_s8, 0 }
 0x348   : > { %1361 = sbr.rel (%p7700_p1) target bundleno = 4526 (0x11ae), region = 156 }
 0x34d   : > { %s7137_s9 = sand.u32 (!%p7700_p1), 1, %s7701_s12  }
 0x34e   : > { %s4158_s19 = sshll.u32 (!%p7700_p1), %s7137_s9, 3  ;;  %s1364_s25 = scalar_lea.sflag (!%p7700_p1), [#allocation4], %s7137_s9 }
 0x34f   : > { %s7143_s18 = scalar_lea.vmem [#allocation3], %s4158_s19 }
 0x350   : > { %6117 = dma.done.wait (%p7702_p2), %s1364_s25, 128  }
 0x351   : > { %6119 = vsyncadd (%p7702_p2), %s1364_s25, 4294967168  ;;  %p7703_p9 = scmp.eq.s32.totalorder %s6545_s10, 0 }
 0x353   : > { %6121 = dma.done.wait (%p7703_p9), [#allocation7], 32   ;;  %p7704_p10 = pmov %p7703_p9 }
 0x354   : > { %p7705_p3 = pmov %p7703_p9 }
 0x355   : > { %6123 = vsyncadd (%p7704_p10), [#allocation7], 4294967264 }
 0x356   : > { %6125 = dma.done.wait (%p7705_p3), [#allocation10], 1040   ;;  %p7706_p6 = pmov %p7705_p3 }
 0x357   : > { %p7707_p5 = pmov %p7705_p3 }
 0x358   : > { %6127 = vsyncadd (%p7706_p6), [#allocation10], 4294966256 }
 0x359   : > { %6129 = dma.done.wait (%p7707_p5), [#allocation13], 1040   ;;  %p7708_p7 = pmov %p7705_p3 }
 0x35a   : > { %p7709_p8 = pmov %p7705_p3 }
 0x35b   : > { %6131 = vsyncadd (%p7708_p7), [#allocation13], 4294966256 }
 0x35c   : > { %6133 = dma.done.wait (%p7709_p8), [#allocation16], 1040   ;;  %p7710_p12 = pmov %p7705_p3 }
 0x35d   : > { %p7711_p11 = pmov %p7705_p3 }
 0x35e   : > { %6135 = vsyncadd (%p7710_p12), [#allocation16], 4294966256 }
 0x35f   : > { %6137 = dma.done.wait (%p7711_p11), [#allocation19], 1040   ;;  %p7712_p13 = pmov %p7705_p3 }
 0x360   : > { %p7713_p0 = pmov %p7705_p3 }
 0x361   : > { %6139 = vsyncadd (%p7712_p13), [#allocation19], 4294966256 }
 0x362   : > { %6141 = dma.done.wait (%p7713_p0), [#allocation22], 1040   ;;  %p7714_p4 = pmov %p7713_p0 }
 0x363   : > { %p7715_p1 = pmov %p7713_p0 }
 0x364   : > { %6143 = vsyncadd (%p7714_p4), [#allocation22], 4294966256 }
 0x365   : > { %6145 = dma.done.wait (%p7715_p1), [#allocation25], 32   ;;  %p7716_p2 = pmov %p7713_p0 }
 0x366   : > { %s1428_s23 = sand.u32 1, %s6545_s10   ;;  %s7179_s8 = sand.u32 1, %s6190_s15  }
 0x367   : > { %6147 = vsyncadd (%p7716_p2), [#allocation25], 4294967264  ;;  %s1429_s2 = scalar_lea.sflag [#allocation28], %s1428_s23  ;;  %s1431_s6 = scalar_lea.vmem [#allocation27], %s7179_s8 }
 0x368   : > { %p7717_p9 = scmp.ne.s32.totalorder %s7650_s22, 0 }
 0x36a   : > { %6149 = dma.done.wait (%p7717_p9), %s1429_s2, 1040  }
 0x36b   : > { %6151 = vsyncadd (%p7717_p9), %s1429_s2, 4294966256  ;;  %s4173_s3 = sshll.u32 %s7179_s8, 6  ;;  %s1446_s24 = scalar_lea.sflag [#allocation31], %s1428_s23 }
 0x36c   : > { %s7187_s0 = scalar_lea.vmem [#allocation29], %s4173_s3  ;;  %s1448_s14 = scalar_lea.vmem [#allocation30], %s7179_s8 }
 0x36d   : > { %6153 = dma.done.wait (%p7717_p9), %s1446_s24, 32  }
 0x36e   : > { %6155 = vsyncadd (%p7717_p9), %s1446_s24, 4294967264  ;;  %s1456_s28 = scalar_lea.vmem [#allocation32], %s7179_s8  ;;  %s1462_s21 = scalar_lea.sflag [#allocation34], %s1428_s23 }
 0x36f   : > { %6157 = dma.done.wait (%p7717_p9), %s1462_s21, 4112  }
 0x370   : > { %6159 = vsyncadd (%p7717_p9), %s1462_s21, 4294963184  ;;  %s4174_s11 = sshll.u32 %s7179_s8, 8  ;;  %s4175_s5 = sshll.u32 %s7179_s8, 2 }
 0x371   : > { %s7202_s26 = scalar_lea.vmem [#allocation35], %s4174_s11  ;;  %s1479_s12 = scalar_lea.sflag [#allocation37], %s1428_s23 }
 0x372   : > { %s7204_s25 = scalar_lea.vmem [#allocation36], %s4175_s5 }
 0x373   : > { %6161 = dma.done.wait (%p7717_p9), %s1479_s12, 4160  }
 0x374   : > { %6163 = vsyncadd (%p7717_p9), %s1479_s12, 4294963136  ;;  %s7210_s2 = scalar_lea.vmem [#allocation38], %s4174_s11  ;;  %s1497_s3 = scalar_lea.sflag [#allocation40], %s1428_s23 }
 0x375   : > { %6165 = dma.done.wait (%p7717_p9), %s1497_s3, 16  }
 0x376   : > { %6167 = vsyncadd (%p7717_p9), %s1497_s3, 4294967280  ;;  %p7718_p10 = pmov %p7713_p0 }
 0x377   : > { %p7719_p3 = pmov %p7713_p0 }
 0x378   : > { %6169 = dma.done.wait (%p7718_p10), [#allocation40], 16  }
 0x379   : > { %6171 = vsyncadd (%p7719_p3), [#allocation40], 4294967280  ;;  %p7720_p6 = pmov %p7713_p0 }
 0x37a   : > { %p7721_p5 = pmov %p7713_p0 }
 0x37b   : > { %6173 = dma.done.wait (%p7720_p6), [#allocation43], 32  }
 0x37c   : > { %6175 = vsyncadd (%p7721_p5), [#allocation43], 4294967264  ;;  %p7722_p7 = pmov %p7713_p0 }
 0x37d   : > { %p7723_p8 = pmov %p7713_p0 }
 0x37e   : > { %6177 = dma.done.wait (%p7722_p7), [#allocation46], 1024  }
 0x37f   : > { %6179 = vsyncadd (%p7723_p8), [#allocation46], 4294966272  ;;  %s7724_s22 = sld [smem:[#allocation104_spill]]  ;;  %s7725_s23 = sld [smem:[#allocation103_spill]] }
 0x380   : > { %s7726_s21 = sld [smem:[#allocation66_spill]]  ;;  %s7727_s11 = sld [smem:[#allocation81_spill]] }
 0x381   : > { %s7240_s13 = scalar_lea.vmem [#allocation47], %s4158_s19 }
 0x385   : > { %p1647_p12 = scmp.lt.s32.totalorder %s7724_s22, 1  ;;  %p1651_p11 = scmp.lt.s32.totalorder %s7725_s23, 1 }
 0x386   : > { %p4183_p13 = scmp.ne.s32.totalorder %s7725_s23, 0 }
 0x387   : > { %s7763_s22 = smov (!%p1647_p12, %s7724_s22), 1  ;;  %v6294_v1 = vmov (!%p4183_p13), 0   ;;  %v5048_v2 = vld [vmem:[#allocation9] sm:$0xff] (!%p4183_p13)   ;;  %v6295_v3 = vmov (!%p4183_p13), 0.0   ;;  %v5049_v4 = vld [vmem:[#allocation9 + $0x8] sm:$0xff] (!%p4183_p13)   ;;  %v5050_v5 = vld [vmem:[#allocation9 + $0x10] sm:$0xff] (!%p4183_p13)  }
 0x388   : > { %s7233_s5 = scalar_select %p1651_p11, %s7725_s23, 1 }
 0x389   : > { %s4182_s12 = sshll.u32 %s7763_s22, 3  ;;  %1658 = sbr.rel (%p4183_p13) target bundleno = 2169 (0x879), region = 272  ;;  %5047 = vset.pattern.permute.xlu0 (!%p4183_p13), %v6294_v1  ;;  %4483 = vmatprep.subr.bf16.mxu0 (!%p4183_p13), %v6295_v3  ;;  %v5051_v6 = vld [vmem:[#allocation9 + $0x18] sm:$0xff] (!%p4183_p13)   ;;  %vm6296_vm0 = vmmov (!%p4183_p13), 0   ;;  %v5052_v7 = vld [vmem:[#allocation9 + $0x20] sm:$0xff] (!%p4183_p13)   ;;  %v5053_v8 = vld [vmem:[#allocation9 + $0x28] sm:$0xff] (!%p4183_p13)  }
 0x38a   : > { %s1650_s3 = scalar_lea.vmem %s7726_s21, %s4182_s12  ;;  %s1653_s24 = scalar_lea.vmem %s7727_s11, %s7233_s5  ;;  %4503 = vmatprep.subr.bf16.mxu1 (!%p4183_p13), %v6295_v3  ;;  %4484 = vmatpush3.bf16.msra.mxu0 (!%p4183_p13), %v5048_v2  ;;  %v5054_v9 = vld [vmem:[#allocation9 + $0x30] sm:$0xff] (!%p4183_p13)   ;;  %v5055_v10 = vld [vmem:[#allocation9 + $0x38] sm:$0xff] (!%p4183_p13)   ;;  %v6297_v26 = vmov (!%p4183_p13), 683565275   ;;  %v6298_v28 = vmov (!%p4183_p13), 2475754826  }
 0x38b   : > { %v1659_v0 = vld [vmem:[%s1650_s3] sm:$0xff] (!%p4183_p13)  ;;  %4485 = vmatprep.subr.bf16.mxu0 (!%p4183_p13), %v6295_v3  ;;  %4499 = vmatprep.mubr.msk.bf16.mxu0 (!%p4183_p13), %vm6296_vm0, %v6295_v3  ;;  %v4184_v11 = vld [vmem:[#allocation6] ss:$0 sm:$0xff] (!%p4183_p13)  ;;  %v4185_v12 = vld [vmem:[#allocation8] ss:$0 sm:$0xff] (!%p4183_p13) }
 0x38c   : > { %1663 = vperm.xlu0 (!%p4183_p13), %5047, %v1659_v0   ;;  %4519 = vmatprep.mubr.msk.bf16.mxu1 (!%p4183_p13), %vm6296_vm0, %v6295_v3  ;;  %v6299_v31 = vmov (!%p4183_p13), 2131351028   ;;  %v6300_v34 = vmov (!%p4183_p13), 2102212464   ;;  %v6301_v37 = vmov (!%p4183_p13), 920167782  }
 0x38d   : > { %v6302_v40 = vmov (!%p4183_p13), 1326507024  }
 0x38e   : > { %4486 = vmatpush3.bf16.msra.mxu0 (!%p4183_p13), %v5049_v4 }
 0x38f   : > { %4487 = vmatprep.subr.bf16.mxu0 (!%p4183_p13), %v6295_v3 }
 0x392   : > { %4488 = vmatpush3.bf16.msra.mxu0 %v5050_v5 }
 0x393   : > { %4489 = vmatprep.subr.bf16.mxu0 %v6295_v3 }
 0x396   : > { %4490 = vmatpush3.bf16.msra.mxu0 %v5051_v6 }
 0x397   : > { %4491 = vmatprep.subr.bf16.mxu0 %v6295_v3 }
 0x39a   : > { %4492 = vmatpush3.bf16.msra.mxu0 %v5052_v7 }
 0x39b   : > { %4493 = vmatprep.subr.bf16.mxu0 %v6295_v3 }
 0x39e   : > { %4494 = vmatpush3.bf16.msra.mxu0 %v5053_v8 }
 0x39f   : > { %4495 = vmatprep.subr.bf16.mxu0 %v6295_v3 }
 0x3a2   : > { %4496 = vmatpush3.bf16.msra.mxu0 %v5054_v9 }
 0x3a3   : > { %4497 = vmatprep.subr.bf16.mxu0 %v6295_v3 }
 0x3a6   : > { %4498 = vmatpush3.bf16.msra.mxu0 %v5055_v10 }
 0x3a7   : > { %4523 = vmatprep.subr.bf16.mxu0 %v6295_v3 }
 0x40b   : > { %v1664_v13 = vpop.permute.xlu0 %1663 }
 0x40c   : > { %v1672_v14 = vmul.f32 %v4184_v11, %v1664_v13 }
 0x40e   : > { %v7257_v15 = vadd.f32 %v4185_v12, %v1672_v14 }
 0x410   : > { %v1684_v16 = vand.u32 2139095040, %v7257_v15  ;;  %v1681_v20 = vand.u32 2147483647, %v7257_v15  ;;  %vm1683_vm8 = vcmp.lt.s32.totalorder %v7257_v15, 0  ;;  %vm1773_vm13 = vweird.f32 %v7257_v15 }
 0x412   : > { %v1685_v17 = vshrl.u32 %v1684_v16, 23  ;;  %v1688_v23 = vand.u32 8388607, %v1681_v20  ;;  %vm1682_vm9 = vcmp.le.f32.partialorder %v1681_v20, 0.7853982 }
 0x414   : > { %v4186_v18 = vadd.s32 4294967169, %v1685_v17  ;;  %v1689_v42 = vor.u32 8388608, %v1688_v23 }
 0x416   : > { %v1691_v19 = vadd.s32 1, %v4186_v18  ;;  %v1729_v56 = vshll.u32 %v1689_v42, 8 }
 0x418   : > { %vm1692_vm1 = vcmp.gt.s32.totalorder %v1691_v19, 0 }
 0x419   : > { %v1693_v21 = vsel %vm1692_vm1, %v1691_v19, 0 }
 0x41a   : > { %v1695_v22 = vand.u32 31, %v1693_v21  ;;  %v1694_v25 = vshrl.u32 %v1693_v21, 5 }
 0x41c   : > { %v1696_v24 = vsub.s32 32, %v1695_v22  ;;  %v1698_v27 = vshll.u32 %v6297_v26, %v1695_v22  ;;  %v1701_v29 = vshll.u32 %v6298_v28, %v1695_v22  ;;  %v1704_v33 = vshll.u32 %v6299_v31, %v1695_v22 }
 0x41d   : > { %v1707_v36 = vshll.u32 %v6300_v34, %v1695_v22  ;;  %v1710_v39 = vshll.u32 %v6301_v37, %v1695_v22  ;;  %vm1713_vm2 = vcmp.lt.s32.totalorder %v1694_v25, 1  ;;  %vm1716_vm3 = vcmp.lt.s32.totalorder %v1694_v25, 4 }
 0x41e   : > { %v1699_v30 = vshrl.u32 %v6298_v28, %v1696_v24  ;;  %v1702_v32 = vshrl.u32 %v6299_v31, %v1696_v24  ;;  %v1705_v35 = vshrl.u32 %v6300_v34, %v1696_v24  ;;  %v1708_v38 = vshrl.u32 %v6301_v37, %v1696_v24 }
 0x41f   : > { %v1711_v41 = vshrl.u32 %v6302_v40, %v1696_v24  ;;  %v1697_v51 = vshrl.u32 %v6297_v26, %v1696_v24  ;;  %vm1715_vm4 = vcmp.lt.s32.totalorder %v1694_v25, 3  ;;  %vm1714_vm5 = vcmp.lt.s32.totalorder %v1694_v25, 2 }
 0x420   : > { %v1700_v43 = vor.u32 %v1699_v30, %v1698_v27  ;;  %v1703_v44 = vor.u32 %v1702_v32, %v1701_v29  ;;  %v1706_v45 = vor.u32 %v1705_v35, %v1704_v33  ;;  %v1709_v46 = vor.u32 %v1708_v38, %v1707_v36 }
 0x421   : > { %v1712_v47 = vor.u32 %v1711_v41, %v1710_v39 }
 0x422   : > { %v1718_v48 = vsel %vm1716_vm3, %v1706_v45, 2102212464  ;;  %v1721_v49 = vsel %vm1713_vm2, %v1700_v43, %v1703_v44  ;;  %v1725_v50 = vsel %vm1713_vm2, %v1703_v44, %v1706_v45  ;;  %v1722_v52 = vsel %vm1716_vm3, %v1709_v46, 920167782 }
 0x423   : > { %v1726_v53 = vsel %vm1716_vm3, %v1712_v47, 1326507024  ;;  %v1723_v54 = vsel %vm1715_vm4, %v1706_v45, %v1722_v52  ;;  %v1717_v57 = vsel %vm1713_vm2, %v1697_v51, %v1700_v43  ;;  %v1719_v58 = vsel %vm1715_vm4, %v1703_v44, %v1718_v48  ;;  %v5057_v47 = vld [vmem:[#allocation12 + $0x8] sm:$0xff]   ;;  %v5058_v48 = vld [vmem:[#allocation12 + $0x10] sm:$0xff]   ;;  %v5063_v52 = vld [vmem:[#allocation12 + $0x38] sm:$0xff]  }
 0x424   : > { %v1727_v55 = vsel %vm1715_vm4, %v1709_v46, %v1726_v53  ;;  %v1724_v59 = vsel %vm1714_vm5, %v1721_v49, %v1723_v54  ;;  %v1720_v1 = vsel %vm1714_vm5, %v1717_v57, %v1719_v58  ;;  %v5056_v46 = vld [vmem:[#allocation12] sm:$0xff]   ;;  %v5062_v51 = vld [vmem:[#allocation12 + $0x30] sm:$0xff]   ;;  %v4190_v53 = vld [vmem:[#allocation11] ss:$0 sm:$0xff] }
 0x425   : > { %v1728_v60 = vsel %vm1714_vm5, %v1725_v50, %v1727_v55  ;;  %v7266_v63 = vmul.u32.u64.low %v1729_v56, %v1724_v59  ;;  %v7267_v0 = vmul.u32.u64.high %v1729_v56, %v1724_v59, %v7266_v63  ;;  %v1736_v4 = vmul.u32 %v1729_v56, %v1720_v1  ;;  %4504 = vmatpush3.bf16.msra.mxu1 %v5056_v46  ;;  %v5060_v49 = vld [vmem:[#allocation12 + $0x20] sm:$0xff]   ;;  %v5061_v50 = vld [vmem:[#allocation12 + $0x28] sm:$0xff]  }
 0x426   : > { %v7263_v61 = vmul.u32.u64.low %v1729_v56, %v1728_v60  ;;  %v7264_v62 = vmul.u32.u64.high %v1729_v56, %v1728_v60, %v7263_v61  ;;  %4505 = vmatprep.subr.bf16.mxu1 %v6295_v3  ;;  %v5064_v1 = vld [vmem:[#allocation15] sm:$0xff]  }
 0x427   : > { %v1739_v2 = vadd.s32 1, %v7267_v0 }
 0x428   : > { %vm1738_vm6 = vc.u32 %v7264_v62, %v7266_v63  ;;  %v1737_v17 = vadd.s32 %v7266_v63, %v7264_v62 }
 0x429   : > { %v1740_v5 = vsel %vm1738_vm6, %v1739_v2, %v7267_v0  ;;  %4506 = vmatpush3.bf16.msra.mxu1 %v5057_v47  ;;  %v5065_v2 = vld [vmem:[#allocation15 + $0x8] sm:$0xff]  }
 0x42a   : > { %v1741_v6 = vadd.s32 %v1740_v5, %v1736_v4  ;;  %4507 = vmatprep.subr.bf16.mxu1 %v6295_v3  ;;  %v5066_v4 = vld [vmem:[#allocation15 + $0x10] sm:$0xff]   ;;  %v5067_v5 = vld [vmem:[#allocation15 + $0x18] sm:$0xff]  }
 0x42c   : > { %v1742_v7 = vadd.s32 536870912, %v1741_v6 }
 0x42d   : > { %4508 = vmatpush3.bf16.msra.mxu1 %v5058_v48 }
 0x42e   : > { %v1743_v8 = vshrl.u32 %v1742_v7, 30  ;;  %4509 = vmatprep.subr.bf16.mxu1 %v6295_v3  ;;  %v5069_v7 = vld [vmem:[#allocation15 + $0x28] sm:$0xff]  }
 0x430   : > { %v1744_v9 = vshll.u32 %v1743_v8, 30  ;;  %v1767_v30 = vsub.s32 4, %v1743_v8 }
 0x432   : > { %v1745_v10 = vsub.s32 %v1741_v6, %v1744_v9  ;;  %v1768_v33 = vsel %vm1683_vm8, %v1767_v30, %v1743_v8  ;;  %v5068_v6 = vld [vmem:[#allocation15 + $0x20] sm:$0xff]   ;;  %v5070_v8 = vld [vmem:[#allocation15 + $0x30] sm:$0xff]   ;;  %v5071_v9 = vld [vmem:[#allocation15 + $0x38] sm:$0xff]  }
 0x433   : > { %v1770_v35 = vsel %vm1682_vm9, 0, %v1768_v33  ;;  %v5078_v30 = vld [vmem:[#allocation21 + $0x30] sm:$0xff]  }
 0x434   : > { %v1747_v11 = vsub.s32 0, %v1745_v10  ;;  %v1774_v36 = vadd.s32 3, %v1770_v35  ;;  %v5081_v35 = vld [vmem:[#allocation18 + $0x8] sm:$0xff]  }
 0x436   : > { %v4187_v12 = vmin.u32 %v1747_v11, %v1745_v10  ;;  %v1775_v37 = vand.u32 3, %v1774_v36  ;;  %v5082_v36 = vld [vmem:[#allocation18 + $0x10] sm:$0xff]  }
 0x438   : > { %v1749_v13 = vclz %v4187_v12  ;;  %vm1780_vm10 = vcmp.eq.s32.totalorder %v1775_v37, 2  ;;  %vm1777_vm11 = vcmp.eq.s32.totalorder %v1775_v37, 0  ;;  %vm1776_vm12 = vcmp.lt.s32.totalorder %v1775_v37, 2  ;;  %v5083_v37 = vld [vmem:[#allocation18 + $0x18] sm:$0xff]  }
 0x43a   : > { %v4188_v14 = vadd.s32 4294967294, %v1749_v13 }
 0x43c   : > { %vm4189_vm7 = vcmp.lt.s32.totalorder %v4188_v14, 0 }
 0x43d   : > { %v1752_v16 = vsel %vm4189_vm7, 0, %v4188_v14 }
 0x43e   : > { %v1753_v18 = vsub.s32 32, %v1752_v16  ;;  %v1757_v19 = vsub.s32 4294967266, %v1752_v16  ;;  %v1754_v21 = vshll.u32 %v1745_v10, %v1752_v16  ;;  %v4200_v10 = vld [vmem:[#allocation14] ss:$0 sm:$0xff] }
 0x440   : > { %v1755_v22 = vshrl.u32 %v1737_v17, %v1753_v18  ;;  %v1758_v23 = vadd.s32 127, %v1757_v19 }
 0x442   : > { %v1756_v24 = vor.u32 %v1755_v22, %v1754_v21  ;;  %v1759_v25 = vshll.u32 %v1758_v23, 23  ;;  %v5072_v23 = vld [vmem:[#allocation21] sm:$0xff]  }
 0x444   : > { %v1760_v26 = vor.u32 4788187, %v1759_v25  ;;  %v1763_v28 = vcvt.s32.f32 %v1756_v24  ;;  %v5073_v25 = vld [vmem:[#allocation21 + $0x8] sm:$0xff]  }
 0x446   : > { %v1761_v27 = vand.u32 2147483647, %v1760_v26  ;;  %v5074_v26 = vld [vmem:[#allocation21 + $0x10] sm:$0xff]  }
 0x448   : > { %v1764_v29 = vmul.f32 %v1763_v28, %v1761_v27  ;;  %v5075_v27 = vld [vmem:[#allocation21 + $0x18] sm:$0xff]   ;;  %v5076_v28 = vld [vmem:[#allocation21 + $0x20] sm:$0xff]  }
 0x44a   : > { %v1765_v31 = vxor.u32 2147483648, %v1764_v29 }
 0x44c   : > { %v1766_v32 = vsel %vm1683_vm8, %v1765_v31, %v1764_v29  ;;  %v5077_v29 = vld [vmem:[#allocation21 + $0x28] sm:$0xff]   ;;  %v5079_v31 = vld [vmem:[#allocation21 + $0x38] sm:$0xff]  }
 0x44d   : > { %v1769_v34 = vsel %vm1682_vm9, %v7257_v15, %v1766_v32  ;;  %v5059_v15 = vld [vmem:[#allocation12 + $0x18] sm:$0xff]  }
 0x44e   : > { %5088 = vcosq.f32 %v1769_v34  ;;  %4510 = vmatpush3.bf16.msra.mxu1 %v5059_v15  ;;  %v2254_v32 = vld [vmem:[%s7143_s18] sm:$0xff] }
 0x44f   : > { %5090 = vsinq.f32 %v1769_v34  ;;  %4511 = vmatprep.subr.bf16.mxu1 %v6295_v3  ;;  %v2272_v33 = vpack.c.bf16 %v2254_v32, %v2254_v32  ;;  %v5080_v34 = vld [vmem:[#allocation18] sm:$0xff]  }
 0x452   : > { %4512 = vmatpush3.bf16.msra.mxu1 %v5060_v49 }
 0x453   : > { %4513 = vmatprep.subr.bf16.mxu1 %v6295_v3 }
 0x456   : > { %4514 = vmatpush3.bf16.msra.mxu1 %v5061_v50 }
 0x457   : > { %4515 = vmatprep.subr.bf16.mxu1 %v6295_v3 }
 0x458   : > { %v5089_v38 = vpop.eup %5088 }
 0x459   : > { %v5091_v39 = vpop.eup %5090  ;;  %v1781_v40 = vxor.u32 2147483648, %v5089_v38 }
 0x45a   : > { %v1778_v41 = vxor.u32 2147483648, %v5091_v39  ;;  %4516 = vmatpush3.bf16.msra.mxu1 %v5062_v51  ;;  %v4229_v51 = vld [vmem:[#allocation23] ss:$0 sm:$0xff] }
 0x45b   : > { %v1782_v42 = vsel %vm1780_vm10, %v1781_v40, %v5091_v39  ;;  %4517 = vmatprep.subr.bf16.mxu1 %v6295_v3  ;;  %v5085_v39 = vld [vmem:[#allocation18 + $0x28] sm:$0xff]   ;;  %v5086_v40 = vld [vmem:[#allocation18 + $0x30] sm:$0xff]  }
 0x45c   : > { %v1779_v43 = vsel %vm1777_vm11, %v5089_v38, %v1778_v41  ;;  %v5084_v38 = vld [vmem:[#allocation18 + $0x20] sm:$0xff]   ;;  %v5087_v41 = vld [vmem:[#allocation18 + $0x38] sm:$0xff]  }
 0x45d   : > { %v1783_v20 = vsel %vm1776_vm12, %v1779_v43, %v1782_v42  ;;  %v4210_v42 = vld [vmem:[#allocation17] ss:$0 sm:$0xff] }
 0x45e   : > { %v1784_v44 = vsel %vm1773_vm13, nan, %v1783_v20  ;;  %4518 = vmatpush3.bf16.msra.mxu1 %v5063_v52 }
 0x45f   : > { %v1802_v45 = vpack.c.bf16 %v1784_v44, %v1784_v44  ;;  %4543 = vmatprep.subr.bf16.mxu1 %v6295_v3 }
 0x461   : > { %4500 = vmatmul.mubr.bf16.vlgmr.msra.gmra.mrb[0].mxu0 %v1802_v45 }
 0x462   : > { %4539 = vmatprep.mubr.msk.bf16.mxu0 %vm6296_vm0, %v6295_v3  ;;  %4524 = vmatpush3.bf16.msra.mxu0 %v5064_v1 }
 0x463   : > { %4525 = vmatprep.subr.bf16.mxu0 %v6295_v3 }
 0x466   : > { %4526 = vmatpush3.bf16.msra.mxu0 %v5065_v2 }
 0x467   : > { %4527 = vmatprep.subr.bf16.mxu0 %v6295_v3 }
 0x46a   : > { %4528 = vmatpush3.bf16.msra.mxu0 %v5066_v4 }
 0x46b   : > { %4529 = vmatprep.subr.bf16.mxu0 %v6295_v3 }
 0x46e   : > { %4530 = vmatpush3.bf16.msra.mxu0 %v5067_v5 }
 0x46f   : > { %4531 = vmatprep.subr.bf16.mxu0 %v6295_v3 }
 0x472   : > { %4532 = vmatpush3.bf16.msra.mxu0 %v5068_v6  ;;  %v4238_v6 = vld [vmem:[#allocation24] ss:$0 sm:$0xff] }
 0x473   : > { %4533 = vmatprep.subr.bf16.mxu0 %v6295_v3 }
 0x476   : > { %4534 = vmatpush3.bf16.msra.mxu0 %v5069_v7 }
 0x477   : > { %4535 = vmatprep.subr.bf16.mxu0 %v6295_v3 }
 0x47a   : > { %4536 = vmatpush3.bf16.msra.mxu0 %v5070_v8  ;;  %v4220_v8 = vld [vmem:[#allocation20] ss:$0 sm:$0xff] }
 0x47b   : > { %4537 = vmatprep.subr.bf16.mxu0 %v6295_v3 }
 0x47e   : > { %4538 = vmatpush3.bf16.msra.mxu0 %v5071_v9  ;;  %v4239_v9 = vld [vmem:[#allocation26] ss:$0 sm:$0xff] }
 0x47f   : > { %4563 = vmatprep.subr.bf16.mxu0 %v6295_v3 }
 0x534   : > { %v1891_v54 = vpop.f32.mrb[0].mxu0 }
 0x535   : > { %v1892_v55 = vadd.f32 %v4190_v53, %v1891_v54  ;;  %v4501_v56 = vpop.f32.mrb[1].mxu0 }
 0x536   : > { %v1894_v57 = vpop.f32.mrb[2].mxu0 }
 0x537   : > { %v4199_v58 = vmul.f32 -1.442695, %v1892_v55  ;;  %v4502_v59 = vpop.f32.mrb[3].mxu0 }
 0x539   : > { %5092 = vpow2.f32 %v4199_v58 }
 0x543   : > { %v5093_v60 = vpop.eup %5092 }
 0x544   : > { %v1900_v61 = vadd.f32 1.0, %v5093_v60 }
 0x546   : > { %5094 = vrcp.f32 %v1900_v61 }
 0x550   : > { %v5095_v62 = vpop.eup %5094 }
 0x551   : > { %v1903_v63 = vmul.f32 %v5095_v62, %v1892_v55 }
 0x553   : > { %v1921_v0 = vpack.c.bf16 %v1903_v63, %v1903_v63 }
 0x555   : > { %4520 = vmatmul.mubr.bf16.vlgmr.msra.gmra.mrb[0].mxu1 %v1921_v0 }
 0x556   : > { %4559 = vmatprep.mubr.msk.bf16.mxu1 %vm6296_vm0, %v6295_v3  ;;  %4544 = vmatpush3.bf16.msra.mxu1 %v5080_v34 }
 0x557   : > { %4545 = vmatprep.subr.bf16.mxu1 %v6295_v3 }
 0x55a   : > { %4546 = vmatpush3.bf16.msra.mxu1 %v5081_v35 }
 0x55b   : > { %4547 = vmatprep.subr.bf16.mxu1 %v6295_v3 }
 0x55e   : > { %4548 = vmatpush3.bf16.msra.mxu1 %v5082_v36 }
 0x55f   : > { %4549 = vmatprep.subr.bf16.mxu1 %v6295_v3 }
 0x562   : > { %4550 = vmatpush3.bf16.msra.mxu1 %v5083_v37 }
 0x563   : > { %4551 = vmatprep.subr.bf16.mxu1 %v6295_v3 }
 0x566   : > { %4552 = vmatpush3.bf16.msra.mxu1 %v5084_v38 }
 0x567   : > { %4553 = vmatprep.subr.bf16.mxu1 %v6295_v3 }
 0x56a   : > { %4554 = vmatpush3.bf16.msra.mxu1 %v5085_v39 }
 0x56b   : > { %4555 = vmatprep.subr.bf16.mxu1 %v6295_v3 }
 0x56e   : > { %4556 = vmatpush3.bf16.msra.mxu1 %v5086_v40 }
 0x56f   : > { %4557 = vmatprep.subr.bf16.mxu1 %v6295_v3 }
 0x572   : > { %4558 = vmatpush3.bf16.msra.mxu1 %v5087_v41 }
 0x628   : > { %v2010_v11 = vpop.f32.mrb[0].mxu1 }
 0x629   : > { %v2011_v12 = vadd.f32 %v4200_v10, %v2010_v11  ;;  %v4521_v13 = vpop.f32.mrb[1].mxu1 }
 0x62a   : > { %v2013_v14 = vpop.f32.mrb[2].mxu1 }
 0x62b   : > { %v4209_v16 = vmul.f32 -1.442695, %v2011_v12  ;;  %v4522_v17 = vpop.f32.mrb[3].mxu1 }
 0x62d   : > { %5096 = vpow2.f32 %v4209_v16 }
 0x637   : > { %v5097_v18 = vpop.eup %5096 }
 0x638   : > { %v2019_v19 = vadd.f32 1.0, %v5097_v18 }
 0x63a   : > { %5098 = vrcp.f32 %v2019_v19 }
 0x644   : > { %v5099_v21 = vpop.eup %5098 }
 0x645   : > { %v2022_v22 = vmul.f32 %v5099_v21, %v2011_v12 }
 0x647   : > { %v2040_v24 = vpack.c.bf16 %v2022_v22, %v2022_v22 }
 0x649   : > { %4540 = vmatmul.mubr.bf16.vlgmr.msra.gmra.mrb[4].mxu0 %v2040_v24 }
 0x64a   : > { %4564 = vmatpush3.bf16.msra.mxu0 %v5072_v23  ;;  %4579 = vmatprep.mubr.msk.bf16.mxu0 %vm6296_vm0, %v6295_v3 }
 0x64b   : > { %4565 = vmatprep.subr.bf16.mxu0 %v6295_v3 }
 0x64e   : > { %4566 = vmatpush3.bf16.msra.mxu0 %v5073_v25 }
 0x64f   : > { %4567 = vmatprep.subr.bf16.mxu0 %v6295_v3 }
 0x652   : > { %4568 = vmatpush3.bf16.msra.mxu0 %v5074_v26 }
 0x653   : > { %4569 = vmatprep.subr.bf16.mxu0 %v6295_v3 }
 0x656   : > { %4570 = vmatpush3.bf16.msra.mxu0 %v5075_v27 }
 0x657   : > { %4571 = vmatprep.subr.bf16.mxu0 %v6295_v3 }
 0x65a   : > { %4572 = vmatpush3.bf16.msra.mxu0 %v5076_v28 }
 0x65b   : > { %4573 = vmatprep.subr.bf16.mxu0 %v6295_v3 }
 0x65e   : > { %4574 = vmatpush3.bf16.msra.mxu0 %v5077_v29 }
 0x65f   : > { %4575 = vmatprep.subr.bf16.mxu0 %v6295_v3 }
 0x662   : > { %4576 = vmatpush3.bf16.msra.mxu0 %v5078_v30 }
 0x663   : > { %4577 = vmatprep.subr.bf16.mxu0 %v6295_v3 }
 0x666   : > { %4578 = vmatpush3.bf16.msra.mxu0 %v5079_v31 }
 0x669   : > { %4580 = vmatmul.mubr.bf16.vlgmr.msra.gmra.mrb[8].mxu0 %v2272_v33 }
 0x71c   : > { %v2129_v43 = vpop.f32.mrb[4].mxu0 }
 0x71d   : > { %v2130_v20 = vadd.f32 %v4210_v42, %v2129_v43  ;;  %v4541_v44 = vpop.f32.mrb[5].mxu0 }
 0x71e   : > { %v2132_v45 = vpop.f32.mrb[6].mxu0 }
 0x71f   : > { %v4219_v46 = vmul.f32 -1.442695, %v2130_v20  ;;  %v4542_v47 = vpop.f32.mrb[7].mxu0 }
 0x721   : > { %5100 = vpow2.f32 %v4219_v46 }
 0x72b   : > { %v5101_v48 = vpop.eup %5100 }
 0x72c   : > { %v2138_v15 = vadd.f32 1.0, %v5101_v48 }
 0x72e   : > { %5102 = vrcp.f32 %v2138_v15 }
 0x738   : > { %v5103_v49 = vpop.eup %5102 }
 0x739   : > { %v2141_v50 = vmul.f32 %v5103_v49, %v2130_v20 }
 0x73b   : > { %v2159_v52 = vpack.c.bf16 %v2141_v50, %v2141_v50 }
 0x73c   : > { %v2361_v53 = vpop.f32.mrb[8].mxu0 }
 0x73d   : > { %v2362_v54 = vadd.f32 %v4229_v51, %v2361_v53  ;;  %v4581_v3 = vpop.f32.mrb[9].mxu0  ;;  %4560 = vmatmul.mubr.bf16.vlgmr.msra.gmra.mrb[4].mxu1 %v2159_v52 }
 0x73e   : > { %v2364_v55 = vpop.f32.mrb[10].mxu0 }
 0x73f   : > { %2369 = vadd.xlane.f32.xlu0 %v2362_v54  ;;  %v4582_v56 = vpop.f32.mrb[11].mxu0 }
 0x7cc   : > { %v2370_v57 = vpop.xlane.xlu0 %2369 }
 0x7cd   : > { %v2372_v58 = vmul.f32 0.0078125, %v2370_v57 }
 0x7cf   : > { %v2373_v59 = vsub.f32 %v2362_v54, %v2372_v58 }
 0x7d1   : > { %v2374_v60 = vmul.f32 %v2373_v59, %v2373_v59 }
 0x7d3   : > { %2375 = vadd.xlane.f32.xlu1 %v2374_v60 }
 0x810   : > { %v2248_v61 = vpop.f32.mrb[4].mxu1 }
 0x811   : > { %v4561_v62 = vpop.f32.mrb[5].mxu1  ;;  %v2249_v11 = vadd.f32 %v4220_v8, %v2248_v61 }
 0x812   : > { %v2251_v63 = vpop.f32.mrb[6].mxu1 }
 0x813   : > { %v4562_v0 = vpop.f32.mrb[7].mxu1 }
 0x860   : > { %v2376_v1 = vpop.xlane.xlu1 %2375 }
 0x861   : > { %v2377_v2 = vmul.f32 0.0078125, %v2376_v1 }
 0x863   : > { %v2378_v4 = vadd.f32 1e-05, %v2377_v2 }
 0x865   : > { %5104 = vrsqrt.f32 %v2378_v4 }
 0x86f   : > { %v5105_v5 = vpop.eup %5104 }
 0x870   : > { %v2380_v7 = vmul.f32 %v5105_v5, %v2373_v59 }
 0x872   : > { %v2387_v10 = vmul.f32 %v4238_v6, %v2380_v7 }
 0x874   : > { %v2394_v12 = vadd.f32 %v4239_v9, %v2387_v10 }
 0x876   : > { %v2395_v13 = vadd.f32 %v2394_v12, %v2249_v11 }
 0x878   : > { %2396 = vst [vmem:[#allocation2] sm:$0xff] %v2395_v13 }
 0x879 PF: > { %v5106_v16 = vld [vmem:[%s7187_s0] sm:$0xff]   ;;  %v5107_v17 = vld [vmem:[%s7187_s0 + $0x8] sm:$0xff]   ;;  %v6303_v18 = vmov 0.0   ;;  %v5108_v24 = vld [vmem:[%s7187_s0 + $0x10] sm:$0xff]   ;;  %vm6304_vm14 = vmmov 0   ;;  %v6305_v11 = vmov 0  }
 0x87a   : > { %4583 = vmatprep.subr.bf16.mxu0 %v6303_v18  ;;  %v5109_v25 = vld [vmem:[%s7187_s0 + $0x18] sm:$0xff]   ;;  %v5110_v26 = vld [vmem:[%s7187_s0 + $0x20] sm:$0xff]   ;;  %4599 = vmatprep.mubr.msk.bf16.mxu0 %vm6304_vm14, %v6303_v18  ;;  %v5111_v27 = vld [vmem:[%s7187_s0 + $0x28] sm:$0xff]   ;;  %s7729_s19 = scalar_lea.vmem [#allocation33], %s7179_s8  ;;  %s7730_s18 = scalar_lea.vmem [#allocation39], %s7179_s8 }
 0x87b   : > { %4584 = vmatpush3.bf16.msra.mxu0 %v5106_v16  ;;  %v5112_v28 = vld [vmem:[%s7187_s0 + $0x30] sm:$0xff]   ;;  %v5113_v29 = vld [vmem:[%s7187_s0 + $0x38] sm:$0xff]   ;;  %2813 = vmatprep.mubr.bf16.mxu1 %v6305_v11 }
 0x87c   : > { %4585 = vmatprep.subr.bf16.mxu0 %v6303_v18  ;;  %v4240_v34 = vld [vmem:[%s1653_s24] ss:$0 sm:$0xff]  ;;  %v5114_v46 = vld [vmem:[%s7202_s26 + $0x4] ss:$16 sps:$4 sm:$0xff]   ;;  %v5116_v47 = vld [vmem:[%s7202_s26 + $0x8] ss:$16 sps:$4 sm:$0xff]  }
 0x87d   : > { %v4241_v36 = vld [vmem:[%s1431_s6] ss:$0 sm:$0xff]  ;;  %v5119_v15 = vld [vmem:[%s7202_s26] ss:$16 sps:$4 sm:$0xff]   ;;  %v5120_v49 = vld [vmem:[%s7202_s26 + $0x24] ss:$16 sps:$4 sm:$0xff]   ;;  %2781 = vmatprep.subr.bf16.mxu1 %v5114_v46 }
 0x87e   : > { %v4242_v40 = vld [vmem:[%s1448_s14] ss:$0 sm:$0xff]  ;;  %2782 = vmatpush1.bf16.msra.mxu1 %v5119_v15  ;;  %v5122_v51 = vld [vmem:[%s7202_s26 + $0x28] ss:$16 sps:$4 sm:$0xff]   ;;  %v5125_v52 = vld [vmem:[%s7202_s26 + $0x20] ss:$16 sps:$4 sm:$0xff]  }
 0x87f   : > { %v2397_v14 = vld [vmem:[#allocation2] sm:$0xff]  ;;  %4586 = vmatpush3.bf16.msra.mxu0 %v5107_v17  ;;  %2783 = vmatprep.subr.bf16.mxu1 %v5120_v49  ;;  %v5128_v3 = vld [vmem:[%s7202_s26 + $0x48] ss:$16 sps:$4 sm:$0xff]   ;;  %s7731_s6 = sld [smem:[#allocation103_spill]] }
 0x880   : > { %2400 = vadd.xlane.f32.xlu0 %v2397_v14  ;;  %4587 = vmatprep.subr.bf16.mxu0 %v6303_v18  ;;  %v5118_v48 = vld [vmem:[%s7202_s26 + $0xc] ss:$16 sps:$4 sm:$0xff]   ;;  %v5126_v53 = vld [vmem:[%s7202_s26 + $0x44] ss:$16 sps:$4 sm:$0xff]   ;;  %v5131_v59 = vld [vmem:[%s7202_s26 + $0x40] ss:$16 sps:$4 sm:$0xff]  }
 0x881   : > { %v5124_v50 = vld [vmem:[%s7202_s26 + $0x2c] ss:$16 sps:$4 sm:$0xff]   ;;  %v5132_v60 = vld [vmem:[%s7202_s26 + $0x64] ss:$16 sps:$4 sm:$0xff]   ;;  %v5134_v62 = vld [vmem:[%s7202_s26 + $0x68] ss:$16 sps:$4 sm:$0xff]  }
 0x882   : > { %v5130_v54 = vld [vmem:[%s7202_s26 + $0x4c] ss:$16 sps:$4 sm:$0xff]   ;;  %2784 = vmatpush1.bf16.msra.mxu1 %v5125_v52  ;;  %v5137_v63 = vld [vmem:[%s7202_s26 + $0x60] ss:$16 sps:$4 sm:$0xff]   ;;  %v5138_v0 = vld [vmem:[%s7202_s26 + $0x84] ss:$16 sps:$4 sm:$0xff]  }
 0x883   : > { %4588 = vmatpush3.bf16.msra.mxu0 %v5108_v24  ;;  %2785 = vmatprep.subr.bf16.mxu1 %v5126_v53  ;;  %v5136_v61 = vld [vmem:[%s7202_s26 + $0x6c] ss:$16 sps:$4 sm:$0xff]   ;;  %v5140_v1 = vld [vmem:[%s7202_s26 + $0x88] ss:$16 sps:$4 sm:$0xff]   ;;  %v5143_v4 = vld [vmem:[%s7202_s26 + $0x80] ss:$16 sps:$4 sm:$0xff]  }
 0x884   : > { %4589 = vmatprep.subr.bf16.mxu0 %v6303_v18  ;;  %v5142_v2 = vld [vmem:[%s7202_s26 + $0x8c] ss:$16 sps:$4 sm:$0xff]   ;;  %v5144_v5 = vld [vmem:[%s7202_s26 + $0xa4] ss:$16 sps:$4 sm:$0xff]   ;;  %v5146_v7 = vld [vmem:[%s7202_s26 + $0xa8] ss:$16 sps:$4 sm:$0xff]  }
 0x885   : > { %v5148_v6 = vld [vmem:[%s7202_s26 + $0xac] ss:$16 sps:$4 sm:$0xff]   ;;  %v5149_v8 = vld [vmem:[%s7202_s26 + $0xa0] ss:$16 sps:$4 sm:$0xff]   ;;  %v5150_v9 = vld [vmem:[%s7202_s26 + $0xc4] ss:$16 sps:$4 sm:$0xff]  }
 0x886   : > { %2786 = vmatpush1.bf16.msra.mxu1 %v5131_v59  ;;  %v5154_v10 = vld [vmem:[%s7202_s26 + $0xcc] ss:$16 sps:$4 sm:$0xff]   ;;  %v5152_v12 = vld [vmem:[%s7202_s26 + $0xc8] ss:$16 sps:$4 sm:$0xff]   ;;  %v5155_v13 = vld [vmem:[%s7202_s26 + $0xc0] ss:$16 sps:$4 sm:$0xff]  }
 0x887   : > { %4590 = vmatpush3.bf16.msra.mxu0 %v5109_v25  ;;  %2787 = vmatprep.subr.bf16.mxu1 %v5132_v60  ;;  %v5160_v16 = vld [vmem:[%s7202_s26 + $0xec] ss:$16 sps:$4 sm:$0xff]   ;;  %v5158_v17 = vld [vmem:[%s7202_s26 + $0xe8] ss:$16 sps:$4 sm:$0xff]   ;;  %v5182_v49 = vld [vmem:[%s7210_s2 + $0x68] sm:$0xff]   ;;  %v2601_v60 = vlaneseq  ;;  %p4318_p0 = scmp.ne.s32.totalorder %s7731_s6, 1 }
 0x888   : > { %4591 = vmatprep.subr.bf16.mxu0 %v6303_v18  ;;  %v5178_v46 = vld [vmem:[%s7210_s2 + $0x60] sm:$0xff]   ;;  %v5185_v52 = vld [vmem:[%s7210_s2 + $0xa8] sm:$0xff]   ;;  %v5186_v53 = vld [vmem:[%s7210_s2 + $0x70] sm:$0xff]   ;;  %s7732_s0 = sld [smem:[#allocation93_spill]] (!%p4318_p0)  ;;  %vm6307_vm15 = vmmov (!%p4318_p0), 0   ;;  %s7734_s8 = sld [smem:[#allocation95_spill]] (!%p4318_p0) }
 0x889   : > { %v5181_v15 = vld [vmem:[%s7210_s2 + $0xa0] sm:$0xff]   ;;  %v5193_v59 = vld [vmem:[%s7210_s2 + $0xb8] sm:$0xff]  }
 0x88a   : > { %2788 = vmatpush1.bf16.msra.mxu1 %v5137_v63 }
 0x88b   : > { %4592 = vmatpush3.bf16.msra.mxu0 %v5110_v26  ;;  %2789 = vmatprep.subr.bf16.mxu1 %v5138_v0  ;;  %v4251_v26 = vld [vmem:[%s1456_s28] ss:$0 sm:$0xff]  ;;  %v2598_v0 = vld [vmem:[%s7204_s25] sm:$0xf]  ;;  %s7735_s28 = sld [smem:[#allocation96_spill]] (!%p4318_p0) }
 0x88c   : > { %4593 = vmatprep.subr.bf16.mxu0 %v6303_v18 }
 0x88e   : > { %2790 = vmatpush1.bf16.msra.mxu1 %v5143_v4  ;;  %s7733_s14 = smov (!%p4318_p0), %s7732_s0 }
 0x88f   : > { %4594 = vmatpush3.bf16.msra.mxu0 %v5111_v27  ;;  %2791 = vmatprep.subr.bf16.mxu1 %v5144_v5 }
 0x890   : > { %4595 = vmatprep.subr.bf16.mxu0 %v6303_v18 }
 0x892   : > { %2792 = vmatpush1.bf16.msra.mxu1 %v5149_v8 }
 0x893   : > { %4596 = vmatpush3.bf16.msra.mxu0 %v5112_v28  ;;  %2793 = vmatprep.subr.bf16.mxu1 %v5150_v9  ;;  %v4252_v28 = vld [vmem:[%s7729_s19] ss:$0 sm:$0xff] }
 0x894   : > { %4597 = vmatprep.subr.bf16.mxu0 %v6303_v18  ;;  %v5161_v18 = vld [vmem:[%s7202_s26 + $0xe0] ss:$16 sps:$4 sm:$0xff]  }
 0x896   : > { %2794 = vmatpush1.bf16.msra.mxu1 %v5155_v13 }
 0x897   : > { %4598 = vmatpush3.bf16.msra.mxu0 %v5113_v29 }
 0x898   : > { %2822 = vmatprep.subr.bf16.mxu0 %v5118_v48  ;;  %v5180_v48 = vld [vmem:[%s7210_s2 + $0x20] sm:$0xff]  }
 0x90d   : > { %v2401_v19 = vpop.xlane.xlu0 %2400 }
 0x90e   : > { %v2403_v21 = vmul.f32 0.0078125, %v2401_v19  ;;  %v5162_v19 = vld [vmem:[%s7210_s2 + $0x40] sm:$0xff]  }
 0x910   : > { %v2404_v22 = vsub.f32 %v2397_v14, %v2403_v21  ;;  %v5163_v21 = vld [vmem:[%s7210_s2 + $0xc0] sm:$0xff]  }
 0x912   : > { %v2405_v23 = vmul.f32 %v2404_v22, %v2404_v22 }
 0x914   : > { %2406 = vadd.xlane.f32.xlu0 %v2405_v23 }
 0x9a1   : > { %v2407_v30 = vpop.xlane.xlu0 %2406 }
 0x9a2   : > { %v2408_v31 = vmul.f32 0.0078125, %v2407_v30 }
 0x9a4   : > { %v2409_v32 = vadd.f32 1e-05, %v2408_v31  ;;  %v5164_v31 = vld [vmem:[%s7210_s2] sm:$0xff]  }
 0x9a6   : > { %5194 = vrsqrt.f32 %v2409_v32  ;;  %v5165_v32 = vld [vmem:[%s7210_s2 + $0x80] sm:$0xff]  }
 0x9b0   : > { %v5195_v33 = vpop.eup %5194 }
 0x9b1   : > { %v2411_v35 = vmul.f32 %v5195_v33, %v2404_v22 }
 0x9b3   : > { %v2418_v37 = vmul.f32 %v4240_v34, %v2411_v35  ;;  %v5166_v34 = vld [vmem:[%s7210_s2 + $0x48] sm:$0xff]  }
 0x9b4   : > { %v5167_v35 = vld [vmem:[%s7210_s2 + $0xc8] sm:$0xff]  }
 0x9b5   : > { %v2425_v38 = vadd.f32 %v4241_v36, %v2418_v37  ;;  %v5168_v36 = vld [vmem:[%s7210_s2 + $0x8] sm:$0xff]  }
 0x9b6   : > { %v5169_v37 = vld [vmem:[%s7210_s2 + $0x88] sm:$0xff]  }
 0x9b7   : > { %v2443_v39 = vpack.c.bf16 %v2425_v38, %v2425_v38  ;;  %v5170_v38 = vld [vmem:[%s7210_s2 + $0x50] sm:$0xff]  }
 0x9b9   : > { %4600 = vmatmul.mubr.bf16.vlgmr.msra.gmra.mrb[0].mxu0 %v2443_v39  ;;  %v5171_v39 = vld [vmem:[%s7210_s2 + $0xd0] sm:$0xff]  }
 0x9ba   : > { %2823 = vmatpush1.bf16.msra.mxu0 %v5116_v47  ;;  %2854 = vmatprep.mubr.bf16.mxu0 %v6305_v11  ;;  %v5179_v47 = vld [vmem:[%s7210_s2 + $0xe0] sm:$0xff]  }
 0x9bb   : > { %2824 = vmatprep.subr.bf16.mxu0 %v5124_v50  ;;  %v5183_v50 = vld [vmem:[%s7210_s2 + $0xe8] sm:$0xff]  }
 0x9be   : > { %2825 = vmatpush1.bf16.msra.mxu0 %v5122_v51  ;;  %v5184_v51 = vld [vmem:[%s7210_s2 + $0x28] sm:$0xff]  }
 0x9bf   : > { %2826 = vmatprep.subr.bf16.mxu0 %v5130_v54  ;;  %v5187_v54 = vld [vmem:[%s7210_s2 + $0xf0] sm:$0xff]  }
 0x9c2   : > { %2827 = vmatpush1.bf16.msra.mxu0 %v5128_v3  ;;  %v5188_v3 = vld [vmem:[%s7210_s2 + $0x30] sm:$0xff]  }
 0x9c3   : > { %2828 = vmatprep.subr.bf16.mxu0 %v5136_v61  ;;  %v2602_v61 = vshrl.u32 %v2601_v60, 7  ;;  %v6306_v60 = vmov (!%p4318_p0), 0.0  }
 0x9c5   : > { %v2611_v63 = vsub.s32 2, %v2602_v61 }
 0x9c6   : > { %2829 = vmatpush1.bf16.msra.mxu0 %v5134_v62  ;;  %v2603_v62 = vsub.s32 0, %v2602_v61 }
 0x9c7   : > { %2830 = vmatprep.subr.bf16.mxu0 %v5142_v2  ;;  %v2615_v2 = vsub.s32 3, %v2602_v61  ;;  %v2612_v5 = vrot.slane %v2598_v0, %v2611_v63 }
 0x9c8   : > { %v2604_v4 = vrot.slane %v2598_v0, %v2603_v62 }
 0x9ca   : > { %2831 = vmatpush1.bf16.msra.mxu0 %v5140_v1  ;;  %v2607_v1 = vsub.s32 1, %v2602_v61  ;;  %v5207_v61 = vld [vmem:[%s7733_s14 + $0x8] sm:$0xff] (!%p4318_p0)  }
 0x9cb   : > { %2832 = vmatprep.subr.bf16.mxu0 %v5148_v6 }
 0x9cc   : > { %v2608_v6 = vrot.slane %v2598_v0, %v2607_v1  ;;  %v5208_v1 = vld [vmem:[%s7733_s14 + $0x10] sm:$0xff] (!%p4318_p0)  }
 0x9ce   : > { %2833 = vmatpush1.bf16.msra.mxu0 %v5146_v7  ;;  %v2616_v7 = vrot.slane %v2598_v0, %v2615_v2  ;;  %v5209_v2 = vld [vmem:[%s7733_s14 + $0x18] sm:$0xff] (!%p4318_p0)  }
 0x9cf   : > { %2834 = vmatprep.subr.bf16.mxu0 %v5154_v10 }
 0x9d2   : > { %2835 = vmatpush1.bf16.msra.mxu0 %v5152_v12 }
 0x9d3   : > { %2836 = vmatprep.subr.bf16.mxu0 %v5160_v16 }
 0x9d6   : > { %2837 = vmatpush1.bf16.msra.mxu0 %v5158_v17 }
 0x9d7   : > { %4434 = vmatprep.subr.bf16.mxu0 %v5163_v21 }
 0xa8c   : > { %v2532_v41 = vpop.f32.mrb[0].mxu0 }
 0xa8d   : > { %v2533_v42 = vadd.f32 %v4242_v40, %v2532_v41  ;;  %v4601_v43 = vpop.f32.mrb[1].mxu0  ;;  %v5172_v40 = vld [vmem:[%s7210_s2 + $0x10] sm:$0xff]  }
 0xa8e   : > { %v2535_v20 = vpop.f32.mrb[2].mxu0  ;;  %v5173_v41 = vld [vmem:[%s7210_s2 + $0x90] sm:$0xff]   ;;  %v5175_v43 = vld [vmem:[%s7210_s2 + $0xd8] sm:$0xff]  }
 0xa8f   : > { %v7330_v44 = vadd.f32 %v2533_v42, %v2397_v14  ;;  %v4602_v45 = vpop.f32.mrb[3].mxu0  ;;  %v5156_v14 = vld [vmem:[%s7202_s26 + $0xe4] ss:$16 sps:$4 sm:$0xff]   ;;  %s7736_s26 = sld [smem:[#allocation98_spill]] (!%p4318_p0) }
 0xa90   : > { %2795 = vmatprep.subr.bf16.mxu1 %v5156_v14  ;;  %v5174_v42 = vld [vmem:[%s7210_s2 + $0x58] sm:$0xff]  }
 0xa91   : > { %2541 = vadd.xlane.f32.xlu1 %v7330_v44  ;;  %2796 = vmatpush1.bf16.msra.mxu1 %v5161_v18  ;;  %v5176_v20 = vld [vmem:[%s7210_s2 + $0x18] sm:$0xff]  }
 0xa92   : > { %4412 = vmatprep.subr.bf16.mxu1 %v5162_v19  ;;  %v5177_v45 = vld [vmem:[%s7210_s2 + $0x98] sm:$0xff]  }
 0xb1e   : > { %v2542_v55 = vpop.xlane.xlu1 %2541 }
 0xb1f   : > { %v2543_v56 = vmul.f32 0.0078125, %v2542_v55  ;;  %v5189_v55 = vld [vmem:[%s7210_s2 + $0xb0] sm:$0xff]  }
 0xb21   : > { %v2544_v57 = vsub.f32 %v7330_v44, %v2543_v56  ;;  %v5190_v56 = vld [vmem:[%s7210_s2 + $0x78] sm:$0xff]  }
 0xb23   : > { %v2545_v58 = vmul.f32 %v2544_v57, %v2544_v57 }
 0xb25   : > { %2546 = vadd.xlane.f32.xlu1 %v2545_v58  ;;  %v5192_v58 = vld [vmem:[%s7210_s2 + $0x38] sm:$0xff]  }
 0xbb2   : > { %v2547_v22 = vpop.xlane.xlu1 %2546 }
 0xbb3   : > { %v2548_v23 = vmul.f32 0.0078125, %v2547_v22 }
 0xbb5   : > { %v2549_v24 = vadd.f32 1e-05, %v2548_v23 }
 0xbb7   : > { %5196 = vrsqrt.f32 %v2549_v24 }
 0xbc1   : > { %v5197_v25 = vpop.eup %5196 }
 0xbc2   : > { %v2551_v27 = vmul.f32 %v5197_v25, %v2544_v57  ;;  %v5191_v57 = vld [vmem:[%s7210_s2 + $0xf8] sm:$0xff]  }
 0xbc4   : > { %v2558_v29 = vmul.f32 %v4251_v26, %v2551_v27 }
 0xbc6   : > { %v2565_v30 = vadd.f32 %v4252_v28, %v2558_v29 }
 0xbc8   : > { %v2599_v33 = vpack.c.bf16 %v2565_v30, %v2565_v30 }
 0xbca   : > { %2814 = vmatmul.mubr.bf16.vlgmr.msra.gmra.mrb[0].mxu1 %v2599_v33  ;;  %2855 = vmatmul.mubr.bf16.vlgmr.msra.gmra.mrb[4].mxu0 %v2599_v33 }
 0xbcb   : > { %4413 = vmatpush3.bf16.msra.mxu1 %v5164_v31  ;;  %4435 = vmatpush3.bf16.msra.mxu0 %v5165_v32 }
 0xbcc   : > { %4414 = vmatprep.subr.bf16.mxu1 %v5166_v34  ;;  %4436 = vmatprep.subr.bf16.mxu0 %v5167_v35 }
 0xbcf   : > { %4415 = vmatpush3.bf16.msra.mxu1 %v5168_v36  ;;  %4437 = vmatpush3.bf16.msra.mxu0 %v5169_v37 }
 0xbd0   : > { %4416 = vmatprep.subr.bf16.mxu1 %v5170_v38  ;;  %4438 = vmatprep.subr.bf16.mxu0 %v5171_v39 }
 0xbd3   : > { %4417 = vmatpush3.bf16.msra.mxu1 %v5172_v40  ;;  %4439 = vmatpush3.bf16.msra.mxu0 %v5173_v41 }
 0xbd4   : > { %4418 = vmatprep.subr.bf16.mxu1 %v5174_v42  ;;  %4440 = vmatprep.subr.bf16.mxu0 %v5175_v43 }
 0xbd7   : > { %4419 = vmatpush3.bf16.msra.mxu1 %v5176_v20  ;;  %4441 = vmatpush3.bf16.msra.mxu0 %v5177_v45 }
 0xbd8   : > { %4420 = vmatprep.subr.bf16.mxu1 %v5178_v46  ;;  %4442 = vmatprep.subr.bf16.mxu0 %v5179_v47 }
 0xbdb   : > { %4421 = vmatpush3.bf16.msra.mxu1 %v5180_v48  ;;  %4443 = vmatpush3.bf16.msra.mxu0 %v5181_v15  ;;  %v4285_v48 = vld [vmem:[%s7730_s18] ss:$0 sm:$0xff] }
 0xbdc   : > { %4422 = vmatprep.subr.bf16.mxu1 %v5182_v49  ;;  %4444 = vmatprep.subr.bf16.mxu0 %v5183_v50 }
 0xbdf   : > { %4423 = vmatpush3.bf16.msra.mxu1 %v5184_v51  ;;  %4445 = vmatpush3.bf16.msra.mxu0 %v5185_v52 }
 0xbe0   : > { %4424 = vmatprep.subr.bf16.mxu1 %v5186_v53  ;;  %4446 = vmatprep.subr.bf16.mxu0 %v5187_v54 }
 0xbe3   : > { %4425 = vmatpush3.bf16.msra.mxu1 %v5188_v3  ;;  %4447 = vmatpush3.bf16.msra.mxu0 %v5189_v55 }
 0xbe4   : > { %4426 = vmatprep.subr.bf16.mxu1 %v5190_v56  ;;  %4448 = vmatprep.subr.bf16.mxu0 %v5191_v57 }
 0xbe7   : > { %4427 = vmatpush3.bf16.msra.mxu1 %v5192_v58  ;;  %4449 = vmatpush3.bf16.msra.mxu0 %v5193_v59  ;;  %v5206_v59 = vld [vmem:[%s7732_s0] sm:$0xff] (!%p4318_p0)  }
 0xbe8   : > { %4603 = vmatprep.subr.bf16.mxu0 (!%p4318_p0), %v6306_v60  ;;  %4623 = vmatprep.subr.bf16.mxu1 (!%p4318_p0), %v6306_v60 }
 0xc9d   : > { %v2815_v8 = vpop.f32.mrb[0].mxu1  ;;  %v2856_v9 = vpop.f32.mrb[4].mxu0 }
 0xc9e   : > { %v2816_v10 = vadd.f32 %v2815_v8, %v2604_v4  ;;  %v2857_v11 = vadd.f32 %v2856_v9, %v2612_v5  ;;  %v2817_v12 = vpop.f32.mrb[1].mxu1  ;;  %v2858_v13 = vpop.f32.mrb[5].mxu0  ;;  %v5210_v4 = vld [vmem:[%s7733_s14 + $0x20] sm:$0xff] (!%p4318_p0)   ;;  %v5211_v5 = vld [vmem:[%s7733_s14 + $0x28] sm:$0xff] (!%p4318_p0)  }
 0xc9f   : > { %v2818_v14 = vadd.f32 %v2817_v12, %v2608_v6  ;;  %v2859_v16 = vadd.f32 %v2858_v13, %v2616_v7  ;;  %v2819_v17 = vpop.f32.mrb[2].mxu1  ;;  %v2860_v18 = vpop.f32.mrb[6].mxu0  ;;  %v5212_v6 = vld [vmem:[%s7733_s14 + $0x30] sm:$0xff] (!%p4318_p0)   ;;  %v5213_v7 = vld [vmem:[%s7733_s14 + $0x38] sm:$0xff] (!%p4318_p0)  }
 0xca0   : > { %v2867_v19 = vmul.f32 0.70710677, %v2816_v10  ;;  %v2869_v21 = vmul.f32 0.70710677, %v2857_v11  ;;  %v2820_v24 = vpop.f32.mrb[3].mxu1  ;;  %v2861_v25 = vpop.f32.mrb[7].mxu0 }
 0xca1   : > { %v2868_v22 = vmul.f32 0.70710677, %v2818_v14  ;;  %v2870_v23 = vmul.f32 0.70710677, %v2859_v16  ;;  %v2863_v30 = vmul.f32 0.5, %v2816_v10  ;;  %v2865_v33 = vmul.f32 0.5, %v2857_v11 }
 0xca2   : > { %5198 = verf.f32 %v2867_v19  ;;  %v2864_v34 = vmul.f32 0.5, %v2818_v14  ;;  %v2866_v37 = vmul.f32 0.5, %v2859_v16  ;;  %v4319_v12 = vld [vmem:[#allocation41] ss:$0 sm:$0xff] (!%p4318_p0)  ;;  %v4320_v14 = vld [vmem:[#allocation42] ss:$0 sm:$0xff] (!%p4318_p0) }
 0xca3   : > { %5200 = verf.f32 %v2869_v21  ;;  %v5214_v19 = vld [vmem:[%s7734_s8] sm:$0xff] (!%p4318_p0)   ;;  %v5215_v21 = vld [vmem:[%s7734_s8 + $0x8] sm:$0xff] (!%p4318_p0)  }
 0xca4   : > { %5202 = verf.f32 %v2868_v22  ;;  %v5216_v22 = vld [vmem:[%s7734_s8 + $0x10] sm:$0xff] (!%p4318_p0)   ;;  %v5218_v24 = vld [vmem:[%s7734_s8 + $0x20] sm:$0xff] (!%p4318_p0)   ;;  %v5219_v25 = vld [vmem:[%s7734_s8 + $0x28] sm:$0xff] (!%p4318_p0)  }
 0xca5   : > { %5204 = verf.f32 %v2870_v23  ;;  %v5217_v23 = vld [vmem:[%s7734_s8 + $0x18] sm:$0xff] (!%p4318_p0)  }
 0xcac   : > { %v5199_v26 = vpop.eup %5198 }
 0xcad   : > { %v5201_v27 = vpop.eup %5200  ;;  %v2875_v28 = vadd.f32 1.0, %v5199_v26  ;;  %v5220_v26 = vld [vmem:[%s7734_s8 + $0x30] sm:$0xff] (!%p4318_p0)  }
 0xcae   : > { %v5203_v29 = vpop.eup %5202  ;;  %v2877_v31 = vadd.f32 1.0, %v5201_v27  ;;  %v5221_v27 = vld [vmem:[%s7734_s8 + $0x38] sm:$0xff] (!%p4318_p0)  }
 0xcaf   : > { %v5205_v32 = vpop.eup %5204  ;;  %v2876_v35 = vadd.f32 1.0, %v5203_v29  ;;  %v2879_v36 = vmul.f32 %v2875_v28, %v2863_v30  ;;  %v4321_v28 = vld [vmem:[#allocation44] ss:$0 sm:$0xff] (!%p4318_p0) }
 0xcb0   : > { %v2878_v38 = vadd.f32 1.0, %v5205_v32  ;;  %v2881_v39 = vmul.f32 %v2877_v31, %v2865_v33 }
 0xcb1   : > { %v2880_v40 = vmul.f32 %v2876_v35, %v2864_v34  ;;  %v2948_v43 = vpack.c.bf16 %v2879_v36, %v2879_v36 }
 0xcb2   : > { %v2882_v41 = vmul.f32 %v2878_v38, %v2866_v37  ;;  %v2950_v45 = vpack.c.bf16 %v2881_v39, %v2881_v39 }
 0xcb3   : > { %v2949_v42 = vpack.c.bf16 %v2880_v40, %v2880_v40  ;;  %v5222_v40 = vld [vmem:[#allocation45] sm:$0xff] (!%p4318_p0)  }
 0xcb4   : > { %v2951_v20 = vpack.c.bf16 %v2882_v41, %v2882_v41  ;;  %v5223_v41 = vld [vmem:[#allocation45 + $0x8] sm:$0xff] (!%p4318_p0)  }
 0xcb5   : > { %3182 = vmatprep.mubr.bf16.mxu1 %v2949_v42  ;;  %v5224_v42 = vld [vmem:[#allocation45 + $0x10] sm:$0xff] (!%p4318_p0)  }
 0xcb6   : > { %3222 = vmatprep.mubr.bf16.mxu0 %v2951_v20  ;;  %3183 = vmatmul.mubr.bf16.vlgmr.msra.gmra.mrb[4].mxu1 %v2948_v43  ;;  %v5225_v43 = vld [vmem:[#allocation45 + $0x18] sm:$0xff] (!%p4318_p0)   ;;  %v5226_v20 = vld [vmem:[#allocation45 + $0x20] sm:$0xff] (!%p4318_p0)  }
 0xcb7   : > { %3223 = vmatmul.mubr.bf16.vlgmr.msra.gmra.mrb[8].mxu0 %v2950_v45  ;;  %4639 = vmatprep.mubr.msk.bf16.mxu1 (!%p4318_p0), %vm6307_vm15, %v6306_v60  ;;  %v5227_v45 = vld [vmem:[#allocation45 + $0x28] sm:$0xff] (!%p4318_p0)  }
 0xcb8   : > { %4604 = vmatpush3.bf16.msra.mxu0 (!%p4318_p0), %v5206_v59  ;;  %4619 = vmatprep.mubr.msk.bf16.mxu0 (!%p4318_p0), %vm6307_vm15, %v6306_v60 }
 0xcb9   : > { %4605 = vmatprep.subr.bf16.mxu0 (!%p4318_p0), %v6306_v60  ;;  %4624 = vmatpush3.bf16.msra.mxu1 (!%p4318_p0), %v5214_v19 }
 0xcba   : > { %4625 = vmatprep.subr.bf16.mxu1 (!%p4318_p0), %v6306_v60 }
 0xcbc   : > { %4606 = vmatpush3.bf16.msra.mxu0 (!%p4318_p0), %v5207_v61 }
 0xcbd   : > { %4607 = vmatprep.subr.bf16.mxu0 (!%p4318_p0), %v6306_v60  ;;  %4626 = vmatpush3.bf16.msra.mxu1 (!%p4318_p0), %v5215_v21 }
 0xcbe   : > { %4627 = vmatprep.subr.bf16.mxu1 (!%p4318_p0), %v6306_v60 }
 0xcc0   : > { %4608 = vmatpush3.bf16.msra.mxu0 (!%p4318_p0), %v5208_v1 }
 0xcc1   : > { %4609 = vmatprep.subr.bf16.mxu0 (!%p4318_p0), %v6306_v60  ;;  %4628 = vmatpush3.bf16.msra.mxu1 (!%p4318_p0), %v5216_v22 }
 0xcc2   : > { %4629 = vmatprep.subr.bf16.mxu1 (!%p4318_p0), %v6306_v60 }
 0xcc4   : > { %4610 = vmatpush3.bf16.msra.mxu0 (!%p4318_p0), %v5209_v2 }
 0xcc5   : > { %4611 = vmatprep.subr.bf16.mxu0 (!%p4318_p0), %v6306_v60  ;;  %4630 = vmatpush3.bf16.msra.mxu1 (!%p4318_p0), %v5217_v23 }
 0xcc6   : > { %4631 = vmatprep.subr.bf16.mxu1 (!%p4318_p0), %v6306_v60 }
 0xcc8   : > { %4612 = vmatpush3.bf16.msra.mxu0 (!%p4318_p0), %v5210_v4 }
 0xcc9   : > { %4613 = vmatprep.subr.bf16.mxu0 (!%p4318_p0), %v6306_v60  ;;  %4632 = vmatpush3.bf16.msra.mxu1 (!%p4318_p0), %v5218_v24 }
 0xcca   : > { %4633 = vmatprep.subr.bf16.mxu1 (!%p4318_p0), %v6306_v60 }
 0xccc   : > { %4614 = vmatpush3.bf16.msra.mxu0 (!%p4318_p0), %v5211_v5 }
 0xccd   : > { %4615 = vmatprep.subr.bf16.mxu0 (!%p4318_p0), %v6306_v60  ;;  %4634 = vmatpush3.bf16.msra.mxu1 (!%p4318_p0), %v5219_v25 }
 0xcce   : > { %4635 = vmatprep.subr.bf16.mxu1 (!%p4318_p0), %v6306_v60 }
 0xcd0   : > { %4616 = vmatpush3.bf16.msra.mxu0 (!%p4318_p0), %v5212_v6 }
 0xcd1   : > { %4617 = vmatprep.subr.bf16.mxu0 (!%p4318_p0), %v6306_v60  ;;  %4636 = vmatpush3.bf16.msra.mxu1 (!%p4318_p0), %v5220_v26 }
 0xcd2   : > { %4637 = vmatprep.subr.bf16.mxu1 (!%p4318_p0), %v6306_v60 }
 0xcd4   : > { %4618 = vmatpush3.bf16.msra.mxu0 (!%p4318_p0), %v5213_v7 }
 0xcd5   : > { %4643 = vmatprep.subr.bf16.mxu0 (!%p4318_p0), %v6306_v60  ;;  %4638 = vmatpush3.bf16.msra.mxu1 (!%p4318_p0), %v5221_v27 }
 0xd89   : > { %v4428_v46 = vpop.f32.mrb[4].mxu1 }
 0xd8a   : > { %v4450_v47 = vpop.f32.mrb[8].mxu0  ;;  %v4429_v15 = vpop.f32.mrb[5].mxu1 }
 0xd8b   : > { %v4430_v49 = vadd.f32 %v4429_v15, %v4428_v46  ;;  %v4451_v50 = vpop.f32.mrb[9].mxu0  ;;  %v4431_v51 = vpop.f32.mrb[6].mxu1  ;;  %v5228_v46 = vld [vmem:[#allocation45 + $0x30] sm:$0xff] (!%p4318_p0)  }
 0xd8c   : > { %v4452_v52 = vadd.f32 %v4451_v50, %v4450_v47  ;;  %v4453_v53 = vpop.f32.mrb[10].mxu0  ;;  %v4432_v54 = vpop.f32.mrb[7].mxu1  ;;  %v5229_v47 = vld [vmem:[#allocation45 + $0x38] sm:$0xff] (!%p4318_p0)  }
 0xd8d   : > { %v3185_v3 = vadd.f32 %v4430_v49, %v4285_v48  ;;  %v4454_v55 = vpop.f32.mrb[11].mxu0  ;;  %3235 = sbr.rel (%p4318_p0) target bundleno = 4499 (0x1193), region = 276  ;;  %v4331_v48 = vld [vmem:[%s7735_s28] ss:$0 sm:$0xff] (!%p4318_p0) }
 0xd8f   : > { %v3225_v56 = vadd.f32 %v4452_v52, %v3185_v3 }
 0xd91   : > { %v3230_v57 = vadd.f32 %v3225_v56, %v7330_v44 }
 0xd93   : > { %3231 = vst [vmem:[#allocation2] sm:$0xff] %v3230_v57 }
 0xd9a   : > { %v3236_v58 = vld [vmem:[#allocation2] sm:$0xff] }
 0xd9b   : > { %3239 = vadd.xlane.f32.xlu0 %v3236_v58 }
 0xe28   : > { %v3240_v44 = vpop.xlane.xlu0 %3239 }
 0xe29   : > { %v3241_v62 = vmul.f32 0.0078125, %v3240_v44 }
 0xe2b   : > { %v3242_v63 = vsub.f32 %v3236_v58, %v3241_v62  ;;  %v4341_v58 = vld [vmem:[%s7736_s26] ss:$0 sm:$0xff] }
 0xe2d   : > { %v3243_v0 = vmul.f32 %v3242_v63, %v3242_v63 }
 0xe2f   : > { %3244 = vadd.xlane.f32.xlu0 %v3243_v0 }
 0xebc   : > { %v3245_v8 = vpop.xlane.xlu0 %3244 }
 0xebd   : > { %v3246_v9 = vmul.f32 0.0078125, %v3245_v8 }
 0xebf   : > { %v3247_v10 = vadd.f32 1e-05, %v3246_v9 }
 0xec1   : > { %5230 = vrsqrt.f32 %v3247_v10 }
 0xecb   : > { %v5231_v11 = vpop.eup %5230 }
 0xecc   : > { %v3249_v13 = vmul.f32 %v5231_v11, %v3242_v63 }
 0xece   : > { %v3256_v16 = vmul.f32 %v4319_v12, %v3249_v13 }
 0xed0   : > { %v3263_v17 = vadd.f32 %v4320_v14, %v3256_v16 }
 0xed2   : > { %v3281_v18 = vpack.c.bf16 %v3263_v17, %v3263_v17 }
 0xed4   : > { %4620 = vmatmul.mubr.bf16.vlgmr.msra.gmra.mrb[0].mxu0 %v3281_v18 }
 0xed5   : > { %4659 = vmatprep.mubr.msk.bf16.mxu0 %vm6307_vm15, %v6306_v60  ;;  %4644 = vmatpush3.bf16.msra.mxu0 %v5222_v40 }
 0xed6   : > { %4645 = vmatprep.subr.bf16.mxu0 %v6306_v60 }
 0xed9   : > { %4646 = vmatpush3.bf16.msra.mxu0 %v5223_v41 }
 0xeda   : > { %4647 = vmatprep.subr.bf16.mxu0 %v6306_v60 }
 0xedd   : > { %4648 = vmatpush3.bf16.msra.mxu0 %v5224_v42 }
 0xede   : > { %4649 = vmatprep.subr.bf16.mxu0 %v6306_v60 }
 0xee1   : > { %4650 = vmatpush3.bf16.msra.mxu0 %v5225_v43 }
 0xee2   : > { %4651 = vmatprep.subr.bf16.mxu0 %v6306_v60 }
 0xee5   : > { %4652 = vmatpush3.bf16.msra.mxu0 %v5226_v20 }
 0xee6   : > { %4653 = vmatprep.subr.bf16.mxu0 %v6306_v60 }
 0xee9   : > { %4654 = vmatpush3.bf16.msra.mxu0 %v5227_v45 }
 0xeea   : > { %4655 = vmatprep.subr.bf16.mxu0 %v6306_v60 }
 0xeed   : > { %4656 = vmatpush3.bf16.msra.mxu0 %v5228_v46 }
 0xeee   : > { %4657 = vmatprep.subr.bf16.mxu0 %v6306_v60 }
 0xef1   : > { %4658 = vmatpush3.bf16.msra.mxu0 %v5229_v47 }
 0xfa7   : > { %v3370_v29 = vpop.f32.mrb[0].mxu0 }
 0xfa8   : > { %v3371_v30 = vadd.f32 %v4321_v28, %v3370_v29  ;;  %v4621_v31 = vpop.f32.mrb[1].mxu0 }
 0xfa9   : > { %v3373_v32 = vpop.f32.mrb[2].mxu0 }
 0xfaa   : > { %v4330_v33 = vmul.f32 -1.442695, %v3371_v30  ;;  %v4622_v34 = vpop.f32.mrb[3].mxu0 }
 0xfac   : > { %5232 = vpow2.f32 %v4330_v33 }
 0xfb6   : > { %v5233_v35 = vpop.eup %5232 }
 0xfb7   : > { %v3379_v36 = vadd.f32 1.0, %v5233_v35 }
 0xfb9   : > { %5234 = vrcp.f32 %v3379_v36 }
 0xfc3   : > { %v5235_v37 = vpop.eup %5234 }
 0xfc4   : > { %v3382_v38 = vmul.f32 %v5235_v37, %v3371_v30 }
 0xfc6   : > { %v3400_v39 = vpack.c.bf16 %v3382_v38, %v3382_v38 }
 0xfc8   : > { %4640 = vmatmul.mubr.bf16.vlgmr.msra.gmra.mrb[0].mxu1 %v3400_v39 }
0x109b   : > { %v3489_v15 = vpop.f32.mrb[0].mxu1 }
0x109c   : > { %v3490_v49 = vadd.f32 %v4331_v48, %v3489_v15  ;;  %v4641_v50 = vpop.f32.mrb[1].mxu1 }
0x109d   : > { %v3492_v51 = vpop.f32.mrb[2].mxu1 }
0x109e   : > { %v4340_v52 = vmul.f32 -1.442695, %v3490_v49  ;;  %v4642_v53 = vpop.f32.mrb[3].mxu1 }
0x10a0   : > { %5236 = vpow2.f32 %v4340_v52 }
0x10aa   : > { %v5237_v54 = vpop.eup %5236 }
0x10ab   : > { %v3498_v3 = vadd.f32 1.0, %v5237_v54 }
0x10ad   : > { %5238 = vrcp.f32 %v3498_v3 }
0x10b7   : > { %v5239_v55 = vpop.eup %5238 }
0x10b8   : > { %v3501_v56 = vmul.f32 %v5239_v55, %v3490_v49 }
0x10ba   : > { %v3519_v57 = vpack.c.bf16 %v3501_v56, %v3501_v56 }
0x10bc   : > { %4660 = vmatmul.mubr.bf16.vlgmr.msra.gmra.mrb[4].mxu0 %v3519_v57 }
0x118f   : > { %v3608_v59 = vpop.f32.mrb[4].mxu0 }
0x1190   : > { %v3609_v60 = vadd.f32 %v4341_v58, %v3608_v59  ;;  %v4661_v61 = vpop.f32.mrb[5].mxu0 }
0x1191   : > { %v3611_v44 = vpop.f32.mrb[6].mxu0 }
0x1192   : > { %3614 = vst [vmem:[%s7240_s13] sm:$0xff] %v3609_v60  ;;  %v4662_v62 = vpop.f32.mrb[7].mxu0 }
0x1193 PF: > { %s7737_s25 = sld [smem:[#allocation104_spill]]  ;;  %s3629_s21 = sshll.u32 %s7240_s13, 4  ;;  %s3630_s21 = int_to_ptr.vmem [resolvable:$true] %s3629_s21 }
0x1194   : > { %s7738_s2 = sld [smem:[#allocation99_spill]]  ;;  %s3616_s11 = scalar_lea.sflag [#allocation5], %s7137_s9 }
0x1195   : > { %s6044_s5 = scalar_lea.vmem %s3630_s21, 128  ;;  %p7740_p1 = scmp.ne.s32.totalorder %s7680_s27, 0 }
0x1196   : > { %p6045_p4 = scmp.ne.s32.totalorder %s3630_s21, %s6044_s5  ;;  %s6308_s12 = smov [#allocation47]  }
0x1197   : > { %s6048_s3 = sshll.u32 %s6308_s12, 4  ;;  %s6049_s3 = int_to_ptr.vmem [resolvable:$false] %s6048_s3 }
0x1198   : > { %p6046_p2 = pnand %p6045_p4, %p7740_p1  ;;  %s6050_s10 = scalar_lea.vmem %s6049_s3, 256 }
0x1199   : > { %s4351_s22 = sshll.u32 %s7737_s25, 7  ;;  %p6051_p10 = scmp.lt.s32.totalorder %s3630_s21, %s6049_s3 }
0x119a   : > { %s7739_s24 = smov %s7738_s2  ;;  %s7458_s23 = scalar_lea.hbm %s7738_s2, %s4351_s22 }
0x119b   : > { %p6047_p9 = pneg %p6046_p2  ;;  %p6052_p3 = scmp.lt.s32.totalorder %s6050_s10, %s6044_s5 }
0x119d   : > { %p6053_p6 = por %p6052_p3, %p6051_p10 }
0x119f   : > { %p6054_p5 = pnand %p6053_p6, %p6047_p9 }
0x11a1   : > { %6057 = shalt.err (!%p6054_p5)
}
0x11a2   : > { %s6058_s9 = scalar_lea.hbm %s7458_s23, 128  ;;  %s6062_s13 = scalar_lea.hbm %s7739_s24, 256 }
0x11a3   : > { %p6059_p7 = scmp.ne.s32.totalorder %s7458_s23, %s6058_s9  ;;  %p6063_p11 = scmp.lt.u32.totalorder %s7458_s23, %s7739_s24 }
0x11a4   : > { %p6064_p13 = scmp.lt.u32.totalorder %s6062_s13, %s6058_s9  ;;  %p6066_p4 = scmp.lt.u32.totalorder %s6058_s9, %s7458_s23 }
0x11a5   : > { %p6060_p8 = pnand %p6059_p7, %p7740_p1 }
0x11a6   : > { %p6065_p0 = por %p6064_p13, %p6063_p11 }
0x11a7   : > { %p6061_p12 = pneg %p6060_p8 }
0x11a8   : > { %p6067_p2 = por %p6066_p4, %p6065_p0 }
0x11aa   : > { %p6068_p9 = pnand %p6067_p2, %p6061_p12 }
0x11ac   : > { %6071 = shalt.err (!%p6068_p9)
}
0x11ad   : > { %4759 = dma.vmem_to_hbm [thread:$0]  (%p7740_p1), %s3630_s21, 128, %s7458_s23, %s3616_s11  }
0x11ae PF: > { %s7741_s19 = sld [smem:[#allocation100_spill]]  ;;  %p4888_p10 = scmp.ge.s32.totalorder %s6226_s7, 2 }
0x11af   : > { %p7742_p3 = scmp.ne.s32.totalorder %s7681_s17, 0 }
0x11b1   : > { %p4848_p6 = pnand %p4888_p10, %p7742_p3 }
0x11b4   : > { %s3641_s18 = sand.u32 1, %s7741_s19  }
0x11b5   : > { %s3642_s6 = scalar_lea.sflag [#allocation5], %s3641_s18 }
0x11b6   : > { %6181 = dma.done.wait (!%p4848_p6), %s3642_s6, 128  }
0x11b7   : > { %6183 = vsyncadd (!%p4848_p6), %s3642_s6, 4294967168  ;;  %s109_s7 = sadd.s32 1, %s6226_s7   ;;  %s7743_s18 = sld [smem:[#allocation101_spill]] }
0x11b8   : > { %p106_p5 = scmp.ge.s32.totalorder %s109_s7, 6   ;;  %s7744_s22 = sld [smem:[#allocation102_spill]] }
0x11b9   : > { %s7745_s28 = sld [smem:[#allocation105_spill]]  ;;  %s7746_s27 = sld [smem:[#allocation107_spill]] }
0x11ba   : > { %s7747_s2 = sld [smem:[#allocation108_spill]]  ;;  %s7748_s0 = smov %s6190_s15 }
0x11bb   : > { %s7749_s15 = smov %s6194_s16  ;;  %s7750_s16 = smov %s6945_s20 }
0x11bc   : > { %s7751_s23 = smov %s7761_s4  ;;  %s7752_s26 = smov %s6218_s1 }
0x11bd   :  { %108 = sbr.rel (!%p106_p5) target bundleno = 101 (0x65), region = 430 }
0x11bf   : > { %s7753_s1 = smov %s7746_s27 }
0x11c4   :  { %3647 = vsyncpa [#allocation4], 1 }
0x11c5   :  { %3649 = vsyncpa [#allocation4 + $0x1], 1 }
0x11c6   :  { %3650 = vsyncpa [#allocation7], 1 }
0x11c7   :  { %3651 = vsyncpa [#allocation10], 1 }
0x11c8   :  { %3652 = vsyncpa [#allocation13], 1 }
0x11c9   :  { %3653 = vsyncpa [#allocation16], 1 }
0x11ca   :  { %3654 = vsyncpa [#allocation19], 1 }
0x11cb   :  { %3655 = vsyncpa [#allocation22], 1 }
0x11cc   :  { %3656 = vsyncpa [#allocation25], 1 }
0x11cd   :  { %3657 = vsyncpa [#allocation28], 1 }
0x11ce   :  { %3659 = vsyncpa [#allocation28 + $0x1], 1 }
0x11cf   :  { %3660 = vsyncpa [#allocation31], 1 }
0x11d0   :  { %3662 = vsyncpa [#allocation31 + $0x1], 1 }
0x11d1   :  { %3663 = vsyncpa [#allocation34], 1 }
0x11d2   :  { %3665 = vsyncpa [#allocation34 + $0x1], 1 }
0x11d3   :  { %3666 = vsyncpa [#allocation37], 1 }
0x11d4   :  { %3668 = vsyncpa [#allocation37 + $0x1], 1 }
0x11d5   :  { %3669 = vsyncpa [#allocation40], 1 }
0x11d6   :  { %3671 = vsyncpa [#allocation40 + $0x1], 1 }
0x11d7   :  { %3672 = vsyncpa [#allocation43], 1 }
0x11d8   :  { %3673 = vsyncpa [#allocation46], 1 }
0x11d9   :  { %3674 = vsyncpa [#allocation5], 1 }
0x11da   :  { %3676 = vsyncpa [#allocation5 + $0x1], 1 }

</bundles_post_ra>
